<compile_context>
chip_gen: v7x
topology: tpu7x:2x2x1
jax: 0.10.0
libtpu: 0.0.40
codegen_flags: <defaults>
</compile_context>

<pallas_src>
import jax
import jax.numpy as jnp
from jax.experimental import pallas as pl
from jax.experimental.pallas import tpu as pltpu

EPS = 1e-5
GROUPS = 32  # nn.GroupNorm(32, out_channels)


# ------------------------------- Pallas kernel -------------------------------

def _corblock_rt_kernel(xpad_ref, state_ref, w_in_ref, bias_in_ref,
                        gamma_in_ref, beta_in_ref, w1_ref,
                        gamma1_ref, beta1_ref, gmat_ref,
                        out_ref, ypad_ref):
    _, H, W, C = out_ref.shape
    CIN = xpad_ref.shape[3]
    n_per_group = (C // GROUPS) * H * W

    def group_norm_relu(x, gamma, beta):
        # Per-(sample, group) statistics; group aggregation via membership matmul (C,C).
        gsum = jnp.dot(jnp.sum(x, axis=0, keepdims=True), gmat_ref[...],
                       preferred_element_type=jnp.float32)
        mean = gsum * (1.0 / n_per_group)
        centered = x - mean                               # two-pass (stable) variance
        gss = jnp.dot(jnp.sum(centered * centered, axis=0, keepdims=True), gmat_ref[...],
                      preferred_element_type=jnp.float32)
        inv = jax.lax.rsqrt(gss * (1.0 / n_per_group) + EPS)
        return jnp.maximum(centered * (gamma * inv) + beta, 0.0)

    # ---- conv_input: 3x3, stride 1, pad 1, with bias — nine shifted matmuls ----
    acc = jnp.zeros((H * W, C), jnp.float32)
    for kh in range(3):
        for kw in range(3):
            patch = xpad_ref[0, kh:kh + H, kw:kw + W, :].reshape(H * W, CIN)
            wslc = w_in_ref[(kh * 3 + kw) * CIN:(kh * 3 + kw + 1) * CIN, :]
            acc += jnp.dot(patch, wslc, preferred_element_type=jnp.float32)
    acc += bias_in_ref[...]

    inp = group_norm_relu(acc, gamma_in_ref[...], beta_in_ref[...])

    # ---- skip = inp + state, staged into a zero-padded VMEM scratch for conv1 ----
    skip = inp + state_ref[0].reshape(H * W, C)
    ypad_ref[...] = jnp.zeros_like(ypad_ref)              # zero halo every step (megacore-safe)
    ypad_ref[1:H + 1, 1:W + 1, :] = skip.reshape(H, W, C)

    # ---- conv1: 3x3, stride 1, pad 1, no bias — from the VMEM-resident skip ----
    acc2 = jnp.zeros((H * W, C), jnp.float32)
    for kh in range(3):
        for kw in range(3):
            patch = ypad_ref[kh:kh + H, kw:kw + W, :].reshape(H * W, C)
            wslc = w1_ref[(kh * 3 + kw) * C:(kh * 3 + kw + 1) * C, :]
            acc2 += jnp.dot(patch, wslc, preferred_element_type=jnp.float32)

    out = group_norm_relu(acc2, gamma1_ref[...], beta1_ref[...])
    out_ref[...] = out.reshape(1, H, W, C)


# ----------------------------- wrapper (NCHW API) -----------------------------

def corblock_rt_forward(x_nchw, params, state_nchw=None):
    """Returns (output, state), both NCHW, matching CORblock_RT.forward(inp, state)."""
    n, cin, h, w = x_nchw.shape
    c = params["conv_input_w"].shape[0]

    x = jnp.transpose(x_nchw, (0, 2, 3, 1)).astype(jnp.float32)           # NCHW -> NHWC
    xpad = jnp.pad(x, ((0, 0), (1, 1), (1, 1), (0, 0)))                   # spatial halo only
    if state_nchw is None:
        state = jnp.zeros((n, h, w, c), jnp.float32)
    else:
        state = jnp.transpose(state_nchw, (0, 2, 3, 1)).astype(jnp.float32)

    # Conv weights OIHW -> flattened HWIO rows, matching the kernel's [kh, kw, ci] order.
    w_in = jnp.transpose(params["conv_input_w"], (2, 3, 1, 0)).reshape(9 * cin, c)
    w1 = jnp.transpose(params["conv1_w"], (2, 3, 1, 0)).reshape(9 * c, c)
    bias_in = params["conv_input_b"].reshape(1, c).astype(jnp.float32)
    gamma_in = params["norm_input_g"].reshape(1, c).astype(jnp.float32)
    beta_in = params["norm_input_b"].reshape(1, c).astype(jnp.float32)
    gamma1 = params["norm1_g"].reshape(1, c).astype(jnp.float32)
    beta1 = params["norm1_b"].reshape(1, c).astype(jnp.float32)

    # Group-membership matrix: M[c1, c2] = 1 iff channels c1, c2 share a GroupNorm group.
    cpg = c // GROUPS
    gids = jnp.arange(c) // cpg
    gmat = (gids[:, None] == gids[None, :]).astype(jnp.float32)

    vec_spec = pl.BlockSpec((1, c), lambda b: (0, 0))
    out = pl.pallas_call(
        _corblock_rt_kernel,
        out_shape=jax.ShapeDtypeStruct((n, h, w, c), jnp.float32),
        grid=(n,),
        in_specs=[
            pl.BlockSpec((1, h + 2, w + 2, cin), lambda b: (b, 0, 0, 0)),
            pl.BlockSpec((1, h, w, c), lambda b: (b, 0, 0, 0)),
            pl.BlockSpec((9 * cin, c), lambda b: (0, 0)),
            vec_spec,                       # conv_input bias
            vec_spec, vec_spec,             # norm_input gamma / beta
            pl.BlockSpec((9 * c, c), lambda b: (0, 0)),
            vec_spec, vec_spec,             # norm1 gamma / beta
            pl.BlockSpec((c, c), lambda b: (0, 0)),
        ],
        out_specs=pl.BlockSpec((1, h, w, c), lambda b: (b, 0, 0, 0)),
        scratch_shapes=[pltpu.VMEM((h + 2, w + 2, c), jnp.float32)],
        compiler_params=pltpu.CompilerParams(dimension_semantics=("parallel",)),
    )(xpad, state, w_in, bias_in, gamma_in, beta_in, w1, gamma1, beta1, gmat)

    out_nchw = jnp.transpose(out, (0, 3, 1, 2))                           # NHWC -> NCHW
    return out_nchw, out_nchw


# ----------------------------- pure-JAX reference -----------------------------

def reference_forward(x_nchw, params, state_nchw=None):
    def conv(x, wgt, b=None):
        y = jax.lax.conv_general_dilated(
            x, wgt, (1, 1), ((1, 1), (1, 1)),
            dimension_numbers=("NCHW", "OIHW", "NCHW"),
            precision=jax.lax.Precision.HIGHEST)
        if b is not None:
            y = y + b[None, :, None, None]
        return y

    def group_norm(x, g, b):
        n, c, h, w = x.shape
        xg = x.reshape(n, GROUPS, c // GROUPS, h, w)
        mean = jnp.mean(xg, axis=(2, 3, 4), keepdims=True)
        var = jnp.var(xg, axis=(2, 3, 4), keepdims=True)
        xg = (xg - mean) * jax.lax.rsqrt(var + EPS)
        return xg.reshape(n, c, h, w) * g[None, :, None, None] + b[None, :, None, None]

    inp = jnp.maximum(group_norm(conv(x_nchw, params["conv_input_w"], params["conv_input_b"]),
                                 params["norm_input_g"], params["norm_input_b"]), 0.0)
    skip = inp + (state_nchw if state_nchw is not None else 0.0)
    out = jnp.maximum(group_norm(conv(skip, params["conv1_w"]),
                                 params["norm1_g"], params["norm1_b"]), 0.0)
    return out, out


# ------------------------------------ main ------------------------------------

def make_params(key, in_channels, out_channels):
    ks = iter(jax.random.split(key, 8))
    return {
        "conv_input_w": 0.1 * jax.random.normal(next(ks), (out_channels, in_channels, 3, 3), jnp.float32),
        "conv_input_b": 0.1 * jax.random.normal(next(ks), (out_channels,), jnp.float32),
        "conv1_w":      0.1 * jax.random.normal(next(ks), (out_channels, out_channels, 3, 3), jnp.float32),
        "norm_input_g": 1.0 + 0.1 * jax.random.normal(next(ks), (out_channels,), jnp.float32),
        "norm_input_b": 0.1 * jax.random.normal(next(ks), (out_channels,), jnp.float32),
        "norm1_g":      1.0 + 0.1 * jax.random.normal(next(ks), (out_channels,), jnp.float32),
        "norm1_b":      0.1 * jax.random.normal(next(ks), (out_channels,), jnp.float32),
    }


if __name__ == "__main__":
    key = jax.random.PRNGKey(0)
    k_x, k_s, k_p = jax.random.split(key, 3)

    # GroupNorm(32, out_channels) requires out_channels % 32 == 0.
    batch, in_channels, out_channels, spatial = 2, 4, 64, 16
    x = jax.random.normal(k_x, (batch, in_channels, spatial, spatial), jnp.float32)
    state_in = jax.random.normal(k_s, (batch, out_channels, spatial, spatial), jnp.float32)
    params = make_params(k_p, in_channels, out_channels)

    fwd = jax.jit(corblock_rt_forward)

    # Timestep 0: no recurrent state (state = 0 path).
    out0, st0 = fwd(x, params)
    out0 = jax.block_until_ready(out0)
    # Timestep 1: with a recurrent state (exercises the skip = inp + state path).
    out1, st1 = fwd(x, params, state_in)
    out1 = jax.block_until_ready(out1)

    ref0, _ = reference_forward(x, params)
    ref1, _ = reference_forward(x, params, state_in)

    assert out0.shape == (batch, out_channels, spatial, spatial)
    assert jnp.allclose(out0, ref0, rtol=1e-2, atol=1e-2), float(jnp.max(jnp.abs(out0 - ref0)))
    assert jnp.allclose(out1, ref1, rtol=1e-2, atol=1e-2), float(jnp.max(jnp.abs(out1 - ref1)))

    print("KERNEL_OK")
</pallas_src>

<mosaic_0001>
module attributes {stable_mosaic.version = 11 : i64} {
  func.func @_corblock_rt_kernel(%arg0: i32, %arg1: memref<1x18x18x4xf32, #tpu.memory_space<vmem>>, %arg2: memref<1x16x16x64xf32, #tpu.memory_space<vmem>>, %arg3: memref<36x64xf32, #tpu.memory_space<vmem>>, %arg4: memref<1x64xf32, #tpu.memory_space<vmem>>, %arg5: memref<1x64xf32, #tpu.memory_space<vmem>>, %arg6: memref<1x64xf32, #tpu.memory_space<vmem>>, %arg7: memref<576x64xf32, #tpu.memory_space<vmem>>, %arg8: memref<1x64xf32, #tpu.memory_space<vmem>>, %arg9: memref<1x64xf32, #tpu.memory_space<vmem>>, %arg10: memref<64x64xf32, #tpu.memory_space<vmem>>, %arg11: memref<1x16x16x64xf32, #tpu.memory_space<vmem>>, %arg12: memref<18x18x64xf32, #tpu.memory_space<vmem>>) attributes {dimension_semantics = [#tpu.dimension_semantics<parallel>], iteration_bounds = array<i64: 2>, scalar_prefetch = 0 : i64, scratch_operands = 1 : i64, tpu.core_type = #tpu.core_type<tc>, window_params = [{transform_indices = @transform_0, window_bounds = array<i64: 1, 18, 18, 4>}, {transform_indices = @transform_1, window_bounds = array<i64: 1, 16, 16, 64>}, {pipeline_mode = #tpu.pipeline_mode<synchronous>, transform_indices = @transform_2, window_bounds = array<i64: 36, 64>}, {pipeline_mode = #tpu.pipeline_mode<synchronous>, transform_indices = @transform_3, window_bounds = array<i64: 1, 64>}, {pipeline_mode = #tpu.pipeline_mode<synchronous>, transform_indices = @transform_4, window_bounds = array<i64: 1, 64>}, {pipeline_mode = #tpu.pipeline_mode<synchronous>, transform_indices = @transform_5, window_bounds = array<i64: 1, 64>}, {pipeline_mode = #tpu.pipeline_mode<synchronous>, transform_indices = @transform_6, window_bounds = array<i64: 576, 64>}, {pipeline_mode = #tpu.pipeline_mode<synchronous>, transform_indices = @transform_7, window_bounds = array<i64: 1, 64>}, {pipeline_mode = #tpu.pipeline_mode<synchronous>, transform_indices = @transform_8, window_bounds = array<i64: 1, 64>}, {pipeline_mode = #tpu.pipeline_mode<synchronous>, transform_indices = @transform_9, window_bounds = array<i64: 64, 64>}, {transform_indices = @transform_10, window_bounds = array<i64: 1, 16, 16, 64>}]} {
    %cst = arith.constant 0.000000e+00 : f32
    %0 = vector.broadcast %cst : f32 to vector<256x64xf32>
    %c0 = arith.constant 0 : index
    %c0_0 = arith.constant 0 : index
    %c0_1 = arith.constant 0 : index
    %c0_2 = arith.constant 0 : index
    %1 = vector.load %arg1[%c0, %c0_0, %c0_1, %c0_2] : memref<1x18x18x4xf32, #tpu.memory_space<vmem>>, vector<1x16x16x4xf32>
    %2 = vector.shape_cast %1 : vector<1x16x16x4xf32> to vector<16x16x4xf32>
    %3 = vector.shape_cast %2 : vector<16x16x4xf32> to vector<256x4xf32>
    %c0_3 = arith.constant 0 : index
    %c0_4 = arith.constant 0 : index
    %4 = vector.load %arg3[%c0_3, %c0_4] : memref<36x64xf32, #tpu.memory_space<vmem>>, vector<4x64xf32>
    %cst_5 = arith.constant dense<0.000000e+00> : vector<256x64xf32>
    %5 = tpu.matmul %3, %4, %cst_5 {dimension_numbers = #tpu.dot_dimension_numbers<[1], [0], [0], [1], [0, 0, 1, 1], [], []>} : vector<256x4xf32>, vector<4x64xf32>, vector<256x64xf32> -> vector<256x64xf32>
    %6 = arith.addf %0, %5 : vector<256x64xf32>
    %c0_6 = arith.constant 0 : index
    %c0_7 = arith.constant 0 : index
    %c1 = arith.constant 1 : index
    %c0_8 = arith.constant 0 : index
    %7 = vector.load %arg1[%c0_6, %c0_7, %c1, %c0_8] : memref<1x18x18x4xf32, #tpu.memory_space<vmem>>, vector<1x16x16x4xf32>
    %8 = vector.shape_cast %7 : vector<1x16x16x4xf32> to vector<16x16x4xf32>
    %9 = vector.shape_cast %8 : vector<16x16x4xf32> to vector<256x4xf32>
    %c4 = arith.constant 4 : index
    %c0_9 = arith.constant 0 : index
    %10 = vector.load %arg3[%c4, %c0_9] : memref<36x64xf32, #tpu.memory_space<vmem>>, vector<4x64xf32>
    %cst_10 = arith.constant dense<0.000000e+00> : vector<256x64xf32>
    %11 = tpu.matmul %9, %10, %cst_10 {dimension_numbers = #tpu.dot_dimension_numbers<[1], [0], [0], [1], [0, 0, 1, 1], [], []>} : vector<256x4xf32>, vector<4x64xf32>, vector<256x64xf32> -> vector<256x64xf32>
    %12 = arith.addf %6, %11 : vector<256x64xf32>
    %c0_11 = arith.constant 0 : index
    %c0_12 = arith.constant 0 : index
    %c2 = arith.constant 2 : index
    %c0_13 = arith.constant 0 : index
    %13 = vector.load %arg1[%c0_11, %c0_12, %c2, %c0_13] : memref<1x18x18x4xf32, #tpu.memory_space<vmem>>, vector<1x16x16x4xf32>
    %14 = vector.shape_cast %13 : vector<1x16x16x4xf32> to vector<16x16x4xf32>
    %15 = vector.shape_cast %14 : vector<16x16x4xf32> to vector<256x4xf32>
    %c8 = arith.constant 8 : index
    %c0_14 = arith.constant 0 : index
    %16 = vector.load %arg3[%c8, %c0_14] : memref<36x64xf32, #tpu.memory_space<vmem>>, vector<4x64xf32>
    %cst_15 = arith.constant dense<0.000000e+00> : vector<256x64xf32>
    %17 = tpu.matmul %15, %16, %cst_15 {dimension_numbers = #tpu.dot_dimension_numbers<[1], [0], [0], [1], [0, 0, 1, 1], [], []>} : vector<256x4xf32>, vector<4x64xf32>, vector<256x64xf32> -> vector<256x64xf32>
    %18 = arith.addf %12, %17 : vector<256x64xf32>
    %c0_16 = arith.constant 0 : index
    %c1_17 = arith.constant 1 : index
    %c0_18 = arith.constant 0 : index
    %c0_19 = arith.constant 0 : index
    %19 = vector.load %arg1[%c0_16, %c1_17, %c0_18, %c0_19] : memref<1x18x18x4xf32, #tpu.memory_space<vmem>>, vector<1x16x16x4xf32>
    %20 = vector.shape_cast %19 : vector<1x16x16x4xf32> to vector<16x16x4xf32>
    %21 = vector.shape_cast %20 : vector<16x16x4xf32> to vector<256x4xf32>
    %c12 = arith.constant 12 : index
    %c0_20 = arith.constant 0 : index
    %22 = vector.load %arg3[%c12, %c0_20] : memref<36x64xf32, #tpu.memory_space<vmem>>, vector<4x64xf32>
    %cst_21 = arith.constant dense<0.000000e+00> : vector<256x64xf32>
    %23 = tpu.matmul %21, %22, %cst_21 {dimension_numbers = #tpu.dot_dimension_numbers<[1], [0], [0], [1], [0, 0, 1, 1], [], []>} : vector<256x4xf32>, vector<4x64xf32>, vector<256x64xf32> -> vector<256x64xf32>
    %24 = arith.addf %18, %23 : vector<256x64xf32>
    %c0_22 = arith.constant 0 : index
    %c1_23 = arith.constant 1 : index
    %c1_24 = arith.constant 1 : index
    %c0_25 = arith.constant 0 : index
    %25 = vector.load %arg1[%c0_22, %c1_23, %c1_24, %c0_25] : memref<1x18x18x4xf32, #tpu.memory_space<vmem>>, vector<1x16x16x4xf32>
    %26 = vector.shape_cast %25 : vector<1x16x16x4xf32> to vector<16x16x4xf32>
    %27 = vector.shape_cast %26 : vector<16x16x4xf32> to vector<256x4xf32>
    %c16 = arith.constant 16 : index
    %c0_26 = arith.constant 0 : index
    %28 = vector.load %arg3[%c16, %c0_26] : memref<36x64xf32, #tpu.memory_space<vmem>>, vector<4x64xf32>
    %cst_27 = arith.constant dense<0.000000e+00> : vector<256x64xf32>
    %29 = tpu.matmul %27, %28, %cst_27 {dimension_numbers = #tpu.dot_dimension_numbers<[1], [0], [0], [1], [0, 0, 1, 1], [], []>} : vector<256x4xf32>, vector<4x64xf32>, vector<256x64xf32> -> vector<256x64xf32>
    %30 = arith.addf %24, %29 : vector<256x64xf32>
    %c0_28 = arith.constant 0 : index
    %c1_29 = arith.constant 1 : index
    %c2_30 = arith.constant 2 : index
    %c0_31 = arith.constant 0 : index
    %31 = vector.load %arg1[%c0_28, %c1_29, %c2_30, %c0_31] : memref<1x18x18x4xf32, #tpu.memory_space<vmem>>, vector<1x16x16x4xf32>
    %32 = vector.shape_cast %31 : vector<1x16x16x4xf32> to vector<16x16x4xf32>
    %33 = vector.shape_cast %32 : vector<16x16x4xf32> to vector<256x4xf32>
    %c20 = arith.constant 20 : index
    %c0_32 = arith.constant 0 : index
    %34 = vector.load %arg3[%c20, %c0_32] : memref<36x64xf32, #tpu.memory_space<vmem>>, vector<4x64xf32>
    %cst_33 = arith.constant dense<0.000000e+00> : vector<256x64xf32>
    %35 = tpu.matmul %33, %34, %cst_33 {dimension_numbers = #tpu.dot_dimension_numbers<[1], [0], [0], [1], [0, 0, 1, 1], [], []>} : vector<256x4xf32>, vector<4x64xf32>, vector<256x64xf32> -> vector<256x64xf32>
    %36 = arith.addf %30, %35 : vector<256x64xf32>
    %c0_34 = arith.constant 0 : index
    %c2_35 = arith.constant 2 : index
    %c0_36 = arith.constant 0 : index
    %c0_37 = arith.constant 0 : index
    %37 = vector.load %arg1[%c0_34, %c2_35, %c0_36, %c0_37] : memref<1x18x18x4xf32, #tpu.memory_space<vmem>>, vector<1x16x16x4xf32>
    %38 = vector.shape_cast %37 : vector<1x16x16x4xf32> to vector<16x16x4xf32>
    %39 = vector.shape_cast %38 : vector<16x16x4xf32> to vector<256x4xf32>
    %c24 = arith.constant 24 : index
    %c0_38 = arith.constant 0 : index
    %40 = vector.load %arg3[%c24, %c0_38] : memref<36x64xf32, #tpu.memory_space<vmem>>, vector<4x64xf32>
    %cst_39 = arith.constant dense<0.000000e+00> : vector<256x64xf32>
    %41 = tpu.matmul %39, %40, %cst_39 {dimension_numbers = #tpu.dot_dimension_numbers<[1], [0], [0], [1], [0, 0, 1, 1], [], []>} : vector<256x4xf32>, vector<4x64xf32>, vector<256x64xf32> -> vector<256x64xf32>
    %42 = arith.addf %36, %41 : vector<256x64xf32>
    %c0_40 = arith.constant 0 : index
    %c2_41 = arith.constant 2 : index
    %c1_42 = arith.constant 1 : index
    %c0_43 = arith.constant 0 : index
    %43 = vector.load %arg1[%c0_40, %c2_41, %c1_42, %c0_43] : memref<1x18x18x4xf32, #tpu.memory_space<vmem>>, vector<1x16x16x4xf32>
    %44 = vector.shape_cast %43 : vector<1x16x16x4xf32> to vector<16x16x4xf32>
    %45 = vector.shape_cast %44 : vector<16x16x4xf32> to vector<256x4xf32>
    %c28 = arith.constant 28 : index
    %c0_44 = arith.constant 0 : index
    %46 = vector.load %arg3[%c28, %c0_44] : memref<36x64xf32, #tpu.memory_space<vmem>>, vector<4x64xf32>
    %cst_45 = arith.constant dense<0.000000e+00> : vector<256x64xf32>
    %47 = tpu.matmul %45, %46, %cst_45 {dimension_numbers = #tpu.dot_dimension_numbers<[1], [0], [0], [1], [0, 0, 1, 1], [], []>} : vector<256x4xf32>, vector<4x64xf32>, vector<256x64xf32> -> vector<256x64xf32>
    %48 = arith.addf %42, %47 : vector<256x64xf32>
    %c0_46 = arith.constant 0 : index
    %c2_47 = arith.constant 2 : index
    %c2_48 = arith.constant 2 : index
    %c0_49 = arith.constant 0 : index
    %49 = vector.load %arg1[%c0_46, %c2_47, %c2_48, %c0_49] : memref<1x18x18x4xf32, #tpu.memory_space<vmem>>, vector<1x16x16x4xf32>
    %50 = vector.shape_cast %49 : vector<1x16x16x4xf32> to vector<16x16x4xf32>
    %51 = vector.shape_cast %50 : vector<16x16x4xf32> to vector<256x4xf32>
    %c32 = arith.constant 32 : index
    %c0_50 = arith.constant 0 : index
    %52 = vector.load %arg3[%c32, %c0_50] : memref<36x64xf32, #tpu.memory_space<vmem>>, vector<4x64xf32>
    %cst_51 = arith.constant dense<0.000000e+00> : vector<256x64xf32>
    %53 = tpu.matmul %51, %52, %cst_51 {dimension_numbers = #tpu.dot_dimension_numbers<[1], [0], [0], [1], [0, 0, 1, 1], [], []>} : vector<256x4xf32>, vector<4x64xf32>, vector<256x64xf32> -> vector<256x64xf32>
    %54 = arith.addf %48, %53 : vector<256x64xf32>
    %c0_52 = arith.constant 0 : index
    %c0_53 = arith.constant 0 : index
    %55 = vector.load %arg4[%c0_52, %c0_53] : memref<1x64xf32, #tpu.memory_space<vmem>>, vector<1x64xf32>
    %56 = vector.broadcast %55 : vector<1x64xf32> to vector<256x64xf32>
    %57 = arith.addf %54, %56 : vector<256x64xf32>
    %c0_54 = arith.constant 0 : index
    %c0_55 = arith.constant 0 : index
    %58 = vector.load %arg5[%c0_54, %c0_55] : memref<1x64xf32, #tpu.memory_space<vmem>>, vector<1x64xf32>
    %c0_56 = arith.constant 0 : index
    %c0_57 = arith.constant 0 : index
    %59 = vector.load %arg6[%c0_56, %c0_57] : memref<1x64xf32, #tpu.memory_space<vmem>>, vector<1x64xf32>
    %cst_58 = arith.constant dense<0.000000e+00> : vector<64xf32>
    %60 = vector.multi_reduction <add>, %57, %cst_58 [0] : vector<256x64xf32> to vector<64xf32>
    %61 = vector.shape_cast %60 : vector<64xf32> to vector<1x64xf32>
    %c0_59 = arith.constant 0 : index
    %c0_60 = arith.constant 0 : index
    %62 = vector.load %arg10[%c0_59, %c0_60] : memref<64x64xf32, #tpu.memory_space<vmem>>, vector<64x64xf32>
    %cst_61 = arith.constant dense<0.000000e+00> : vector<1x64xf32>
    %63 = tpu.matmul %61, %62, %cst_61 {dimension_numbers = #tpu.dot_dimension_numbers<[1], [0], [0], [1], [0, 0, 1, 1], [], []>} : vector<1x64xf32>, vector<64x64xf32>, vector<1x64xf32> -> vector<1x64xf32>
    %cst_62 = arith.constant 0.001953125 : f32
    %64 = vector.broadcast %cst_62 : f32 to vector<1x64xf32>
    %65 = arith.mulf %63, %64 : vector<1x64xf32>
    %66 = vector.broadcast %65 : vector<1x64xf32> to vector<256x64xf32>
    %67 = arith.subf %57, %66 : vector<256x64xf32>
    %68 = arith.mulf %67, %67 : vector<256x64xf32>
    %cst_63 = arith.constant dense<0.000000e+00> : vector<64xf32>
    %69 = vector.multi_reduction <add>, %68, %cst_63 [0] : vector<256x64xf32> to vector<64xf32>
    %70 = vector.shape_cast %69 : vector<64xf32> to vector<1x64xf32>
    %c0_64 = arith.constant 0 : index
    %c0_65 = arith.constant 0 : index
    %71 = vector.load %arg10[%c0_64, %c0_65] : memref<64x64xf32, #tpu.memory_space<vmem>>, vector<64x64xf32>
    %cst_66 = arith.constant dense<0.000000e+00> : vector<1x64xf32>
    %72 = tpu.matmul %70, %71, %cst_66 {dimension_numbers = #tpu.dot_dimension_numbers<[1], [0], [0], [1], [0, 0, 1, 1], [], []>} : vector<1x64xf32>, vector<64x64xf32>, vector<1x64xf32> -> vector<1x64xf32>
    %cst_67 = arith.constant 0.001953125 : f32
    %73 = vector.broadcast %cst_67 : f32 to vector<1x64xf32>
    %74 = arith.mulf %72, %73 : vector<1x64xf32>
    %cst_68 = arith.constant 9.99999974E-6 : f32
    %75 = vector.broadcast %cst_68 : f32 to vector<1x64xf32>
    %76 = arith.addf %74, %75 : vector<1x64xf32>
    %77 = math.rsqrt %76 : vector<1x64xf32>
    %78 = arith.mulf %58, %77 : vector<1x64xf32>
    %79 = vector.broadcast %78 : vector<1x64xf32> to vector<256x64xf32>
    %80 = arith.mulf %67, %79 : vector<256x64xf32>
    %81 = vector.broadcast %59 : vector<1x64xf32> to vector<256x64xf32>
    %82 = arith.addf %80, %81 : vector<256x64xf32>
    %cst_69 = arith.constant 0.000000e+00 : f32
    %83 = vector.broadcast %cst_69 : f32 to vector<256x64xf32>
    %84 = arith.maximumf %82, %83 : vector<256x64xf32>
    %c0_70 = arith.constant 0 : index
    %c0_71 = arith.constant 0 : index
    %c0_72 = arith.constant 0 : index
    %c0_73 = arith.constant 0 : index
    %85 = vector.load %arg2[%c0_70, %c0_71, %c0_72, %c0_73] : memref<1x16x16x64xf32, #tpu.memory_space<vmem>>, vector<1x16x16x64xf32>
    %86 = vector.shape_cast %85 : vector<1x16x16x64xf32> to vector<16x16x64xf32>
    %87 = vector.shape_cast %86 : vector<16x16x64xf32> to vector<256x64xf32>
    %88 = arith.addf %84, %87 : vector<256x64xf32>
    %cst_74 = arith.constant 0.000000e+00 : f32
    %89 = vector.broadcast %cst_74 : f32 to vector<18x18x64xf32>
    %c0_75 = arith.constant 0 : index
    %c0_76 = arith.constant 0 : index
    %c0_77 = arith.constant 0 : index
    %90 = vector.load %arg12[%c0_75, %c0_76, %c0_77] : memref<18x18x64xf32, #tpu.memory_space<vmem>>, vector<18x18x64xf32>
    tpu.vector_store %arg12[%c0_75, %c0_76, %c0_77], %89 {strides = array<i32>} : memref<18x18x64xf32, #tpu.memory_space<vmem>>, vector<18x18x64xf32>,
    %91 = vector.shape_cast %88 : vector<256x64xf32> to vector<16x16x64xf32>
    %c1_78 = arith.constant 1 : index
    %c1_79 = arith.constant 1 : index
    %c0_80 = arith.constant 0 : index
    %92 = vector.load %arg12[%c1_78, %c1_79, %c0_80] : memref<18x18x64xf32, #tpu.memory_space<vmem>>, vector<16x16x64xf32>
    tpu.vector_store %arg12[%c1_78, %c1_79, %c0_80], %91 {strides = array<i32>} : memref<18x18x64xf32, #tpu.memory_space<vmem>>, vector<16x16x64xf32>,
    %cst_81 = arith.constant 0.000000e+00 : f32
    %93 = vector.broadcast %cst_81 : f32 to vector<256x64xf32>
    %c0_82 = arith.constant 0 : index
    %c0_83 = arith.constant 0 : index
    %c0_84 = arith.constant 0 : index
    %94 = vector.load %arg12[%c0_82, %c0_83, %c0_84] : memref<18x18x64xf32, #tpu.memory_space<vmem>>, vector<16x16x64xf32>
    %95 = vector.shape_cast %94 : vector<16x16x64xf32> to vector<256x64xf32>
    %c0_85 = arith.constant 0 : index
    %c0_86 = arith.constant 0 : index
    %96 = vector.load %arg7[%c0_85, %c0_86] : memref<576x64xf32, #tpu.memory_space<vmem>>, vector<64x64xf32>
    %cst_87 = arith.constant dense<0.000000e+00> : vector<256x64xf32>
    %97 = tpu.matmul %95, %96, %cst_87 {dimension_numbers = #tpu.dot_dimension_numbers<[1], [0], [0], [1], [0, 0, 1, 1], [], []>} : vector<256x64xf32>, vector<64x64xf32>, vector<256x64xf32> -> vector<256x64xf32>
    %98 = arith.addf %93, %97 : vector<256x64xf32>
    %c0_88 = arith.constant 0 : index
    %c1_89 = arith.constant 1 : index
    %c0_90 = arith.constant 0 : index
    %99 = vector.load %arg12[%c0_88, %c1_89, %c0_90] : memref<18x18x64xf32, #tpu.memory_space<vmem>>, vector<16x16x64xf32>
    %100 = vector.shape_cast %99 : vector<16x16x64xf32> to vector<256x64xf32>
    %c64 = arith.constant 64 : index
    %c0_91 = arith.constant 0 : index
    %101 = vector.load %arg7[%c64, %c0_91] : memref<576x64xf32, #tpu.memory_space<vmem>>, vector<64x64xf32>
    %cst_92 = arith.constant dense<0.000000e+00> : vector<256x64xf32>
    %102 = tpu.matmul %100, %101, %cst_92 {dimension_numbers = #tpu.dot_dimension_numbers<[1], [0], [0], [1], [0, 0, 1, 1], [], []>} : vector<256x64xf32>, vector<64x64xf32>, vector<256x64xf32> -> vector<256x64xf32>
    %103 = arith.addf %98, %102 : vector<256x64xf32>
    %c0_93 = arith.constant 0 : index
    %c2_94 = arith.constant 2 : index
    %c0_95 = arith.constant 0 : index
    %104 = vector.load %arg12[%c0_93, %c2_94, %c0_95] : memref<18x18x64xf32, #tpu.memory_space<vmem>>, vector<16x16x64xf32>
    %105 = vector.shape_cast %104 : vector<16x16x64xf32> to vector<256x64xf32>
    %c128 = arith.constant 128 : index
    %c0_96 = arith.constant 0 : index
    %106 = vector.load %arg7[%c128, %c0_96] : memref<576x64xf32, #tpu.memory_space<vmem>>, vector<64x64xf32>
    %cst_97 = arith.constant dense<0.000000e+00> : vector<256x64xf32>
    %107 = tpu.matmul %105, %106, %cst_97 {dimension_numbers = #tpu.dot_dimension_numbers<[1], [0], [0], [1], [0, 0, 1, 1], [], []>} : vector<256x64xf32>, vector<64x64xf32>, vector<256x64xf32> -> vector<256x64xf32>
    %108 = arith.addf %103, %107 : vector<256x64xf32>
    %c1_98 = arith.constant 1 : index
    %c0_99 = arith.constant 0 : index
    %c0_100 = arith.constant 0 : index
    %109 = vector.load %arg12[%c1_98, %c0_99, %c0_100] : memref<18x18x64xf32, #tpu.memory_space<vmem>>, vector<16x16x64xf32>
    %110 = vector.shape_cast %109 : vector<16x16x64xf32> to vector<256x64xf32>
    %c192 = arith.constant 192 : index
    %c0_101 = arith.constant 0 : index
    %111 = vector.load %arg7[%c192, %c0_101] : memref<576x64xf32, #tpu.memory_space<vmem>>, vector<64x64xf32>
    %cst_102 = arith.constant dense<0.000000e+00> : vector<256x64xf32>
    %112 = tpu.matmul %110, %111, %cst_102 {dimension_numbers = #tpu.dot_dimension_numbers<[1], [0], [0], [1], [0, 0, 1, 1], [], []>} : vector<256x64xf32>, vector<64x64xf32>, vector<256x64xf32> -> vector<256x64xf32>
    %113 = arith.addf %108, %112 : vector<256x64xf32>
    %c1_103 = arith.constant 1 : index
    %c1_104 = arith.constant 1 : index
    %c0_105 = arith.constant 0 : index
    %114 = vector.load %arg12[%c1_103, %c1_104, %c0_105] : memref<18x18x64xf32, #tpu.memory_space<vmem>>, vector<16x16x64xf32>
    %115 = vector.shape_cast %114 : vector<16x16x64xf32> to vector<256x64xf32>
    %c256 = arith.constant 256 : index
    %c0_106 = arith.constant 0 : index
    %116 = vector.load %arg7[%c256, %c0_106] : memref<576x64xf32, #tpu.memory_space<vmem>>, vector<64x64xf32>
    %cst_107 = arith.constant dense<0.000000e+00> : vector<256x64xf32>
    %117 = tpu.matmul %115, %116, %cst_107 {dimension_numbers = #tpu.dot_dimension_numbers<[1], [0], [0], [1], [0, 0, 1, 1], [], []>} : vector<256x64xf32>, vector<64x64xf32>, vector<256x64xf32> -> vector<256x64xf32>
    %118 = arith.addf %113, %117 : vector<256x64xf32>
    %c1_108 = arith.constant 1 : index
    %c2_109 = arith.constant 2 : index
    %c0_110 = arith.constant 0 : index
    %119 = vector.load %arg12[%c1_108, %c2_109, %c0_110] : memref<18x18x64xf32, #tpu.memory_space<vmem>>, vector<16x16x64xf32>
    %120 = vector.shape_cast %119 : vector<16x16x64xf32> to vector<256x64xf32>
    %c320 = arith.constant 320 : index
    %c0_111 = arith.constant 0 : index
    %121 = vector.load %arg7[%c320, %c0_111] : memref<576x64xf32, #tpu.memory_space<vmem>>, vector<64x64xf32>
    %cst_112 = arith.constant dense<0.000000e+00> : vector<256x64xf32>
    %122 = tpu.matmul %120, %121, %cst_112 {dimension_numbers = #tpu.dot_dimension_numbers<[1], [0], [0], [1], [0, 0, 1, 1], [], []>} : vector<256x64xf32>, vector<64x64xf32>, vector<256x64xf32> -> vector<256x64xf32>
    %123 = arith.addf %118, %122 : vector<256x64xf32>
    %c2_113 = arith.constant 2 : index
    %c0_114 = arith.constant 0 : index
    %c0_115 = arith.constant 0 : index
    %124 = vector.load %arg12[%c2_113, %c0_114, %c0_115] : memref<18x18x64xf32, #tpu.memory_space<vmem>>, vector<16x16x64xf32>
    %125 = vector.shape_cast %124 : vector<16x16x64xf32> to vector<256x64xf32>
    %c384 = arith.constant 384 : index
    %c0_116 = arith.constant 0 : index
    %126 = vector.load %arg7[%c384, %c0_116] : memref<576x64xf32, #tpu.memory_space<vmem>>, vector<64x64xf32>
    %cst_117 = arith.constant dense<0.000000e+00> : vector<256x64xf32>
    %127 = tpu.matmul %125, %126, %cst_117 {dimension_numbers = #tpu.dot_dimension_numbers<[1], [0], [0], [1], [0, 0, 1, 1], [], []>} : vector<256x64xf32>, vector<64x64xf32>, vector<256x64xf32> -> vector<256x64xf32>
    %128 = arith.addf %123, %127 : vector<256x64xf32>
    %c2_118 = arith.constant 2 : index
    %c1_119 = arith.constant 1 : index
    %c0_120 = arith.constant 0 : index
    %129 = vector.load %arg12[%c2_118, %c1_119, %c0_120] : memref<18x18x64xf32, #tpu.memory_space<vmem>>, vector<16x16x64xf32>
    %130 = vector.shape_cast %129 : vector<16x16x64xf32> to vector<256x64xf32>
    %c448 = arith.constant 448 : index
    %c0_121 = arith.constant 0 : index
    %131 = vector.load %arg7[%c448, %c0_121] : memref<576x64xf32, #tpu.memory_space<vmem>>, vector<64x64xf32>
    %cst_122 = arith.constant dense<0.000000e+00> : vector<256x64xf32>
    %132 = tpu.matmul %130, %131, %cst_122 {dimension_numbers = #tpu.dot_dimension_numbers<[1], [0], [0], [1], [0, 0, 1, 1], [], []>} : vector<256x64xf32>, vector<64x64xf32>, vector<256x64xf32> -> vector<256x64xf32>
    %133 = arith.addf %128, %132 : vector<256x64xf32>
    %c2_123 = arith.constant 2 : index
    %c2_124 = arith.constant 2 : index
    %c0_125 = arith.constant 0 : index
    %134 = vector.load %arg12[%c2_123, %c2_124, %c0_125] : memref<18x18x64xf32, #tpu.memory_space<vmem>>, vector<16x16x64xf32>
    %135 = vector.shape_cast %134 : vector<16x16x64xf32> to vector<256x64xf32>
    %c512 = arith.constant 512 : index
    %c0_126 = arith.constant 0 : index
    %136 = vector.load %arg7[%c512, %c0_126] : memref<576x64xf32, #tpu.memory_space<vmem>>, vector<64x64xf32>
    %cst_127 = arith.constant dense<0.000000e+00> : vector<256x64xf32>
    %137 = tpu.matmul %135, %136, %cst_127 {dimension_numbers = #tpu.dot_dimension_numbers<[1], [0], [0], [1], [0, 0, 1, 1], [], []>} : vector<256x64xf32>, vector<64x64xf32>, vector<256x64xf32> -> vector<256x64xf32>
    %138 = arith.addf %133, %137 : vector<256x64xf32>
    %c0_128 = arith.constant 0 : index
    %c0_129 = arith.constant 0 : index
    %139 = vector.load %arg8[%c0_128, %c0_129] : memref<1x64xf32, #tpu.memory_space<vmem>>, vector<1x64xf32>
    %c0_130 = arith.constant 0 : index
    %c0_131 = arith.constant 0 : index
    %140 = vector.load %arg9[%c0_130, %c0_131] : memref<1x64xf32, #tpu.memory_space<vmem>>, vector<1x64xf32>
    %cst_132 = arith.constant dense<0.000000e+00> : vector<64xf32>
    %141 = vector.multi_reduction <add>, %138, %cst_132 [0] : vector<256x64xf32> to vector<64xf32>
    %142 = vector.shape_cast %141 : vector<64xf32> to vector<1x64xf32>
    %c0_133 = arith.constant 0 : index
    %c0_134 = arith.constant 0 : index
    %143 = vector.load %arg10[%c0_133, %c0_134] : memref<64x64xf32, #tpu.memory_space<vmem>>, vector<64x64xf32>
    %cst_135 = arith.constant dense<0.000000e+00> : vector<1x64xf32>
    %144 = tpu.matmul %142, %143, %cst_135 {dimension_numbers = #tpu.dot_dimension_numbers<[1], [0], [0], [1], [0, 0, 1, 1], [], []>} : vector<1x64xf32>, vector<64x64xf32>, vector<1x64xf32> -> vector<1x64xf32>
    %cst_136 = arith.constant 0.001953125 : f32
    %145 = vector.broadcast %cst_136 : f32 to vector<1x64xf32>
    %146 = arith.mulf %144, %145 : vector<1x64xf32>
    %147 = vector.broadcast %146 : vector<1x64xf32> to vector<256x64xf32>
    %148 = arith.subf %138, %147 : vector<256x64xf32>
    %149 = arith.mulf %148, %148 : vector<256x64xf32>
    %cst_137 = arith.constant dense<0.000000e+00> : vector<64xf32>
    %150 = vector.multi_reduction <add>, %149, %cst_137 [0] : vector<256x64xf32> to vector<64xf32>
    %151 = vector.shape_cast %150 : vector<64xf32> to vector<1x64xf32>
    %c0_138 = arith.constant 0 : index
    %c0_139 = arith.constant 0 : index
    %152 = vector.load %arg10[%c0_138, %c0_139] : memref<64x64xf32, #tpu.memory_space<vmem>>, vector<64x64xf32>
    %cst_140 = arith.constant dense<0.000000e+00> : vector<1x64xf32>
    %153 = tpu.matmul %151, %152, %cst_140 {dimension_numbers = #tpu.dot_dimension_numbers<[1], [0], [0], [1], [0, 0, 1, 1], [], []>} : vector<1x64xf32>, vector<64x64xf32>, vector<1x64xf32> -> vector<1x64xf32>
    %cst_141 = arith.constant 0.001953125 : f32
    %154 = vector.broadcast %cst_141 : f32 to vector<1x64xf32>
    %155 = arith.mulf %153, %154 : vector<1x64xf32>
    %cst_142 = arith.constant 9.99999974E-6 : f32
    %156 = vector.broadcast %cst_142 : f32 to vector<1x64xf32>
    %157 = arith.addf %155, %156 : vector<1x64xf32>
    %158 = math.rsqrt %157 : vector<1x64xf32>
    %159 = arith.mulf %139, %158 : vector<1x64xf32>
    %160 = vector.broadcast %159 : vector<1x64xf32> to vector<256x64xf32>
    %161 = arith.mulf %148, %160 : vector<256x64xf32>
    %162 = vector.broadcast %140 : vector<1x64xf32> to vector<256x64xf32>
    %163 = arith.addf %161, %162 : vector<256x64xf32>
    %cst_143 = arith.constant 0.000000e+00 : f32
    %164 = vector.broadcast %cst_143 : f32 to vector<256x64xf32>
    %165 = arith.maximumf %163, %164 : vector<256x64xf32>
    %166 = vector.shape_cast %165 : vector<256x64xf32> to vector<1x16x16x64xf32>
    %c0_144 = arith.constant 0 : index
    %c0_145 = arith.constant 0 : index
    %c0_146 = arith.constant 0 : index
    %c0_147 = arith.constant 0 : index
    %167 = vector.load %arg11[%c0_144, %c0_145, %c0_146, %c0_147] : memref<1x16x16x64xf32, #tpu.memory_space<vmem>>, vector<1x16x16x64xf32>
    tpu.vector_store %arg11[%c0_144, %c0_145, %c0_146, %c0_147], %166 {strides = array<i32>} : memref<1x16x16x64xf32, #tpu.memory_space<vmem>>, vector<1x16x16x64xf32>,
    return
  }
  func.func @transform_0(%arg0: i32) -> (i32, i32, i32, i32) {
    %c0_i32 = arith.constant 0 : i32
    %c0_i32_0 = arith.constant 0 : i32
    %c0_i32_1 = arith.constant 0 : i32
    %c0_i32_2 = arith.constant 0 : i32
    return %arg0, %c0_i32, %c0_i32_0, %c0_i32_1 : i32, i32, i32, i32
  }
  func.func @transform_1(%arg0: i32) -> (i32, i32, i32, i32) {
    %c0_i32 = arith.constant 0 : i32
    %c0_i32_0 = arith.constant 0 : i32
    %c0_i32_1 = arith.constant 0 : i32
    %c0_i32_2 = arith.constant 0 : i32
    return %arg0, %c0_i32, %c0_i32_0, %c0_i32_1 : i32, i32, i32, i32
  }
  func.func @transform_2(%arg0: i32) -> (i32, i32) {
    %c0_i32 = arith.constant 0 : i32
    %c0_i32_0 = arith.constant 0 : i32
    %c0_i32_1 = arith.constant 0 : i32
    return %c0_i32, %c0_i32_0 : i32, i32
  }
  func.func @transform_3(%arg0: i32) -> (i32, i32) {
    %c0_i32 = arith.constant 0 : i32
    %c0_i32_0 = arith.constant 0 : i32
    %c0_i32_1 = arith.constant 0 : i32
    return %c0_i32, %c0_i32_0 : i32, i32
  }
  func.func @transform_4(%arg0: i32) -> (i32, i32) {
    %c0_i32 = arith.constant 0 : i32
    %c0_i32_0 = arith.constant 0 : i32
    %c0_i32_1 = arith.constant 0 : i32
    return %c0_i32, %c0_i32_0 : i32, i32
  }
  func.func @transform_5(%arg0: i32) -> (i32, i32) {
    %c0_i32 = arith.constant 0 : i32
    %c0_i32_0 = arith.constant 0 : i32
    %c0_i32_1 = arith.constant 0 : i32
    return %c0_i32, %c0_i32_0 : i32, i32
  }
  func.func @transform_6(%arg0: i32) -> (i32, i32) {
    %c0_i32 = arith.constant 0 : i32
    %c0_i32_0 = arith.constant 0 : i32
    %c0_i32_1 = arith.constant 0 : i32
    return %c0_i32, %c0_i32_0 : i32, i32
  }
  func.func @transform_7(%arg0: i32) -> (i32, i32) {
    %c0_i32 = arith.constant 0 : i32
    %c0_i32_0 = arith.constant 0 : i32
    %c0_i32_1 = arith.constant 0 : i32
    return %c0_i32, %c0_i32_0 : i32, i32
  }
  func.func @transform_8(%arg0: i32) -> (i32, i32) {
    %c0_i32 = arith.constant 0 : i32
    %c0_i32_0 = arith.constant 0 : i32
    %c0_i32_1 = arith.constant 0 : i32
    return %c0_i32, %c0_i32_0 : i32, i32
  }
  func.func @transform_9(%arg0: i32) -> (i32, i32) {
    %c0_i32 = arith.constant 0 : i32
    %c0_i32_0 = arith.constant 0 : i32
    %c0_i32_1 = arith.constant 0 : i32
    return %c0_i32, %c0_i32_0 : i32, i32
  }
  func.func @transform_10(%arg0: i32) -> (i32, i32, i32, i32) {
    %c0_i32 = arith.constant 0 : i32
    %c0_i32_0 = arith.constant 0 : i32
    %c0_i32_1 = arith.constant 0 : i32
    %c0_i32_2 = arith.constant 0 : i32
    return %arg0, %c0_i32, %c0_i32_0, %c0_i32_1 : i32, i32, i32, i32
  }
}

</mosaic_0001>

<bundles_post_ra>
// kernel: corblock_rt_forward.1
= control target key start
LH: loop header
LB: loop body
LE: loop exit
PB: predicated region body
PF: predicated region fallthrough
CT: control target
= control target key end

     0   :  { %s11915_s13 = smov 0   ;;  %s15055_s0 = inlined_call_operand.vmem [shape: f32[2,18,18,4], index: 0, kind: input, shape index: {}]   ;;  %s15056_s1 = inlined_call_operand.vmem [shape: f32[2,16,16,64], index: 1, kind: input, shape index: {}]   ;;  %s15057_s2 = inlined_call_operand.vmem [shape: f32[36,64], index: 2, kind: input, shape index: {}]   ;;  %s15058_s3 = inlined_call_operand.vmem [shape: f32[1,64], index: 3, kind: input, shape index: {}]   ;;  %s15059_s4 = inlined_call_operand.vmem [shape: f32[1,64], index: 4, kind: input, shape index: {}]   ;;  %s15060_s5 = inlined_call_operand.vmem [shape: f32[1,64], index: 5, kind: input, shape index: {}]   ;;  %s15061_s6 = inlined_call_operand.vmem [shape: f32[576,64], index: 6, kind: input, shape index: {}]   ;;  %s15062_s7 = inlined_call_operand.vmem [shape: f32[1,64], index: 7, kind: input, shape index: {}]   ;;  %s15063_s8 = inlined_call_operand.vmem [shape: f32[1,64], index: 8, kind: input, shape index: {}]   ;;  %s15064_s9 = inlined_call_operand.vmem [shape: f32[64,64], index: 9, kind: input, shape index: {}]   ;;  %s15065_s10 = inlined_call_operand.vmem [shape: f32[2,16,16,64], index: 10, kind: output, shape index: {}]  }
   0x1 LB: > { %s8536_s14 = sadd.s32 4294967295, %s11855_s13   ;;  %p8540_p0 = scmp.ge.s32.totalorder %s11855_s13, 1  ;;  %s11855_s13 = sphi %s11915_s13, %s20_s13  }
   0x2   : > { %p322_p1 = scmp.lt.s32.totalorder %s11855_s13, 3 }
   0x4   : > { %p323_p2 = pnand %p8540_p0, %p322_p1 }
   0x6   : > { %326 = sbr.rel (%p323_p2) target bundleno = 2747 (0xabb), region = 60 }
   0xd   : > { %v445_v0 = vld [vmem:[%s15057_s2 + $0x4] sm:$0xf]  ;;  %vm543_vm0 = vcmask 1043456   ;;  %p365_p3 = scmp.lt.s32.totalorder %s8536_s14, 1  ;;  %v412_v1 = vld [vmem:[%s15057_s2] sm:$0xf] }
   0xe   : > { %10027 = vmatprep.subr.msk.mxu0 %vm543_vm0, %v445_v0  ;;  %vm446_vm1 = vcmask 31744   ;;  %v11949_v5 = vld [vmem:[%s15057_s2 + $0x8] sm:$0xf]  ;;  %v12111_v38 = vld [vmem:[%s15057_s2 + $0xc] sm:$0xf]  ;;  %vm3862_vm2 = vcmask 523264  }
   0xf   : > { %10028 = vmatpush3.msk.msra.mxu0 %vm543_vm0, %v445_v0  ;;  %s15397_s14 = smov (!%p365_p3, %s8536_s14), 1  ;;  %vm4402_vm3 = vcmask 517120   ;;  %vm11859_vm4 = vmmov 0  }
  0x10   : > { %10077 = vmatprep.subr.msk.mxu0 %vm543_vm0, %v412_v1  ;;  %s11833_s19 = smul.u32 432, %s15397_s14  ;;  %s9332_s23 = sshll.u32 %s15397_s14, 8 }
  0x11   : > { %s13563_s26 = scalar_lea.vmem %s15056_s1, %s9332_s23  ;;  %s14966_s20 = scalar_lea.vmem %s15065_s10, %s9332_s23 }
  0x12   : > { %s11938_s22 = scalar_lea.vmem %s15055_s0, %s11833_s19 }
  0x13   : > { %v413_v2 = vld [vmem:[%s11938_s22 + $0x1] sm:$0xff]  ;;  %v414_v3 = vld [vmem:[%s11938_s22 + $0x9] sm:$0xff]  ;;  %v11943_v4 = vld [vmem:[%s11938_s22 + $0x19] sm:$0xff] }
  0x14   : > { %10029 = vmatprep.mubr.msk.f32.mxu0 %vm446_vm1, %v413_v2  ;;  %v11956_v6 = vld [vmem:[%s11938_s22 + $0x21] sm:$0xff]  ;;  %v11959_v7 = vld [vmem:[%s11938_s22 + $0x31] sm:$0xff]  ;;  %v11968_v8 = vld [vmem:[%s11938_s22 + $0x39] sm:$0xff] }
  0x15   : > { %10030 = vmatmul.mubr.msk.f32.vlgmr.msra.gmra.mrb[0].mxu0 %vm446_vm1, %v414_v3  ;;  %v11971_v9 = vld [vmem:[%s11938_s22 + $0x49] sm:$0xff]  ;;  %v11978_v10 = vld [vmem:[%s11938_s22 + $0x51] sm:$0xff]  ;;  %v11981_v11 = vld [vmem:[%s11938_s22 + $0x61] sm:$0xff] }
  0x16   : > { %10078 = vmatpush3.msk.msra.mxu0 %vm543_vm0, %v412_v1  ;;  %10032 = vmatprep.mubr.msk.f32.mxu0 %vm446_vm1, %v11943_v4  ;;  %v11988_v12 = vld [vmem:[%s11938_s22 + $0x69] sm:$0xff]  ;;  %v11991_v13 = vld [vmem:[%s11938_s22 + $0x79] sm:$0xff]  ;;  %v11998_v14 = vld [vmem:[%s11938_s22 + $0x81] sm:$0xff] }
  0x17   : > { %10127 = vmatprep.subr.msk.mxu0 %vm543_vm0, %v11949_v5  ;;  %v12001_v15 = vld [vmem:[%s11938_s22 + $0x91] sm:$0xff]  ;;  %v12008_v16 = vld [vmem:[%s11938_s22 + $0x99] sm:$0xff]  ;;  %v12011_v17 = vld [vmem:[%s11938_s22 + $0xa9] sm:$0xff] }
  0x18   : > { %v12018_v18 = vld [vmem:[%s11938_s22 + $0xb1] sm:$0xff]  ;;  %v12021_v19 = vld [vmem:[%s11938_s22 + $0xc1] sm:$0xff]  ;;  %v12028_v20 = vld [vmem:[%s11938_s22 + $0xc9] sm:$0xff] }
  0x19   : > { %10033 = vmatmul.mubr.msk.f32.gmra.mrb[2].mxu0 %vm446_vm1, %v11956_v6  ;;  %v12031_v21 = vld [vmem:[%s11938_s22 + $0xd9] sm:$0xff]  ;;  %v12038_v22 = vld [vmem:[%s11938_s22 + $0xe1] sm:$0xff]  ;;  %v12041_v23 = vld [vmem:[%s11938_s22 + $0xf1] sm:$0xff] }
  0x1a   : > { %10035 = vmatprep.mubr.msk.f32.mxu0 %vm446_vm1, %v11959_v7  ;;  %v12048_v24 = vld [vmem:[%s11938_s22 + $0xf9] sm:$0xff]  ;;  %v12051_v25 = vld [vmem:[%s11938_s22 + $0x109] sm:$0xff]  ;;  %v12058_v26 = vld [vmem:[%s11938_s22 + $0x111] sm:$0xff] }
  0x1b   : > { %v12061_v27 = vld [vmem:[%s11938_s22 + $0x121] sm:$0xff]  ;;  %v12068_v28 = vld [vmem:[%s11938_s22 + $0x129] sm:$0xff]  ;;  %v12071_v29 = vld [vmem:[%s11938_s22 + $0x139] sm:$0xff] }
  0x1c   : > { %15199 = vst [vmem:[#allocation3_spill] sm:$0xff] %v12061_v27  ;;  %15200 = vst [vmem:[#allocation4_spill] sm:$0xff] %v12068_v28  ;;  %v12078_v30 = vld [vmem:[%s11938_s22 + $0x141] sm:$0xff]  ;;  %v12081_v31 = vld [vmem:[%s11938_s22 + $0x151] sm:$0xff] }
  0x1d   : > { %10036 = vmatmul.mubr.msk.f32.gmra.mrb[4].mxu0 %vm446_vm1, %v11968_v8  ;;  %15201 = vst [vmem:[#allocation5_spill] sm:$0xff] %v12071_v29  ;;  %15202 = vst [vmem:[#allocation6_spill] sm:$0xff] %v12078_v30  ;;  %v12088_v32 = vld [vmem:[%s11938_s22 + $0x159] sm:$0xff]  ;;  %v12091_v33 = vld [vmem:[%s11938_s22 + $0x169] sm:$0xff] }
  0x1e   : > { %10038 = vmatprep.mubr.msk.f32.mxu0 %vm446_vm1, %v11971_v9  ;;  %15203 = vst [vmem:[#allocation7_spill] sm:$0xff] %v12081_v31  ;;  %15204 = vst [vmem:[#allocation8_spill] sm:$0xff] %v12088_v32  ;;  %v12098_v34 = vld [vmem:[%s11938_s22 + $0x171] sm:$0xff]  ;;  %v380_v35 = vld [vmem:[%s11938_s22] sm:$0xff] }
  0x1f   : > { %15205 = vst [vmem:[#allocation9_spill] sm:$0xff] %v12091_v33  ;;  %15206 = vst [vmem:[#allocation10_spill] sm:$0xff] %v12098_v34  ;;  %v381_v36 = vld [vmem:[%s11938_s22 + $0x8] sm:$0xff]  ;;  %v12106_v37 = vld [vmem:[%s11938_s22 + $0x18] sm:$0xff] }
  0x20   : > { %v12119_v39 = vld [vmem:[%s11938_s22 + $0x20] sm:$0xff]  ;;  %v12122_v40 = vld [vmem:[%s11938_s22 + $0x30] sm:$0xff]  ;;  %v12131_v41 = vld [vmem:[%s11938_s22 + $0x38] sm:$0xff] }
  0x21   : > { %10039 = vmatmul.mubr.msk.f32.gmra.mrb[6].mxu0 %vm446_vm1, %v11978_v10  ;;  %v12134_v42 = vld [vmem:[%s11938_s22 + $0x48] sm:$0xff]  ;;  %v12141_v43 = vld [vmem:[%s11938_s22 + $0x50] sm:$0xff]  ;;  %v12144_v44 = vld [vmem:[%s11938_s22 + $0x60] sm:$0xff] }
  0x22   : > { %10041 = vmatprep.mubr.msk.f32.mxu0 %vm446_vm1, %v11981_v11  ;;  %v12151_v45 = vld [vmem:[%s11938_s22 + $0x68] sm:$0xff]  ;;  %v12154_v46 = vld [vmem:[%s11938_s22 + $0x78] sm:$0xff]  ;;  %v12161_v47 = vld [vmem:[%s11938_s22 + $0x80] sm:$0xff] }
  0x23   : > { %v12164_v48 = vld [vmem:[%s11938_s22 + $0x90] sm:$0xff]  ;;  %v12171_v49 = vld [vmem:[%s11938_s22 + $0x98] sm:$0xff]  ;;  %v12174_v50 = vld [vmem:[%s11938_s22 + $0xa8] sm:$0xff] }
  0x24   : > { %v12181_v51 = vld [vmem:[%s11938_s22 + $0xb0] sm:$0xff]  ;;  %v12184_v52 = vld [vmem:[%s11938_s22 + $0xc0] sm:$0xff]  ;;  %v12191_v53 = vld [vmem:[%s11938_s22 + $0xc8] sm:$0xff] }
  0x25   : > { %10042 = vmatmul.mubr.msk.f32.gmra.mrb[8].mxu0 %vm446_vm1, %v11988_v12  ;;  %v12194_v54 = vld [vmem:[%s11938_s22 + $0xd8] sm:$0xff]  ;;  %v12201_v55 = vld [vmem:[%s11938_s22 + $0xe0] sm:$0xff]  ;;  %v12204_v56 = vld [vmem:[%s11938_s22 + $0xf0] sm:$0xff] }
  0x26   : > { %10044 = vmatprep.mubr.msk.f32.mxu0 %vm446_vm1, %v11991_v13  ;;  %v12211_v57 = vld [vmem:[%s11938_s22 + $0xf8] sm:$0xff]  ;;  %v12214_v58 = vld [vmem:[%s11938_s22 + $0x108] sm:$0xff]  ;;  %v12221_v59 = vld [vmem:[%s11938_s22 + $0x110] sm:$0xff] }
  0x27   : > { %v12224_v60 = vld [vmem:[%s11938_s22 + $0x120] sm:$0xff]  ;;  %v12231_v61 = vld [vmem:[%s11938_s22 + $0x128] sm:$0xff]  ;;  %v12234_v62 = vld [vmem:[%s11938_s22 + $0x138] sm:$0xff] }
  0x28   : > { %v12241_v63 = vld [vmem:[%s11938_s22 + $0x140] sm:$0xff]  ;;  %v12244_v0 = vld [vmem:[%s11938_s22 + $0x150] sm:$0xff]  ;;  %v12251_v1 = vld [vmem:[%s11938_s22 + $0x158] sm:$0xff] }
  0x29   : > { %10045 = vmatmul.mubr.msk.f32.gmra.mrb[10].mxu0 %vm446_vm1, %v11998_v14  ;;  %v12254_v2 = vld [vmem:[%s11938_s22 + $0x168] sm:$0xff]  ;;  %v12261_v3 = vld [vmem:[%s11938_s22 + $0x170] sm:$0xff] }
  0x2a   : > { %10047 = vmatprep.mubr.msk.f32.mxu0 %vm446_vm1, %v12001_v15 }
  0x2d   : > { %10048 = vmatmul.mubr.msk.f32.gmra.mrb[12].mxu0 %vm446_vm1, %v12008_v16 }
  0x2e   : > { %10050 = vmatprep.mubr.msk.f32.mxu0 %vm446_vm1, %v12011_v17 }
  0x31   : > { %10051 = vmatmul.mubr.msk.f32.gmra.mrb[14].mxu0 %vm446_vm1, %v12018_v18 }
  0x32   : > { %10053 = vmatprep.mubr.msk.f32.mxu0 %vm446_vm1, %v12021_v19 }
  0x35   : > { %10054 = vmatmul.mubr.msk.f32.gmra.mrb[16].mxu0 %vm446_vm1, %v12028_v20 }
  0x36   : > { %10056 = vmatprep.mubr.msk.f32.mxu0 %vm446_vm1, %v12031_v21 }
  0x39   : > { %10057 = vmatmul.mubr.msk.f32.gmra.mrb[18].mxu0 %vm446_vm1, %v12038_v22 }
  0x3a   : > { %10059 = vmatprep.mubr.msk.f32.mxu0 %vm446_vm1, %v12041_v23 }
  0x3d   : > { %10060 = vmatmul.mubr.msk.f32.gmra.mrb[20].mxu0 %vm446_vm1, %v12048_v24 }
  0x3e   : > { %10062 = vmatprep.mubr.msk.f32.mxu0 %vm446_vm1, %v12051_v25 }
  0x41   : > { %10063 = vmatmul.mubr.msk.f32.gmra.mrb[22].mxu0 %vm446_vm1, %v12058_v26 }
  0x42   : > { %10065 = vmatprep.mubr.msk.f32.mxu0 %vm446_vm1, %v12061_v27 }
  0x45   : > { %10066 = vmatmul.mubr.msk.f32.gmra.mrb[24].mxu0 %vm446_vm1, %v12068_v28 }
  0x46   : > { %10068 = vmatprep.mubr.msk.f32.mxu0 %vm446_vm1, %v12071_v29 }
  0x49   : > { %10069 = vmatmul.mubr.msk.f32.gmra.mrb[26].mxu0 %vm446_vm1, %v12078_v30 }
  0x4a   : > { %10071 = vmatprep.mubr.msk.f32.mxu0 %vm446_vm1, %v12081_v31 }
  0x4d   : > { %10072 = vmatmul.mubr.msk.f32.gmra.mrb[28].mxu0 %vm446_vm1, %v12088_v32  ;;  %v12307_v32 = vld [vmem:[%s11938_s22 + $0x62] sm:$0xff] }
  0x4e   : > { %10074 = vmatprep.mubr.msk.f32.mxu0 %vm446_vm1, %v12091_v33  ;;  %v12285_v33 = vld [vmem:[%s11938_s22 + $0x32] sm:$0xff]  ;;  %15213 = vst [vmem:[#allocation17_spill] sm:$0xff] %v12307_v32 }
  0x4f   : > { %15209 = vst [vmem:[#allocation13_spill] sm:$0xff] %v12285_v33 }
  0x51   : > { %10075 = vmatmul.mubr.msk.f32.gmra.mrb[30].mxu0 %vm446_vm1, %v12098_v34  ;;  %v12274_v34 = vld [vmem:[%s15057_s2 + $0x10] sm:$0xf] }
  0x52   : > { %10079 = vmatprep.mubr.msk.f32.mxu0 %vm446_vm1, %v380_v35  ;;  %v1097_v35 = vld [vmem:[%s11938_s22 + $0xa] sm:$0xff] }
  0x55   : > { %10080 = vmatmul.mubr.msk.f32.vlgmr.msra.gmra.mrb[0].mxu0 %vm446_vm1, %v381_v36  ;;  %v12269_v36 = vld [vmem:[%s11938_s22 + $0x1a] sm:$0xff] }
  0x56   : > { %10128 = vmatpush3.msk.msra.mxu0 %vm543_vm0, %v11949_v5  ;;  %10082 = vmatprep.mubr.msk.f32.mxu0 %vm446_vm1, %v12106_v37  ;;  %v1096_v5 = vld [vmem:[%s11938_s22 + $0x2] sm:$0xff]  ;;  %15207 = vst [vmem:[#allocation11_spill] sm:$0xff] %v12269_v36 }
  0x57   : > { %10177 = vmatprep.subr.msk.mxu0 %vm543_vm0, %v12111_v38 }
  0x59   : > { %10083 = vmatmul.mubr.msk.f32.gmra.mrb[2].mxu0 %vm446_vm1, %v12119_v39 }
  0x5a   : > { %10085 = vmatprep.mubr.msk.f32.mxu0 %vm446_vm1, %v12122_v40 }
  0x5d   : > { %10086 = vmatmul.mubr.msk.f32.gmra.mrb[4].mxu0 %vm446_vm1, %v12131_v41 }
  0x5e   : > { %10088 = vmatprep.mubr.msk.f32.mxu0 %vm446_vm1, %v12134_v42 }
  0x61   : > { %10089 = vmatmul.mubr.msk.f32.gmra.mrb[6].mxu0 %vm446_vm1, %v12141_v43 }
  0x62   : > { %10091 = vmatprep.mubr.msk.f32.mxu0 %vm446_vm1, %v12144_v44 }
  0x65   : > { %10092 = vmatmul.mubr.msk.f32.gmra.mrb[8].mxu0 %vm446_vm1, %v12151_v45 }
  0x66   : > { %10094 = vmatprep.mubr.msk.f32.mxu0 %vm446_vm1, %v12154_v46 }
  0x69   : > { %10095 = vmatmul.mubr.msk.f32.gmra.mrb[10].mxu0 %vm446_vm1, %v12161_v47 }
  0x6a   : > { %10097 = vmatprep.mubr.msk.f32.mxu0 %vm446_vm1, %v12164_v48 }
  0x6d   : > { %10098 = vmatmul.mubr.msk.f32.gmra.mrb[12].mxu0 %vm446_vm1, %v12171_v49 }
  0x6e   : > { %10100 = vmatprep.mubr.msk.f32.mxu0 %vm446_vm1, %v12174_v50 }
  0x71   : > { %10101 = vmatmul.mubr.msk.f32.gmra.mrb[14].mxu0 %vm446_vm1, %v12181_v51 }
  0x72   : > { %10103 = vmatprep.mubr.msk.f32.mxu0 %vm446_vm1, %v12184_v52 }
  0x75   : > { %10104 = vmatmul.mubr.msk.f32.gmra.mrb[16].mxu0 %vm446_vm1, %v12191_v53 }
  0x76   : > { %10106 = vmatprep.mubr.msk.f32.mxu0 %vm446_vm1, %v12194_v54 }
  0x79   : > { %10107 = vmatmul.mubr.msk.f32.gmra.mrb[18].mxu0 %vm446_vm1, %v12201_v55 }
  0x7a   : > { %10109 = vmatprep.mubr.msk.f32.mxu0 %vm446_vm1, %v12204_v56 }
  0x7d   : > { %10110 = vmatmul.mubr.msk.f32.gmra.mrb[20].mxu0 %vm446_vm1, %v12211_v57 }
  0x7e   : > { %10112 = vmatprep.mubr.msk.f32.mxu0 %vm446_vm1, %v12214_v58 }
  0x81   : > { %10113 = vmatmul.mubr.msk.f32.gmra.mrb[22].mxu0 %vm446_vm1, %v12221_v59 }
  0x82   : > { %10115 = vmatprep.mubr.msk.f32.mxu0 %vm446_vm1, %v12224_v60 }
  0x85   : > { %10116 = vmatmul.mubr.msk.f32.gmra.mrb[24].mxu0 %vm446_vm1, %v12231_v61 }
  0x86   : > { %10118 = vmatprep.mubr.msk.f32.mxu0 %vm446_vm1, %v12234_v62 }
  0x89   : > { %10119 = vmatmul.mubr.msk.f32.gmra.mrb[26].mxu0 %vm446_vm1, %v12241_v63 }
  0x8a   : > { %10121 = vmatprep.mubr.msk.f32.mxu0 %vm446_vm1, %v12244_v0 }
  0x8d   : > { %10122 = vmatmul.mubr.msk.f32.gmra.mrb[28].mxu0 %vm446_vm1, %v12251_v1 }
  0x8e   : > { %10124 = vmatprep.mubr.msk.f32.mxu0 %vm446_vm1, %v12254_v2 }
  0x91   : > { %10125 = vmatmul.mubr.msk.f32.gmra.mrb[30].mxu0 %vm446_vm1, %v12261_v3 }
  0x92   : > { %10129 = vmatprep.mubr.msk.f32.mxu0 %vm446_vm1, %v1096_v5  ;;  %v12282_v5 = vld [vmem:[%s11938_s22 + $0x22] sm:$0xff] }
  0x93   : > { %15208 = vst [vmem:[#allocation12_spill] sm:$0xff] %v12282_v5 }
  0x95   : > { %10130 = vmatmul.mubr.msk.f32.vlgmr.msra.gmra.mrb[0].mxu0 %vm446_vm1, %v1097_v35  ;;  %v12297_v35 = vld [vmem:[%s11938_s22 + $0x4a] sm:$0xff] }
  0x96   : > { %10178 = vmatpush3.msk.msra.mxu0 %vm543_vm0, %v12111_v38  ;;  %10132 = vmatprep.mubr.msk.f32.mxu0 %vm446_vm1, %v12269_v36  ;;  %v12294_v38 = vld [vmem:[%s11938_s22 + $0x3a] sm:$0xff]  ;;  %15211 = vst [vmem:[#allocation15_spill] sm:$0xff] %v12297_v35  ;;  %v12304_v36 = vld [vmem:[%s11938_s22 + $0x52] sm:$0xff] }
  0x97   : > { %10227 = vmatprep.subr.msk.mxu0 %vm543_vm0, %v12274_v34  ;;  %15210 = vst [vmem:[#allocation14_spill] sm:$0xff] %v12294_v38  ;;  %15212 = vst [vmem:[#allocation16_spill] sm:$0xff] %v12304_v36 }
  0x99   : > { %10133 = vmatmul.mubr.msk.f32.gmra.mrb[2].mxu0 %vm446_vm1, %v12282_v5  ;;  %v12317_v5 = vld [vmem:[%s11938_s22 + $0x7a] sm:$0xff] }
  0x9a   : > { %10135 = vmatprep.mubr.msk.f32.mxu0 %vm446_vm1, %v12285_v33  ;;  %v12314_v33 = vld [vmem:[%s11938_s22 + $0x6a] sm:$0xff]  ;;  %15215 = vst [vmem:[#allocation19_spill] sm:$0xff] %v12317_v5 }
  0x9b   : > { %15214 = vst [vmem:[#allocation18_spill] sm:$0xff] %v12314_v33 }
  0x9d   : > { %10136 = vmatmul.mubr.msk.f32.gmra.mrb[4].mxu0 %vm446_vm1, %v12294_v38  ;;  %v12327_v38 = vld [vmem:[%s11938_s22 + $0x92] sm:$0xff] }
  0x9e   : > { %10138 = vmatprep.mubr.msk.f32.mxu0 %vm446_vm1, %v12297_v35  ;;  %v12324_v35 = vld [vmem:[%s11938_s22 + $0x82] sm:$0xff]  ;;  %15217 = vst [vmem:[#allocation21_spill] sm:$0xff] %v12327_v38 }
  0x9f   : > { %15216 = vst [vmem:[#allocation20_spill] sm:$0xff] %v12324_v35 }
  0xa1   : > { %10139 = vmatmul.mubr.msk.f32.gmra.mrb[6].mxu0 %vm446_vm1, %v12304_v36  ;;  %v12337_v36 = vld [vmem:[%s11938_s22 + $0xaa] sm:$0xff] }
  0xa2   : > { %10141 = vmatprep.mubr.msk.f32.mxu0 %vm446_vm1, %v12307_v32  ;;  %v12334_v32 = vld [vmem:[%s11938_s22 + $0x9a] sm:$0xff]  ;;  %15219 = vst [vmem:[#allocation23_spill] sm:$0xff] %v12337_v36 }
  0xa3   : > { %15218 = vst [vmem:[#allocation22_spill] sm:$0xff] %v12334_v32 }
  0xa5   : > { %10142 = vmatmul.mubr.msk.f32.gmra.mrb[8].mxu0 %vm446_vm1, %v12314_v33  ;;  %v12347_v33 = vld [vmem:[%s11938_s22 + $0xc2] sm:$0xff] }
  0xa6   : > { %10144 = vmatprep.mubr.msk.f32.mxu0 %vm446_vm1, %v12317_v5  ;;  %v12344_v5 = vld [vmem:[%s11938_s22 + $0xb2] sm:$0xff]  ;;  %15221 = vst [vmem:[#allocation25_spill] sm:$0xff] %v12347_v33 }
  0xa7   : > { %15220 = vst [vmem:[#allocation24_spill] sm:$0xff] %v12344_v5 }
  0xa9   : > { %10145 = vmatmul.mubr.msk.f32.gmra.mrb[10].mxu0 %vm446_vm1, %v12324_v35  ;;  %v12357_v35 = vld [vmem:[%s11938_s22 + $0xda] sm:$0xff] }
  0xaa   : > { %10147 = vmatprep.mubr.msk.f32.mxu0 %vm446_vm1, %v12327_v38  ;;  %v12354_v38 = vld [vmem:[%s11938_s22 + $0xca] sm:$0xff]  ;;  %15223 = vst [vmem:[#allocation27_spill] sm:$0xff] %v12357_v35 }
  0xab   : > { %15222 = vst [vmem:[#allocation26_spill] sm:$0xff] %v12354_v38 }
  0xad   : > { %10148 = vmatmul.mubr.msk.f32.gmra.mrb[12].mxu0 %vm446_vm1, %v12334_v32  ;;  %v12367_v32 = vld [vmem:[%s11938_s22 + $0xf2] sm:$0xff] }
  0xae   : > { %10150 = vmatprep.mubr.msk.f32.mxu0 %vm446_vm1, %v12337_v36  ;;  %v12364_v36 = vld [vmem:[%s11938_s22 + $0xe2] sm:$0xff]  ;;  %15225 = vst [vmem:[#allocation29_spill] sm:$0xff] %v12367_v32 }
  0xaf   : > { %15224 = vst [vmem:[#allocation28_spill] sm:$0xff] %v12364_v36 }
  0xb1   : > { %10151 = vmatmul.mubr.msk.f32.gmra.mrb[14].mxu0 %vm446_vm1, %v12344_v5  ;;  %v12377_v5 = vld [vmem:[%s11938_s22 + $0x10a] sm:$0xff] }
  0xb2   : > { %10153 = vmatprep.mubr.msk.f32.mxu0 %vm446_vm1, %v12347_v33  ;;  %v12374_v33 = vld [vmem:[%s11938_s22 + $0xfa] sm:$0xff]  ;;  %15227 = vst [vmem:[#allocation31_spill] sm:$0xff] %v12377_v5 }
  0xb3   : > { %15226 = vst [vmem:[#allocation30_spill] sm:$0xff] %v12374_v33 }
  0xb5   : > { %10154 = vmatmul.mubr.msk.f32.gmra.mrb[16].mxu0 %vm446_vm1, %v12354_v38  ;;  %v12387_v38 = vld [vmem:[%s11938_s22 + $0x122] sm:$0xff] }
  0xb6   : > { %10156 = vmatprep.mubr.msk.f32.mxu0 %vm446_vm1, %v12357_v35  ;;  %v12384_v35 = vld [vmem:[%s11938_s22 + $0x112] sm:$0xff]  ;;  %15229 = vst [vmem:[#allocation33_spill] sm:$0xff] %v12387_v38 }
  0xb7   : > { %15228 = vst [vmem:[#allocation32_spill] sm:$0xff] %v12384_v35 }
  0xb9   : > { %10157 = vmatmul.mubr.msk.f32.gmra.mrb[18].mxu0 %vm446_vm1, %v12364_v36  ;;  %v12397_v36 = vld [vmem:[%s11938_s22 + $0x13a] sm:$0xff] }
  0xba   : > { %10159 = vmatprep.mubr.msk.f32.mxu0 %vm446_vm1, %v12367_v32  ;;  %v12394_v32 = vld [vmem:[%s11938_s22 + $0x12a] sm:$0xff]  ;;  %15230 = vst [vmem:[#allocation34_spill] sm:$0xff] %v12397_v36 }
  0xbd   : > { %10160 = vmatmul.mubr.msk.f32.gmra.mrb[20].mxu0 %vm446_vm1, %v12374_v33  ;;  %v12407_v33 = vld [vmem:[%s11938_s22 + $0x152] sm:$0xff] }
  0xbe   : > { %10162 = vmatprep.mubr.msk.f32.mxu0 %vm446_vm1, %v12377_v5  ;;  %v12404_v5 = vld [vmem:[%s11938_s22 + $0x142] sm:$0xff]  ;;  %15231 = vst [vmem:[#allocation35_spill] sm:$0xff] %v12407_v33 }
  0xc1   : > { %10163 = vmatmul.mubr.msk.f32.gmra.mrb[22].mxu0 %vm446_vm1, %v12384_v35  ;;  %v12417_v35 = vld [vmem:[%s11938_s22 + $0x16a] sm:$0xff] }
  0xc2   : > { %10165 = vmatprep.mubr.msk.f32.mxu0 %vm446_vm1, %v12387_v38  ;;  %v12414_v38 = vld [vmem:[%s11938_s22 + $0x15a] sm:$0xff]  ;;  %15232 = vst [vmem:[#allocation36_spill] sm:$0xff] %v12417_v35 }
  0xc5   : > { %10166 = vmatmul.mubr.msk.f32.gmra.mrb[24].mxu0 %vm446_vm1, %v12394_v32 }
  0xc6   : > { %10168 = vmatprep.mubr.msk.f32.mxu0 %vm446_vm1, %v12397_v36  ;;  %v12424_v36 = vld [vmem:[%s11938_s22 + $0x172] sm:$0xff] }
  0xc9   : > { %10169 = vmatmul.mubr.msk.f32.gmra.mrb[26].mxu0 %vm446_vm1, %v12404_v5 }
  0xca   : > { %10171 = vmatprep.mubr.msk.f32.mxu0 %vm446_vm1, %v12407_v33  ;;  %v2296_v33 = vld [vmem:[%s15057_s2 + $0x14] sm:$0xf] }
  0xcd   : > { %10172 = vmatmul.mubr.msk.f32.gmra.mrb[28].mxu0 %vm446_vm1, %v12414_v38 }
  0xce   : > { %10174 = vmatprep.mubr.msk.f32.mxu0 %vm446_vm1, %v12417_v35 }
  0xd1   : > { %10175 = vmatmul.mubr.msk.f32.gmra.mrb[30].mxu0 %vm446_vm1, %v12424_v36 }
  0xd2   : > { %10179 = vmatprep.mubr.msk.f32.mxu0 %vm446_vm1, %v12106_v37  ;;  %v12500_v37 = vld [vmem:[%s11938_s22 + $0x188] sm:$0xff] }
  0xd5   : > { %10180 = vmatmul.mubr.msk.f32.vlgmr.msra.gmra.mrb[0].mxu0 %vm446_vm1, %v12119_v39  ;;  %v2686_v39 = vld [vmem:[%s15057_s2 + $0x18] sm:$0xf] }
  0xd6   : > { %10228 = vmatpush3.msk.msra.mxu0 %vm543_vm0, %v12274_v34  ;;  %10182 = vmatprep.mubr.msk.f32.mxu0 %vm446_vm1, %v12122_v40  ;;  %v12493_v34 = vld [vmem:[%s11938_s22 + $0x180] sm:$0xff] }
  0xd7   : > { %10277 = vmatprep.subr.msk.mxu0 %vm543_vm0, %v2296_v33 }
  0xd9   : > { %10183 = vmatmul.mubr.msk.f32.gmra.mrb[2].mxu0 %vm446_vm1, %v12131_v41 }
  0xda   : > { %10185 = vmatprep.mubr.msk.f32.mxu0 %vm446_vm1, %v12134_v42 }
  0xdd   : > { %10186 = vmatmul.mubr.msk.f32.gmra.mrb[4].mxu0 %vm446_vm1, %v12141_v43 }
  0xde   : > { %10188 = vmatprep.mubr.msk.f32.mxu0 %vm446_vm1, %v12144_v44 }
  0xe1   : > { %10189 = vmatmul.mubr.msk.f32.gmra.mrb[6].mxu0 %vm446_vm1, %v12151_v45 }
  0xe2   : > { %10191 = vmatprep.mubr.msk.f32.mxu0 %vm446_vm1, %v12154_v46 }
  0xe5   : > { %10192 = vmatmul.mubr.msk.f32.gmra.mrb[8].mxu0 %vm446_vm1, %v12161_v47 }
  0xe6   : > { %10194 = vmatprep.mubr.msk.f32.mxu0 %vm446_vm1, %v12164_v48 }
  0xe9   : > { %10195 = vmatmul.mubr.msk.f32.gmra.mrb[10].mxu0 %vm446_vm1, %v12171_v49 }
  0xea   : > { %10197 = vmatprep.mubr.msk.f32.mxu0 %vm446_vm1, %v12174_v50 }
  0xed   : > { %10198 = vmatmul.mubr.msk.f32.gmra.mrb[12].mxu0 %vm446_vm1, %v12181_v51 }
  0xee   : > { %10200 = vmatprep.mubr.msk.f32.mxu0 %vm446_vm1, %v12184_v52 }
  0xf1   : > { %10201 = vmatmul.mubr.msk.f32.gmra.mrb[14].mxu0 %vm446_vm1, %v12191_v53 }
  0xf2   : > { %10203 = vmatprep.mubr.msk.f32.mxu0 %vm446_vm1, %v12194_v54 }
  0xf5   : > { %10204 = vmatmul.mubr.msk.f32.gmra.mrb[16].mxu0 %vm446_vm1, %v12201_v55 }
  0xf6   : > { %10206 = vmatprep.mubr.msk.f32.mxu0 %vm446_vm1, %v12204_v56 }
  0xf9   : > { %10207 = vmatmul.mubr.msk.f32.gmra.mrb[18].mxu0 %vm446_vm1, %v12211_v57 }
  0xfa   : > { %10209 = vmatprep.mubr.msk.f32.mxu0 %vm446_vm1, %v12214_v58 }
  0xfd   : > { %10210 = vmatmul.mubr.msk.f32.gmra.mrb[20].mxu0 %vm446_vm1, %v12221_v59 }
  0xfe   : > { %10212 = vmatprep.mubr.msk.f32.mxu0 %vm446_vm1, %v12224_v60 }
 0x101   : > { %10213 = vmatmul.mubr.msk.f32.gmra.mrb[22].mxu0 %vm446_vm1, %v12231_v61 }
 0x102   : > { %10215 = vmatprep.mubr.msk.f32.mxu0 %vm446_vm1, %v12234_v62 }
 0x105   : > { %10216 = vmatmul.mubr.msk.f32.gmra.mrb[24].mxu0 %vm446_vm1, %v12241_v63 }
 0x106   : > { %10218 = vmatprep.mubr.msk.f32.mxu0 %vm446_vm1, %v12244_v0 }
 0x109   : > { %10219 = vmatmul.mubr.msk.f32.gmra.mrb[26].mxu0 %vm446_vm1, %v12251_v1 }
 0x10a   : > { %10221 = vmatprep.mubr.msk.f32.mxu0 %vm446_vm1, %v12254_v2 }
 0x10d   : > { %10222 = vmatmul.mubr.msk.f32.gmra.mrb[28].mxu0 %vm446_vm1, %v12261_v3 }
 0x10e   : > { %10224 = vmatprep.mubr.msk.f32.mxu0 %vm446_vm1, %v12493_v34 }
 0x111   : > { %10225 = vmatmul.mubr.msk.f32.gmra.mrb[30].mxu0 %vm446_vm1, %v12500_v37 }
 0x112   : > { %10229 = vmatprep.mubr.msk.f32.mxu0 %vm446_vm1, %v11943_v4  ;;  %v15233_v4 = vld [vmem:[#allocation8_spill] sm:$0xff] }
 0x115   : > { %10230 = vmatmul.mubr.msk.f32.vlgmr.msra.gmra.mrb[0].mxu0 %vm446_vm1, %v11956_v6  ;;  %v15234_v6 = vld [vmem:[#allocation9_spill] sm:$0xff] }
 0x116   : > { %10278 = vmatpush3.msk.msra.mxu0 %vm543_vm0, %v2296_v33  ;;  %10232 = vmatprep.mubr.msk.f32.mxu0 %vm446_vm1, %v11959_v7  ;;  %v12568_v33 = vld [vmem:[%s11938_s22 + $0x181] sm:$0xff] }
 0x117   : > { %10327 = vmatprep.subr.msk.mxu0 %vm543_vm0, %v2686_v39  ;;  %15235 = vst [vmem:[#allocation37_spill] sm:$0xff] %v12568_v33 }
 0x119   : > { %10233 = vmatmul.mubr.msk.f32.gmra.mrb[2].mxu0 %vm446_vm1, %v11968_v8 }
 0x11a   : > { %10235 = vmatprep.mubr.msk.f32.mxu0 %vm446_vm1, %v11971_v9 }
 0x11d   : > { %10236 = vmatmul.mubr.msk.f32.gmra.mrb[4].mxu0 %vm446_vm1, %v11978_v10 }
 0x11e   : > { %10238 = vmatprep.mubr.msk.f32.mxu0 %vm446_vm1, %v11981_v11 }
 0x121   : > { %10239 = vmatmul.mubr.msk.f32.gmra.mrb[6].mxu0 %vm446_vm1, %v11988_v12 }
 0x122   : > { %10241 = vmatprep.mubr.msk.f32.mxu0 %vm446_vm1, %v11991_v13 }
 0x125   : > { %10242 = vmatmul.mubr.msk.f32.gmra.mrb[8].mxu0 %vm446_vm1, %v11998_v14 }
 0x126   : > { %10244 = vmatprep.mubr.msk.f32.mxu0 %vm446_vm1, %v12001_v15 }
 0x129   : > { %10245 = vmatmul.mubr.msk.f32.gmra.mrb[10].mxu0 %vm446_vm1, %v12008_v16 }
 0x12a   : > { %10247 = vmatprep.mubr.msk.f32.mxu0 %vm446_vm1, %v12011_v17 }
 0x12d   : > { %10248 = vmatmul.mubr.msk.f32.gmra.mrb[12].mxu0 %vm446_vm1, %v12018_v18 }
 0x12e   : > { %10250 = vmatprep.mubr.msk.f32.mxu0 %vm446_vm1, %v12021_v19 }
 0x131   : > { %10251 = vmatmul.mubr.msk.f32.gmra.mrb[14].mxu0 %vm446_vm1, %v12028_v20 }
 0x132   : > { %10253 = vmatprep.mubr.msk.f32.mxu0 %vm446_vm1, %v12031_v21 }
 0x135   : > { %10254 = vmatmul.mubr.msk.f32.gmra.mrb[16].mxu0 %vm446_vm1, %v12038_v22 }
 0x136   : > { %10256 = vmatprep.mubr.msk.f32.mxu0 %vm446_vm1, %v12041_v23 }
 0x139   : > { %10257 = vmatmul.mubr.msk.f32.gmra.mrb[18].mxu0 %vm446_vm1, %v12048_v24 }
 0x13a   : > { %10259 = vmatprep.mubr.msk.f32.mxu0 %vm446_vm1, %v12051_v25 }
 0x13d   : > { %10260 = vmatmul.mubr.msk.f32.gmra.mrb[20].mxu0 %vm446_vm1, %v12058_v26 }
 0x13e   : > { %10262 = vmatprep.mubr.msk.f32.mxu0 %vm446_vm1, %v12061_v27  ;;  %v15236_v27 = vld [vmem:[#allocation10_spill] sm:$0xff] }
 0x141   : > { %10263 = vmatmul.mubr.msk.f32.gmra.mrb[22].mxu0 %vm446_vm1, %v12068_v28  ;;  %v15248_v28 = vld [vmem:[#allocation21_spill] sm:$0xff] }
 0x142   : > { %10265 = vmatprep.mubr.msk.f32.mxu0 %vm446_vm1, %v12071_v29  ;;  %v12575_v29 = vld [vmem:[%s11938_s22 + $0x189] sm:$0xff] }
 0x143   : > { %15237 = vst [vmem:[#allocation38_spill] sm:$0xff] %v12575_v29 }
 0x145   : > { %10266 = vmatmul.mubr.msk.f32.gmra.mrb[24].mxu0 %vm446_vm1, %v12078_v30  ;;  %v15244_v30 = vld [vmem:[#allocation17_spill] sm:$0xff] }
 0x146   : > { %10268 = vmatprep.mubr.msk.f32.mxu0 %vm446_vm1, %v12081_v31  ;;  %v15238_v31 = vld [vmem:[#allocation11_spill] sm:$0xff] }
 0x149   : > { %10269 = vmatmul.mubr.msk.f32.gmra.mrb[26].mxu0 %vm446_vm1, %v15233_v4  ;;  %v15239_v4 = vld [vmem:[#allocation12_spill] sm:$0xff] }
 0x14a   : > { %10271 = vmatprep.mubr.msk.f32.mxu0 %vm446_vm1, %v15234_v6  ;;  %v3075_v6 = vld [vmem:[%s15057_s2 + $0x1c] sm:$0xf] }
 0x14d   : > { %10272 = vmatmul.mubr.msk.f32.gmra.mrb[28].mxu0 %vm446_vm1, %v15236_v27  ;;  %v15240_v27 = vld [vmem:[#allocation13_spill] sm:$0xff] }
 0x14e   : > { %10274 = vmatprep.mubr.msk.f32.mxu0 %vm446_vm1, %v12568_v33  ;;  %v15241_v33 = vld [vmem:[#allocation14_spill] sm:$0xff] }
 0x151   : > { %10275 = vmatmul.mubr.msk.f32.gmra.mrb[30].mxu0 %vm446_vm1, %v12575_v29  ;;  %v15242_v29 = vld [vmem:[#allocation15_spill] sm:$0xff] }
 0x152   : > { %10279 = vmatprep.mubr.msk.f32.mxu0 %vm446_vm1, %v15238_v31  ;;  %v15243_v31 = vld [vmem:[#allocation16_spill] sm:$0xff] }
 0x155   : > { %10280 = vmatmul.mubr.msk.f32.vlgmr.msra.gmra.mrb[0].mxu0 %vm446_vm1, %v15239_v4  ;;  %v15245_v4 = vld [vmem:[#allocation18_spill] sm:$0xff] }
 0x156   : > { %10328 = vmatpush3.msk.msra.mxu0 %vm543_vm0, %v2686_v39  ;;  %10282 = vmatprep.mubr.msk.f32.mxu0 %vm446_vm1, %v15240_v27  ;;  %v15246_v39 = vld [vmem:[#allocation19_spill] sm:$0xff]  ;;  %v15247_v27 = vld [vmem:[#allocation20_spill] sm:$0xff] }
 0x157   : > { %10377 = vmatprep.subr.msk.mxu0 %vm543_vm0, %v3075_v6 }
 0x159   : > { %10283 = vmatmul.mubr.msk.f32.gmra.mrb[2].mxu0 %vm446_vm1, %v15241_v33  ;;  %v15249_v33 = vld [vmem:[#allocation22_spill] sm:$0xff] }
 0x15a   : > { %10285 = vmatprep.mubr.msk.f32.mxu0 %vm446_vm1, %v15242_v29  ;;  %v15250_v29 = vld [vmem:[#allocation23_spill] sm:$0xff] }
 0x15d   : > { %10286 = vmatmul.mubr.msk.f32.gmra.mrb[4].mxu0 %vm446_vm1, %v15243_v31  ;;  %v15251_v31 = vld [vmem:[#allocation24_spill] sm:$0xff] }
 0x15e   : > { %10288 = vmatprep.mubr.msk.f32.mxu0 %vm446_vm1, %v15244_v30  ;;  %v15252_v30 = vld [vmem:[#allocation25_spill] sm:$0xff] }
 0x161   : > { %10289 = vmatmul.mubr.msk.f32.gmra.mrb[6].mxu0 %vm446_vm1, %v15245_v4 }
 0x162   : > { %10291 = vmatprep.mubr.msk.f32.mxu0 %vm446_vm1, %v15246_v39  ;;  %v15253_v39 = vld [vmem:[#allocation26_spill] sm:$0xff] }
 0x165   : > { %10292 = vmatmul.mubr.msk.f32.gmra.mrb[8].mxu0 %vm446_vm1, %v15247_v27  ;;  %v15254_v27 = vld [vmem:[#allocation27_spill] sm:$0xff] }
 0x166   : > { %10294 = vmatprep.mubr.msk.f32.mxu0 %vm446_vm1, %v15248_v28  ;;  %v15255_v28 = vld [vmem:[#allocation28_spill] sm:$0xff] }
 0x169   : > { %10295 = vmatmul.mubr.msk.f32.gmra.mrb[10].mxu0 %vm446_vm1, %v15249_v33  ;;  %v15256_v33 = vld [vmem:[#allocation29_spill] sm:$0xff] }
 0x16a   : > { %10297 = vmatprep.mubr.msk.f32.mxu0 %vm446_vm1, %v15250_v29  ;;  %v15257_v29 = vld [vmem:[#allocation30_spill] sm:$0xff] }
 0x16d   : > { %10298 = vmatmul.mubr.msk.f32.gmra.mrb[12].mxu0 %vm446_vm1, %v15251_v31  ;;  %v15258_v31 = vld [vmem:[#allocation31_spill] sm:$0xff] }
 0x16e   : > { %10300 = vmatprep.mubr.msk.f32.mxu0 %vm446_vm1, %v15252_v30  ;;  %v15259_v30 = vld [vmem:[#allocation32_spill] sm:$0xff] }
 0x171   : > { %10301 = vmatmul.mubr.msk.f32.gmra.mrb[14].mxu0 %vm446_vm1, %v15253_v39  ;;  %v15260_v39 = vld [vmem:[#allocation33_spill] sm:$0xff] }
 0x172   : > { %10303 = vmatprep.mubr.msk.f32.mxu0 %vm446_vm1, %v15254_v27  ;;  %v15261_v27 = vld [vmem:[#allocation34_spill] sm:$0xff] }
 0x175   : > { %10304 = vmatmul.mubr.msk.f32.gmra.mrb[16].mxu0 %vm446_vm1, %v15255_v28 }
 0x176   : > { %10306 = vmatprep.mubr.msk.f32.mxu0 %vm446_vm1, %v15256_v33  ;;  %v15262_v33 = vld [vmem:[#allocation35_spill] sm:$0xff] }
 0x179   : > { %10307 = vmatmul.mubr.msk.f32.gmra.mrb[18].mxu0 %vm446_vm1, %v15257_v29 }
 0x17a   : > { %10309 = vmatprep.mubr.msk.f32.mxu0 %vm446_vm1, %v15258_v31 }
 0x17d   : > { %10310 = vmatmul.mubr.msk.f32.gmra.mrb[20].mxu0 %vm446_vm1, %v15259_v30  ;;  %v12643_v30 = vld [vmem:[%s11938_s22 + $0x182] sm:$0xff] }
 0x17e   : > { %10312 = vmatprep.mubr.msk.f32.mxu0 %vm446_vm1, %v15260_v39 }
 0x181   : > { %10313 = vmatmul.mubr.msk.f32.gmra.mrb[22].mxu0 %vm446_vm1, %v12394_v32 }
 0x182   : > { %10315 = vmatprep.mubr.msk.f32.mxu0 %vm446_vm1, %v15261_v27  ;;  %v12650_v27 = vld [vmem:[%s11938_s22 + $0x18a] sm:$0xff] }
 0x185   : > { %10316 = vmatmul.mubr.msk.f32.gmra.mrb[24].mxu0 %vm446_vm1, %v12404_v5 }
 0x186   : > { %10318 = vmatprep.mubr.msk.f32.mxu0 %vm446_vm1, %v15262_v33 }
 0x189   : > { %10319 = vmatmul.mubr.msk.f32.gmra.mrb[26].mxu0 %vm446_vm1, %v12414_v38 }
 0x18a   : > { %10321 = vmatprep.mubr.msk.f32.mxu0 %vm446_vm1, %v12417_v35  ;;  %v3464_v35 = vld [vmem:[%s15057_s2 + $0x20] sm:$0xf] }
 0x18d   : > { %10322 = vmatmul.mubr.msk.f32.gmra.mrb[28].mxu0 %vm446_vm1, %v12424_v36 }
 0x18e   : > { %10324 = vmatprep.mubr.msk.f32.mxu0 %vm446_vm1, %v12643_v30 }
 0x191   : > { %10325 = vmatmul.mubr.msk.f32.gmra.mrb[30].mxu0 %vm446_vm1, %v12650_v27 }
 0x192   : > { %10329 = vmatprep.mubr.msk.f32.mxu0 %vm446_vm1, %v12122_v40  ;;  %v8870_v40 = vld [vmem:[%s11938_s22 + $0x198] sm:$0xff] }
 0x195   : > { %10330 = vmatmul.mubr.msk.f32.vlgmr.msra.gmra.mrb[0].mxu0 %vm446_vm1, %v12131_v41  ;;  %v8871_v41 = vld [vmem:[%s11938_s22 + $0x1a0] sm:$0xff] }
 0x196   : > { %10378 = vmatpush3.msk.msra.mxu0 %vm543_vm0, %v3075_v6  ;;  %10332 = vmatprep.mubr.msk.f32.mxu0 %vm446_vm1, %v12134_v42  ;;  %v15281_v42 = vld [vmem:[#allocation22_spill] sm:$0xff] }
 0x197   : > { %10427 = vmatprep.subr.msk.mxu0 %vm543_vm0, %v3464_v35 }
 0x199   : > { %10333 = vmatmul.mubr.msk.f32.gmra.mrb[2].mxu0 %vm446_vm1, %v12141_v43  ;;  %v15282_v43 = vld [vmem:[#allocation23_spill] sm:$0xff] }
 0x19a   : > { %10335 = vmatprep.mubr.msk.f32.mxu0 %vm446_vm1, %v12144_v44  ;;  %v15283_v44 = vld [vmem:[#allocation24_spill] sm:$0xff] }
 0x19d   : > { %10336 = vmatmul.mubr.msk.f32.gmra.mrb[4].mxu0 %vm446_vm1, %v12151_v45  ;;  %v15284_v45 = vld [vmem:[#allocation25_spill] sm:$0xff] }
 0x19e   : > { %10338 = vmatprep.mubr.msk.f32.mxu0 %vm446_vm1, %v12154_v46  ;;  %v15285_v46 = vld [vmem:[#allocation26_spill] sm:$0xff] }
 0x1a1   : > { %10339 = vmatmul.mubr.msk.f32.gmra.mrb[6].mxu0 %vm446_vm1, %v12161_v47  ;;  %v15286_v47 = vld [vmem:[#allocation27_spill] sm:$0xff] }
 0x1a2   : > { %10341 = vmatprep.mubr.msk.f32.mxu0 %vm446_vm1, %v12164_v48  ;;  %v15287_v48 = vld [vmem:[#allocation29_spill] sm:$0xff] }
 0x1a5   : > { %10342 = vmatmul.mubr.msk.f32.gmra.mrb[8].mxu0 %vm446_vm1, %v12171_v49  ;;  %v15288_v49 = vld [vmem:[#allocation32_spill] sm:$0xff] }
 0x1a6   : > { %10344 = vmatprep.mubr.msk.f32.mxu0 %vm446_vm1, %v12174_v50  ;;  %v9001_v50 = vld [vmem:[%s11938_s22 + $0x1a2] sm:$0xff] }
 0x1a9   : > { %10345 = vmatmul.mubr.msk.f32.gmra.mrb[10].mxu0 %vm446_vm1, %v12181_v51  ;;  %v15128_v51 = vmov 0.0  }
 0x1aa   : > { %10347 = vmatprep.mubr.msk.f32.mxu0 %vm446_vm1, %v12184_v52  ;;  %4405 = vst.msk [vmem:[#allocation2 + $0x20] sm:$0xff] %vm3862_vm2, %v15128_v51  ;;  %4400 = vst.msk [vmem:[#allocation2] sm:$0xff] %vm3862_vm2, %v15128_v51  ;;  %v3933_v52 = vld [vmem:[%s15064_s9 + $0x8] sm:$0xff]  ;;  %10512 = vmatprep.mubr.msk.f32.mxu1 %vm11859_vm4, %v15128_v51 }
 0x1ab   : > { %4406 = vst.msk [vmem:[#allocation2 + $0x28] sm:$0x3] %vm4402_vm3, %v15128_v51  ;;  %4403 = vst.msk [vmem:[#allocation2 + $0x10] sm:$0x3] %vm4402_vm3, %v15128_v51 }
 0x1ac   : > { %4401 = vst.msk [vmem:[#allocation2 + $0x8] sm:$0xff] %vm3862_vm2, %v15128_v51  ;;  %4404 = vst.msk [vmem:[#allocation2 + $0x18] sm:$0xff] %vm3862_vm2, %v15128_v51 }
 0x1ad   : > { %10348 = vmatmul.mubr.msk.f32.gmra.mrb[12].mxu0 %vm446_vm1, %v12191_v53  ;;  %4407 = vst.msk [vmem:[#allocation2 + $0x30] sm:$0xff] %vm3862_vm2, %v15128_v51  ;;  %4408 = vst.msk [vmem:[#allocation2 + $0x38] sm:$0xff] %vm3862_vm2, %v15128_v51 }
 0x1ae   : > { %10350 = vmatprep.mubr.msk.f32.mxu0 %vm446_vm1, %v12194_v54  ;;  %4409 = vst.msk [vmem:[#allocation2 + $0x40] sm:$0x3] %vm4402_vm3, %v15128_v51  ;;  %4412 = vst.msk [vmem:[#allocation2 + $0x58] sm:$0x3] %vm4402_vm3, %v15128_v51  ;;  %v3934_v54 = vld [vmem:[%s15064_s9 + $0x10] sm:$0xff] }
 0x1af   : > { %4410 = vst.msk [vmem:[#allocation2 + $0x48] sm:$0xff] %vm3862_vm2, %v15128_v51  ;;  %4411 = vst.msk [vmem:[#allocation2 + $0x50] sm:$0xff] %vm3862_vm2, %v15128_v51 }
 0x1b0   : > { %4413 = vst.msk [vmem:[#allocation2 + $0x60] sm:$0xff] %vm3862_vm2, %v15128_v51  ;;  %4414 = vst.msk [vmem:[#allocation2 + $0x68] sm:$0xff] %vm3862_vm2, %v15128_v51 }
 0x1b1   : > { %10351 = vmatmul.mubr.msk.f32.gmra.mrb[14].mxu0 %vm446_vm1, %v12201_v55  ;;  %4415 = vst.msk [vmem:[#allocation2 + $0x70] sm:$0x3] %vm4402_vm3, %v15128_v51  ;;  %4418 = vst.msk [vmem:[#allocation2 + $0x88] sm:$0x3] %vm4402_vm3, %v15128_v51  ;;  %v3935_v55 = vld [vmem:[%s15064_s9 + $0x18] sm:$0xff] }
 0x1b2   : > { %10353 = vmatprep.mubr.msk.f32.mxu0 %vm446_vm1, %v12204_v56  ;;  %4416 = vst.msk [vmem:[#allocation2 + $0x78] sm:$0xff] %vm3862_vm2, %v15128_v51  ;;  %4417 = vst.msk [vmem:[#allocation2 + $0x80] sm:$0xff] %vm3862_vm2, %v15128_v51  ;;  %v11133_v56 = vpack.c.bf16 %v3935_v55, %v3934_v54 }
 0x1b3   : > { %4419 = vst.msk [vmem:[#allocation2 + $0x90] sm:$0xff] %vm3862_vm2, %v15128_v51  ;;  %4420 = vst.msk [vmem:[#allocation2 + $0x98] sm:$0xff] %vm3862_vm2, %v15128_v51 }
 0x1b4   : > { %4421 = vst.msk [vmem:[#allocation2 + $0xa0] sm:$0x3] %vm4402_vm3, %v15128_v51  ;;  %4424 = vst.msk [vmem:[#allocation2 + $0xb8] sm:$0x3] %vm4402_vm3, %v15128_v51 }
 0x1b5   : > { %10354 = vmatmul.mubr.msk.f32.gmra.mrb[16].mxu0 %vm446_vm1, %v12211_v57  ;;  %4422 = vst.msk [vmem:[#allocation2 + $0xa8] sm:$0xff] %vm3862_vm2, %v15128_v51  ;;  %4423 = vst.msk [vmem:[#allocation2 + $0xb0] sm:$0xff] %vm3862_vm2, %v15128_v51  ;;  %v3936_v57 = vld [vmem:[%s15064_s9 + $0x20] sm:$0xff] }
 0x1b6   : > { %10356 = vmatprep.mubr.msk.f32.mxu0 %vm446_vm1, %v12214_v58  ;;  %4425 = vst.msk [vmem:[#allocation2 + $0xc0] sm:$0xff] %vm3862_vm2, %v15128_v51  ;;  %4426 = vst.msk [vmem:[#allocation2 + $0xc8] sm:$0xff] %vm3862_vm2, %v15128_v51  ;;  %v3937_v58 = vld [vmem:[%s15064_s9 + $0x28] sm:$0xff] }
 0x1b7   : > { %4427 = vst.msk [vmem:[#allocation2 + $0xd0] sm:$0x3] %vm4402_vm3, %v15128_v51  ;;  %4430 = vst.msk [vmem:[#allocation2 + $0xe8] sm:$0x3] %vm4402_vm3, %v15128_v51 }
 0x1b8   : > { %4428 = vst.msk [vmem:[#allocation2 + $0xd8] sm:$0xff] %vm3862_vm2, %v15128_v51  ;;  %4429 = vst.msk [vmem:[#allocation2 + $0xe0] sm:$0xff] %vm3862_vm2, %v15128_v51 }
 0x1b9   : > { %10357 = vmatmul.mubr.msk.f32.gmra.mrb[18].mxu0 %vm446_vm1, %v12221_v59  ;;  %4431 = vst.msk [vmem:[#allocation2 + $0xf0] sm:$0xff] %vm3862_vm2, %v15128_v51  ;;  %4432 = vst.msk [vmem:[#allocation2 + $0xf8] sm:$0xff] %vm3862_vm2, %v15128_v51  ;;  %v11136_v59 = vpack.c.bf16 %v3937_v58, %v3936_v57 }
 0x1ba   : > { %10359 = vmatprep.mubr.msk.f32.mxu0 %vm446_vm1, %v12224_v60  ;;  %4433 = vst.msk [vmem:[#allocation2 + $0x100] sm:$0x3] %vm4402_vm3, %v15128_v51  ;;  %4436 = vst.msk [vmem:[#allocation2 + $0x118] sm:$0x3] %vm4402_vm3, %v15128_v51  ;;  %v3938_v60 = vld [vmem:[%s15064_s9 + $0x30] sm:$0xff] }
 0x1bb   : > { %4434 = vst.msk [vmem:[#allocation2 + $0x108] sm:$0xff] %vm3862_vm2, %v15128_v51  ;;  %4435 = vst.msk [vmem:[#allocation2 + $0x110] sm:$0xff] %vm3862_vm2, %v15128_v51 }
 0x1bc   : > { %4437 = vst.msk [vmem:[#allocation2 + $0x120] sm:$0xff] %vm3862_vm2, %v15128_v51  ;;  %4438 = vst.msk [vmem:[#allocation2 + $0x128] sm:$0xff] %vm3862_vm2, %v15128_v51 }
 0x1bd   : > { %10360 = vmatmul.mubr.msk.f32.gmra.mrb[20].mxu0 %vm446_vm1, %v12231_v61  ;;  %4439 = vst.msk [vmem:[#allocation2 + $0x130] sm:$0x3] %vm4402_vm3, %v15128_v51  ;;  %4442 = vst.msk [vmem:[#allocation2 + $0x148] sm:$0x3] %vm4402_vm3, %v15128_v51  ;;  %v3939_v61 = vld [vmem:[%s15064_s9 + $0x38] sm:$0xff] }
 0x1be   : > { %10362 = vmatprep.mubr.msk.f32.mxu0 %vm446_vm1, %v12234_v62  ;;  %4440 = vst.msk [vmem:[#allocation2 + $0x138] sm:$0xff] %vm3862_vm2, %v15128_v51  ;;  %4441 = vst.msk [vmem:[#allocation2 + $0x140] sm:$0xff] %vm3862_vm2, %v15128_v51  ;;  %v11139_v62 = vpack.c.bf16 %v3939_v61, %v3938_v60 }
 0x1bf   : > { %4443 = vst.msk [vmem:[#allocation2 + $0x150] sm:$0xff] %vm3862_vm2, %v15128_v51  ;;  %4444 = vst.msk [vmem:[#allocation2 + $0x158] sm:$0xff] %vm3862_vm2, %v15128_v51 }
 0x1c0   : > { %4445 = vst.msk [vmem:[#allocation2 + $0x160] sm:$0x3] %vm4402_vm3, %v15128_v51  ;;  %4448 = vst.msk [vmem:[#allocation2 + $0x178] sm:$0x3] %vm4402_vm3, %v15128_v51 }
 0x1c1   : > { %10363 = vmatmul.mubr.msk.f32.gmra.mrb[22].mxu0 %vm446_vm1, %v12241_v63  ;;  %4446 = vst.msk [vmem:[#allocation2 + $0x168] sm:$0xff] %vm3862_vm2, %v15128_v51  ;;  %4447 = vst.msk [vmem:[#allocation2 + $0x170] sm:$0xff] %vm3862_vm2, %v15128_v51  ;;  %v13000_v63 = vld [vmem:[%s15058_s3] ss:$0 sm:$0xff] }
 0x1c2   : > { %10365 = vmatprep.mubr.msk.f32.mxu0 %vm446_vm1, %v12244_v0  ;;  %4449 = vst.msk [vmem:[#allocation2 + $0x180] sm:$0xff] %vm3862_vm2, %v15128_v51  ;;  %4450 = vst.msk [vmem:[#allocation2 + $0x188] sm:$0xff] %vm3862_vm2, %v15128_v51 }
 0x1c3   : > { %4451 = vst.msk [vmem:[#allocation2 + $0x190] sm:$0x3] %vm4402_vm3, %v15128_v51  ;;  %4454 = vst.msk [vmem:[#allocation2 + $0x1a8] sm:$0x3] %vm4402_vm3, %v15128_v51 }
 0x1c4   : > { %4452 = vst.msk [vmem:[#allocation2 + $0x198] sm:$0xff] %vm3862_vm2, %v15128_v51  ;;  %4453 = vst.msk [vmem:[#allocation2 + $0x1a0] sm:$0xff] %vm3862_vm2, %v15128_v51 }
 0x1c5   : > { %10366 = vmatmul.mubr.msk.f32.gmra.mrb[24].mxu0 %vm446_vm1, %v12251_v1 }
 0x1c6   : > { %10368 = vmatprep.mubr.msk.f32.mxu0 %vm446_vm1, %v12254_v2 }
 0x1c9   : > { %10369 = vmatmul.mubr.msk.f32.gmra.mrb[26].mxu0 %vm446_vm1, %v12261_v3 }
 0x1ca   : > { %10371 = vmatprep.mubr.msk.f32.mxu0 %vm446_vm1, %v12493_v34 }
 0x1cd   : > { %10372 = vmatmul.mubr.msk.f32.gmra.mrb[28].mxu0 %vm446_vm1, %v12500_v37 }
 0x1ce   : > { %10374 = vmatprep.mubr.msk.f32.mxu0 %vm446_vm1, %v8870_v40 }
 0x1d1   : > { %10375 = vmatmul.mubr.msk.f32.gmra.mrb[30].mxu0 %vm446_vm1, %v8871_v41 }
 0x1d2   : > { %10379 = vmatprep.mubr.msk.f32.mxu0 %vm446_vm1, %v11959_v7  ;;  %v15263_v7 = vld [vmem:[#allocation3_spill] sm:$0xff] }
 0x1d5   : > { %10380 = vmatmul.mubr.msk.f32.vlgmr.msra.gmra.mrb[0].mxu0 %vm446_vm1, %v11968_v8  ;;  %v15264_v8 = vld [vmem:[#allocation4_spill] sm:$0xff] }
 0x1d6   : > { %10428 = vmatpush3.msk.msra.mxu0 %vm543_vm0, %v3464_v35  ;;  %10382 = vmatprep.mubr.msk.f32.mxu0 %vm446_vm1, %v11971_v9  ;;  %v15265_v9 = vld [vmem:[#allocation5_spill] sm:$0xff] }
 0x1d9   : > { %10383 = vmatmul.mubr.msk.f32.gmra.mrb[2].mxu0 %vm446_vm1, %v11978_v10  ;;  %v15266_v10 = vld [vmem:[#allocation6_spill] sm:$0xff] }
 0x1da   : > { %10385 = vmatprep.mubr.msk.f32.mxu0 %vm446_vm1, %v11981_v11  ;;  %v15267_v11 = vld [vmem:[#allocation7_spill] sm:$0xff] }
 0x1dd   : > { %10386 = vmatmul.mubr.msk.f32.gmra.mrb[4].mxu0 %vm446_vm1, %v11988_v12  ;;  %v15268_v12 = vld [vmem:[#allocation8_spill] sm:$0xff] }
 0x1de   : > { %10388 = vmatprep.mubr.msk.f32.mxu0 %vm446_vm1, %v11991_v13  ;;  %v15269_v13 = vld [vmem:[#allocation9_spill] sm:$0xff] }
 0x1e1   : > { %10389 = vmatmul.mubr.msk.f32.gmra.mrb[6].mxu0 %vm446_vm1, %v11998_v14  ;;  %v15270_v14 = vld [vmem:[#allocation10_spill] sm:$0xff] }
 0x1e2   : > { %10391 = vmatprep.mubr.msk.f32.mxu0 %vm446_vm1, %v12001_v15  ;;  %v15271_v15 = vld [vmem:[#allocation37_spill] sm:$0xff] }
 0x1e5   : > { %10392 = vmatmul.mubr.msk.f32.gmra.mrb[8].mxu0 %vm446_vm1, %v12008_v16  ;;  %v8935_v16 = vld [vmem:[%s11938_s22 + $0x199] sm:$0xff] }
 0x1e6   : > { %10394 = vmatprep.mubr.msk.f32.mxu0 %vm446_vm1, %v12011_v17  ;;  %v15272_v17 = vld [vmem:[#allocation38_spill] sm:$0xff] }
 0x1e9   : > { %10395 = vmatmul.mubr.msk.f32.gmra.mrb[10].mxu0 %vm446_vm1, %v12018_v18  ;;  %v8936_v18 = vld [vmem:[%s11938_s22 + $0x1a1] sm:$0xff] }
 0x1ea   : > { %10397 = vmatprep.mubr.msk.f32.mxu0 %vm446_vm1, %v12021_v19  ;;  %v15273_v19 = vld [vmem:[#allocation13_spill] sm:$0xff] }
 0x1ed   : > { %10398 = vmatmul.mubr.msk.f32.gmra.mrb[12].mxu0 %vm446_vm1, %v12028_v20  ;;  %v15274_v20 = vld [vmem:[#allocation14_spill] sm:$0xff] }
 0x1ee   : > { %10400 = vmatprep.mubr.msk.f32.mxu0 %vm446_vm1, %v12031_v21  ;;  %v15275_v21 = vld [vmem:[#allocation15_spill] sm:$0xff] }
 0x1f1   : > { %10401 = vmatmul.mubr.msk.f32.gmra.mrb[14].mxu0 %vm446_vm1, %v12038_v22  ;;  %v15276_v22 = vld [vmem:[#allocation16_spill] sm:$0xff] }
 0x1f2   : > { %10403 = vmatprep.mubr.msk.f32.mxu0 %vm446_vm1, %v12041_v23  ;;  %v15277_v23 = vld [vmem:[#allocation17_spill] sm:$0xff] }
 0x1f5   : > { %10404 = vmatmul.mubr.msk.f32.gmra.mrb[16].mxu0 %vm446_vm1, %v12048_v24  ;;  %v15278_v24 = vld [vmem:[#allocation19_spill] sm:$0xff] }
 0x1f6   : > { %10406 = vmatprep.mubr.msk.f32.mxu0 %vm446_vm1, %v12051_v25  ;;  %v15279_v25 = vld [vmem:[#allocation20_spill] sm:$0xff] }
 0x1f9   : > { %10407 = vmatmul.mubr.msk.f32.gmra.mrb[18].mxu0 %vm446_vm1, %v12058_v26  ;;  %v15280_v26 = vld [vmem:[#allocation21_spill] sm:$0xff] }
 0x1fa   : > { %10409 = vmatprep.mubr.msk.f32.mxu0 %vm446_vm1, %v15263_v7 }
 0x1fd   : > { %10410 = vmatmul.mubr.msk.f32.gmra.mrb[20].mxu0 %vm446_vm1, %v15264_v8 }
 0x1fe   : > { %10412 = vmatprep.mubr.msk.f32.mxu0 %vm446_vm1, %v15265_v9 }
 0x201   : > { %10413 = vmatmul.mubr.msk.f32.gmra.mrb[22].mxu0 %vm446_vm1, %v15266_v10 }
 0x202   : > { %10415 = vmatprep.mubr.msk.f32.mxu0 %vm446_vm1, %v15267_v11 }
 0x205   : > { %10416 = vmatmul.mubr.msk.f32.gmra.mrb[24].mxu0 %vm446_vm1, %v15268_v12 }
 0x206   : > { %10418 = vmatprep.mubr.msk.f32.mxu0 %vm446_vm1, %v15269_v13 }
 0x209   : > { %10419 = vmatmul.mubr.msk.f32.gmra.mrb[26].mxu0 %vm446_vm1, %v15270_v14 }
 0x20a   : > { %10421 = vmatprep.mubr.msk.f32.mxu0 %vm446_vm1, %v15271_v15 }
 0x20d   : > { %10422 = vmatmul.mubr.msk.f32.gmra.mrb[28].mxu0 %vm446_vm1, %v15272_v17 }
 0x20e   : > { %10424 = vmatprep.mubr.msk.f32.mxu0 %vm446_vm1, %v8935_v16 }
 0x211   : > { %10425 = vmatmul.mubr.msk.f32.gmra.mrb[30].mxu0 %vm446_vm1, %v8936_v18 }
 0x212   : > { %10429 = vmatprep.mubr.msk.f32.mxu0 %vm446_vm1, %v15273_v19 }
 0x215   : > { %10430 = vmatmul.mubr.msk.f32.vlgmr.msra.gmra.mrb[0].mxu0 %vm446_vm1, %v15274_v20 }
 0x216   : > { %10432 = vmatprep.mubr.msk.f32.mxu0 %vm446_vm1, %v15275_v21 }
 0x219   : > { %10433 = vmatmul.mubr.msk.f32.gmra.mrb[2].mxu0 %vm446_vm1, %v15276_v22 }
 0x21a   : > { %10435 = vmatprep.mubr.msk.f32.mxu0 %vm446_vm1, %v15277_v23 }
 0x21d   : > { %10436 = vmatmul.mubr.msk.f32.gmra.mrb[4].mxu0 %vm446_vm1, %v15245_v4 }
 0x21e   : > { %10438 = vmatprep.mubr.msk.f32.mxu0 %vm446_vm1, %v15278_v24 }
 0x221   : > { %10439 = vmatmul.mubr.msk.f32.gmra.mrb[6].mxu0 %vm446_vm1, %v15279_v25 }
 0x222   : > { %10441 = vmatprep.mubr.msk.f32.mxu0 %vm446_vm1, %v15280_v26 }
 0x225   : > { %10442 = vmatmul.mubr.msk.f32.gmra.mrb[8].mxu0 %vm446_vm1, %v15281_v42 }
 0x226   : > { %10444 = vmatprep.mubr.msk.f32.mxu0 %vm446_vm1, %v15282_v43 }
 0x229   : > { %10445 = vmatmul.mubr.msk.f32.gmra.mrb[10].mxu0 %vm446_vm1, %v15283_v44 }
 0x22a   : > { %10447 = vmatprep.mubr.msk.f32.mxu0 %vm446_vm1, %v15284_v45 }
 0x22d   : > { %10448 = vmatmul.mubr.msk.f32.gmra.mrb[12].mxu0 %vm446_vm1, %v15285_v46 }
 0x22e   : > { %10450 = vmatprep.mubr.msk.f32.mxu0 %vm446_vm1, %v15286_v47 }
 0x231   : > { %10451 = vmatmul.mubr.msk.f32.gmra.mrb[14].mxu0 %vm446_vm1, %v15255_v28  ;;  %v15289_v28 = vld [vmem:[#allocation34_spill] sm:$0xff] }
 0x232   : > { %10453 = vmatprep.mubr.msk.f32.mxu0 %vm446_vm1, %v15287_v48 }
 0x235   : > { %10454 = vmatmul.mubr.msk.f32.gmra.mrb[16].mxu0 %vm446_vm1, %v15257_v29  ;;  %v15290_v29 = vld [vmem:[#allocation36_spill] sm:$0xff] }
 0x236   : > { %10456 = vmatprep.mubr.msk.f32.mxu0 %vm446_vm1, %v15258_v31 }
 0x239   : > { %10457 = vmatmul.mubr.msk.f32.gmra.mrb[18].mxu0 %vm446_vm1, %v15288_v49 }
 0x23a   : > { %10459 = vmatprep.mubr.msk.f32.mxu0 %vm446_vm1, %v15260_v39 }
 0x23d   : > { %10460 = vmatmul.mubr.msk.f32.gmra.mrb[20].mxu0 %vm446_vm1, %v12394_v32  ;;  %v9000_v32 = vld [vmem:[%s11938_s22 + $0x19a] sm:$0xff] }
 0x23e   : > { %10462 = vmatprep.mubr.msk.f32.mxu0 %vm446_vm1, %v15289_v28 }
 0x241   : > { %10463 = vmatmul.mubr.msk.f32.gmra.mrb[22].mxu0 %vm446_vm1, %v12404_v5 }
 0x242   : > { %10465 = vmatprep.mubr.msk.f32.mxu0 %vm446_vm1, %v15262_v33 }
 0x245   : > { %10466 = vmatmul.mubr.msk.f32.gmra.mrb[24].mxu0 %vm446_vm1, %v12414_v38 }
 0x246   : > { %10468 = vmatprep.mubr.msk.f32.mxu0 %vm446_vm1, %v15290_v29 }
 0x249   : > { %10469 = vmatmul.mubr.msk.f32.gmra.mrb[26].mxu0 %vm446_vm1, %v12424_v36 }
 0x24a   : > { %10471 = vmatprep.mubr.msk.f32.mxu0 %vm446_vm1, %v12643_v30  ;;  %v3932_v30 = vld [vmem:[%s15064_s9] sm:$0xff] }
 0x24b   : > { %v11130_v53 = vpack.c.bf16 %v3933_v52, %v3932_v30 }
 0x24d   : > { %10472 = vmatmul.mubr.msk.f32.gmra.mrb[28].mxu0 %vm446_vm1, %v12650_v27  ;;  %v15129_v27 = vmov 0.0|0.0  }
 0x24e   : > { %10474 = vmatprep.mubr.msk.f32.mxu0 %vm446_vm1, %v9000_v32  ;;  %11129 = vmatprep.subr.bf16.mxu0 %v15129_v27 }
 0x24f   : > { %11141 = vmatprep.subr.bf16.mxu1 %v15129_v27  ;;  %11131 = vmatpush3.bf16.msra.mxu0 %v11130_v53 }
 0x250   : > { %11143 = vmatpush3.bf16.msra.mxu1 %v11130_v53  ;;  %11132 = vmatprep.subr.bf16.mxu0 %v15129_v27 }
 0x251   : > { %10475 = vmatmul.mubr.msk.f32.gmra.mrb[30].mxu0 %vm446_vm1, %v9001_v50  ;;  %11144 = vmatprep.subr.bf16.mxu1 %v15129_v27 }
 0x252   : > { %10493 = vmatprep.mubr.msk.f32.mxu0 %vm11859_vm4, %v15128_v51 }
 0x253   : > { %11134 = vmatpush3.bf16.msra.mxu0 %v11133_v56 }
 0x254   : > { %11146 = vmatpush3.bf16.msra.mxu1 %v11133_v56  ;;  %11135 = vmatprep.subr.bf16.mxu0 %v15129_v27 }
 0x255   : > { %11147 = vmatprep.subr.bf16.mxu1 %v15129_v27 }
 0x257   : > { %11137 = vmatpush3.bf16.msra.mxu0 %v11136_v59 }
 0x258   : > { %11149 = vmatpush3.bf16.msra.mxu1 %v11136_v59  ;;  %11138 = vmatprep.subr.bf16.mxu0 %v15129_v27 }
 0x259   : > { %11150 = vmatprep.subr.bf16.mxu1 %v15129_v27 }
 0x25b   : > { %11140 = vmatpush3.bf16.msra.mxu0 %v11139_v62 }
 0x25c   : > { %11152 = vmatpush3.bf16.msra.mxu1 %v11139_v62  ;;  %11309 = vmatprep.subr.bf16.mxu0 %v15129_v27 }
 0x2e8   : > { %v10431_v0 = vpop.f32.mrb[0].mxu0 }
 0x2e9   : > { %v13003_v1 = vadd.f32 %v10431_v0, %v13000_v63  ;;  %v3630_v2 = vpop.f32.mrb[1].mxu0 }
 0x2ea   : > { %v13006_v3 = vadd.f32 %v13000_v63, %v3630_v2 }
 0x2eb   : > { %v3864_v36 = vsel %vm3862_vm2, %v13003_v1, 0.0 }
 0x2ec   : > { %v3863_v5 = vsel %vm3862_vm2, %v13006_v3, 0.0  ;;  %v10434_v38 = vpop.f32.mrb[2].mxu0 }
 0x2ed   : > { %v3640_v35 = vpop.f32.mrb[3].mxu0  ;;  %v13013_v34 = vadd.f32 %v10434_v38, %v13000_v63  ;;  %v3865_v6 = vadd.f32 %v3864_v36, %v3863_v5 }
 0x2ee   : > { %v13016_v37 = vadd.f32 %v13000_v63, %v3640_v35 }
 0x2ef   : > { %v3868_v40 = vsel %vm3862_vm2, %v13013_v34, 0.0 }
 0x2f0   : > { %v3866_v33 = vsel %vm3862_vm2, %v13016_v37, 0.0  ;;  %v10437_v31 = vpop.f32.mrb[4].mxu0 }
 0x2f1   : > { %v3867_v4 = vadd.f32 %v3866_v33, %v3865_v6  ;;  %v3650_v39 = vpop.f32.mrb[5].mxu0  ;;  %v13023_v41 = vadd.f32 %v10437_v31, %v13000_v63 }
 0x2f2   : > { %v13026_v7 = vadd.f32 %v13000_v63, %v3650_v39 }
 0x2f3   : > { %v3869_v8 = vadd.f32 %v3868_v40, %v3867_v4  ;;  %v3872_v13 = vsel %vm3862_vm2, %v13023_v41, 0.0 }
 0x2f4   : > { %v3870_v9 = vsel %vm3862_vm2, %v13026_v7, 0.0  ;;  %v10440_v10 = vpop.f32.mrb[6].mxu0 }
 0x2f5   : > { %v3871_v11 = vadd.f32 %v3870_v9, %v3869_v8  ;;  %v3660_v12 = vpop.f32.mrb[7].mxu0  ;;  %v13033_v14 = vadd.f32 %v10440_v10, %v13000_v63 }
 0x2f6   : > { %v13036_v15 = vadd.f32 %v13000_v63, %v3660_v12 }
 0x2f7   : > { %v3873_v16 = vadd.f32 %v3872_v13, %v3871_v11  ;;  %v3876_v21 = vsel %vm3862_vm2, %v13033_v14, 0.0 }
 0x2f8   : > { %v3874_v17 = vsel %vm3862_vm2, %v13036_v15, 0.0  ;;  %v10443_v18 = vpop.f32.mrb[8].mxu0 }
 0x2f9   : > { %v3875_v19 = vadd.f32 %v3874_v17, %v3873_v16  ;;  %v3670_v20 = vpop.f32.mrb[9].mxu0  ;;  %v13043_v22 = vadd.f32 %v10443_v18, %v13000_v63 }
 0x2fa   : > { %v13046_v23 = vadd.f32 %v13000_v63, %v3670_v20 }
 0x2fb   : > { %v3877_v24 = vadd.f32 %v3876_v21, %v3875_v19  ;;  %v3880_v44 = vsel %vm3862_vm2, %v13043_v22, 0.0 }
 0x2fc   : > { %v3878_v25 = vsel %vm3862_vm2, %v13046_v23, 0.0  ;;  %v10446_v26 = vpop.f32.mrb[10].mxu0 }
 0x2fd   : > { %v3879_v42 = vadd.f32 %v3878_v25, %v3877_v24  ;;  %v3680_v43 = vpop.f32.mrb[11].mxu0  ;;  %v13053_v45 = vadd.f32 %v10446_v26, %v13000_v63 }
 0x2fe   : > { %v13056_v46 = vadd.f32 %v13000_v63, %v3680_v43 }
 0x2ff   : > { %v3881_v47 = vadd.f32 %v3880_v44, %v3879_v42  ;;  %v3884_v32 = vsel %vm3862_vm2, %v13053_v45, 0.0 }
 0x300   : > { %v3882_v48 = vsel %vm3862_vm2, %v13056_v46, 0.0  ;;  %v10449_v49 = vpop.f32.mrb[12].mxu0 }
 0x301   : > { %v3883_v28 = vadd.f32 %v3882_v48, %v3881_v47  ;;  %v3690_v29 = vpop.f32.mrb[13].mxu0  ;;  %v13063_v50 = vadd.f32 %v10449_v49, %v13000_v63 }
 0x302   : > { %v13066_v30 = vadd.f32 %v13000_v63, %v3690_v29 }
 0x303   : > { %v3885_v52 = vadd.f32 %v3884_v32, %v3883_v28  ;;  %v3888_v57 = vsel %vm3862_vm2, %v13063_v50, 0.0 }
 0x304   : > { %v3886_v53 = vsel %vm3862_vm2, %v13066_v30, 0.0  ;;  %v10452_v54 = vpop.f32.mrb[14].mxu0 }
 0x305   : > { %v3887_v55 = vadd.f32 %v3886_v53, %v3885_v52  ;;  %v3700_v56 = vpop.f32.mrb[15].mxu0  ;;  %v13073_v58 = vadd.f32 %v10452_v54, %v13000_v63 }
 0x306   : > { %v13076_v59 = vadd.f32 %v13000_v63, %v3700_v56 }
 0x307   : > { %v3889_v60 = vadd.f32 %v3888_v57, %v3887_v55  ;;  %v3892_v36 = vsel %vm3862_vm2, %v13073_v58, 0.0 }
 0x308   : > { %v3890_v61 = vsel %vm3862_vm2, %v13076_v59, 0.0  ;;  %v10455_v62 = vpop.f32.mrb[16].mxu0 }
 0x309   : > { %v3891_v0 = vadd.f32 %v3890_v61, %v3889_v60  ;;  %v3710_v2 = vpop.f32.mrb[17].mxu0  ;;  %v13083_v5 = vadd.f32 %v10455_v62, %v13000_v63 }
 0x30a   : > { %v13086_v38 = vadd.f32 %v13000_v63, %v3710_v2 }
 0x30b   : > { %v3893_v35 = vadd.f32 %v3892_v36, %v3891_v0  ;;  %v3896_v39 = vsel %vm3862_vm2, %v13083_v5, 0.0 }
 0x30c   : > { %v3894_v6 = vsel %vm3862_vm2, %v13086_v38, 0.0  ;;  %v10458_v33 = vpop.f32.mrb[18].mxu0 }
 0x30d   : > { %v3895_v31 = vadd.f32 %v3894_v6, %v3893_v35  ;;  %v3720_v4 = vpop.f32.mrb[19].mxu0  ;;  %v13093_v40 = vadd.f32 %v10458_v33, %v13000_v63 }
 0x30e   : > { %v13096_v8 = vadd.f32 %v13000_v63, %v3720_v4 }
 0x30f   : > { %v3897_v9 = vadd.f32 %v3896_v39, %v3895_v31  ;;  %v3900_v16 = vsel %vm3862_vm2, %v13093_v40, 0.0 }
 0x310   : > { %v3898_v10 = vsel %vm3862_vm2, %v13096_v8, 0.0  ;;  %v10461_v11 = vpop.f32.mrb[20].mxu0 }
 0x311   : > { %v3899_v12 = vadd.f32 %v3898_v10, %v3897_v9  ;;  %v3730_v13 = vpop.f32.mrb[21].mxu0  ;;  %v13103_v17 = vadd.f32 %v10461_v11, %v13000_v63 }
 0x312   : > { %v13106_v18 = vadd.f32 %v13000_v63, %v3730_v13 }
 0x313   : > { %v3901_v19 = vadd.f32 %v3900_v16, %v3899_v12  ;;  %v3904_v26 = vsel %vm3862_vm2, %v13103_v17, 0.0 }
 0x314   : > { %v3902_v20 = vsel %vm3862_vm2, %v13106_v18, 0.0  ;;  %v10464_v21 = vpop.f32.mrb[22].mxu0 }
 0x315   : > { %v3903_v24 = vadd.f32 %v3902_v20, %v3901_v19  ;;  %v3740_v25 = vpop.f32.mrb[23].mxu0  ;;  %v13113_v42 = vadd.f32 %v10464_v21, %v13000_v63 }
 0x316   : > { %v13116_v43 = vadd.f32 %v13000_v63, %v3740_v25 }
 0x317   : > { %v3905_v44 = vadd.f32 %v3904_v26, %v3903_v24  ;;  %v3908_v29 = vsel %vm3862_vm2, %v13113_v42, 0.0 }
 0x318   : > { %v3906_v47 = vsel %vm3862_vm2, %v13116_v43, 0.0  ;;  %v10467_v48 = vpop.f32.mrb[24].mxu0 }
 0x319   : > { %v3907_v49 = vadd.f32 %v3906_v47, %v3905_v44  ;;  %v3750_v28 = vpop.f32.mrb[25].mxu0  ;;  %v13123_v32 = vadd.f32 %v10467_v48, %v13000_v63 }
 0x31a   : > { %v13126_v52 = vadd.f32 %v13000_v63, %v3750_v28 }
 0x31b   : > { %v3909_v53 = vadd.f32 %v3908_v29, %v3907_v49  ;;  %v3912_v60 = vsel %vm3862_vm2, %v13123_v32, 0.0 }
 0x31c   : > { %v3910_v54 = vsel %vm3862_vm2, %v13126_v52, 0.0  ;;  %v10470_v55 = vpop.f32.mrb[26].mxu0 }
 0x31d   : > { %v3911_v56 = vadd.f32 %v3910_v54, %v3909_v53  ;;  %v3760_v57 = vpop.f32.mrb[27].mxu0  ;;  %v13133_v61 = vadd.f32 %v10470_v55, %v13000_v63 }
 0x31e   : > { %v13136_v62 = vadd.f32 %v13000_v63, %v3760_v57 }
 0x31f   : > { %v3913_v0 = vadd.f32 %v3912_v60, %v3911_v56  ;;  %v3916_v33 = vsel %vm3862_vm2, %v13133_v61, 0.0 }
 0x320   : > { %v3914_v2 = vsel %vm3862_vm2, %v13136_v62, 0.0  ;;  %v10473_v36 = vpop.f32.mrb[28].mxu0 }
 0x321   : > { %v3915_v35 = vadd.f32 %v3914_v2, %v3913_v0  ;;  %v3770_v6 = vpop.f32.mrb[29].mxu0  ;;  %v13143_v31 = vadd.f32 %v10473_v36, %v13000_v63 }
 0x322   : > { %v13146_v4 = vadd.f32 %v13000_v63, %v3770_v6 }
 0x323   : > { %v3917_v39 = vadd.f32 %v3916_v33, %v3915_v35  ;;  %v3920_v13 = vsel %vm3862_vm2, %v13143_v31, 0.0 }
 0x324   : > { %v3918_v9 = vsel %vm3862_vm2, %v13146_v4, 0.0  ;;  %v10476_v10 = vpop.f32.mrb[30].mxu0 }
 0x325   : > { %v3919_v11 = vadd.f32 %v3918_v9, %v3917_v39  ;;  %v3780_v12 = vpop.f32.mrb[31].mxu0  ;;  %v13153_v16 = vadd.f32 %v10476_v10, %v13000_v63 }
 0x326   : > { %v13156_v19 = vadd.f32 %v13000_v63, %v3780_v12  ;;  %v4014_v63 = vlaneseq }
 0x327   : > { %v3921_v20 = vadd.f32 %v3920_v13, %v3919_v11  ;;  %v3924_v25 = vsel %vm3862_vm2, %v13153_v16, 0.0 }
 0x328   : > { %v3922_v21 = vsel %vm3862_vm2, %v13156_v19, 0.0  ;;  %v4015_v54 = vshrl.u32 %v4014_v63, 7 }
 0x329   : > { %v3923_v24 = vadd.f32 %v3922_v21, %v3921_v20 }
 0x32a   : > { %v13165_v57 = vsub.s32 0, %v4015_v54 }
 0x32b   : > { %v3925_v26 = vadd.f32 %v3924_v25, %v3923_v24 }
 0x32c   : > { %15291 = vst [vmem:[#allocation11_spill] sm:$0xff] %v13165_v57 }
 0x32d   : > { %v3926_v44 = vrot.slane %v3925_v26, 4 }
 0x32f   : > { %v3927_v47 = vadd.f32 %v3926_v44, %v3925_v26 }
 0x331   : > { %v3928_v48 = vrot.slane %v3927_v47, 2 }
 0x333   : > { %v3929_v49 = vadd.f32 %v3928_v48, %v3927_v47 }
 0x335   : > { %v3930_v28 = vrot.slane %v3929_v49, 1 }
 0x337   : > { %v3931_v29 = vadd.f32 %v3930_v28, %v3929_v49 }
 0x339   : > { %10494 = vmatmul.mubr.msk.f32.vlgmr.msra.gmra.mrb[32].mxu0 %vm3862_vm2, %v3931_v29 }
 0x33a   : > { %11126 = vmatprep.mubr.msk.f32.mxu0 %vm11859_vm4, %v15128_v51  ;;  %v4353_v51 = vld [vmem:[%s13563_s26 + $0x88] sm:$0xff] }
 0x40c   : > { %v4009_v53 = vpop.f32.mrb[32].mxu0 }
 0x40d   : > { %v10495_v55 = vpop.f32.mrb[33].mxu0  ;;  %v4013_v56 = vmul.f32 0.001953125, %v4009_v53 }
 0x40f   : > { %v13168_v60 = vrot.slane %v4013_v56, %v13165_v57 }
 0x411   : > { %v13172_v0 = vsub.f32 %v13006_v3, %v13168_v60  ;;  %v13176_v2 = vsub.f32 %v13003_v1, %v13168_v60  ;;  %v13180_v36 = vsub.f32 %v13016_v37, %v13168_v60  ;;  %v13184_v35 = vsub.f32 %v13013_v34, %v13168_v60 }
 0x412   : > { %v13192_v3 = vsub.f32 %v13026_v7, %v13168_v60  ;;  %v13198_v37 = vsub.f32 %v13023_v41, %v13168_v60  ;;  %v13206_v11 = vsub.f32 %v13036_v15, %v13168_v60  ;;  %v13213_v41 = vsub.f32 %v13033_v14, %v13168_v60 }
 0x413   : > { %v4050_v6 = vmul.f32 %v13172_v0, %v13172_v0  ;;  %v4051_v33 = vmul.f32 %v13176_v2, %v13176_v2  ;;  %v4052_v1 = vmul.f32 %v13180_v36, %v13180_v36  ;;  %v4053_v34 = vmul.f32 %v13184_v35, %v13184_v35 }
 0x414   : > { %v4054_v7 = vmul.f32 %v13192_v3, %v13192_v3  ;;  %v4055_v20 = vmul.f32 %v13198_v37, %v13198_v37  ;;  %v13220_v15 = vsub.f32 %v13046_v23, %v13168_v60  ;;  %v4056_v25 = vmul.f32 %v13206_v11, %v13206_v11 }
 0x415   : > { %v4082_v39 = vsel %vm3862_vm2, %v4050_v6, 0.0  ;;  %v4083_v9 = vsel %vm3862_vm2, %v4051_v33, 0.0  ;;  %v4085_v12 = vsel %vm3862_vm2, %v4052_v1, 0.0  ;;  %v4087_v21 = vsel %vm3862_vm2, %v4053_v34, 0.0 }
 0x416   : > { %v4084_v10 = vadd.f32 %v4083_v9, %v4082_v39  ;;  %v4089_v26 = vsel %vm3862_vm2, %v4054_v7, 0.0  ;;  %v13227_v14 = vsub.f32 %v13043_v22, %v13168_v60  ;;  %v4057_v47 = vmul.f32 %v13213_v41, %v13213_v41 }
 0x417   : > { %v4091_v48 = vsel %vm3862_vm2, %v4055_v20, 0.0  ;;  %v13234_v23 = vsub.f32 %v13056_v46, %v13168_v60  ;;  %v4058_v28 = vmul.f32 %v13220_v15, %v13220_v15  ;;  %v4093_v29 = vsel %vm3862_vm2, %v4056_v25, 0.0 }
 0x418   : > { %v4086_v13 = vadd.f32 %v4085_v12, %v4084_v10  ;;  %v13241_v22 = vsub.f32 %v13053_v45, %v13168_v60  ;;  %v4059_v53 = vmul.f32 %v13227_v14, %v13227_v14  ;;  %v4095_v54 = vsel %vm3862_vm2, %v4057_v47, 0.0 }
 0x419   : > { %v13248_v46 = vsub.f32 %v13066_v30, %v13168_v60  ;;  %v4060_v56 = vmul.f32 %v13234_v23, %v13234_v23  ;;  %v4097_v6 = vsel %vm3862_vm2, %v4058_v28, 0.0  ;;  %v13255_v45 = vsub.f32 %v13063_v50, %v13168_v60 }
 0x41a   : > { %v4088_v24 = vadd.f32 %v4087_v21, %v4086_v13  ;;  %v4061_v1 = vmul.f32 %v13241_v22, %v13241_v22  ;;  %v4099_v34 = vsel %vm3862_vm2, %v4059_v53, 0.0  ;;  %v13262_v30 = vsub.f32 %v13076_v59, %v13168_v60 }
 0x41b   : > { %v4062_v9 = vmul.f32 %v13248_v46, %v13248_v46  ;;  %v4101_v10 = vsel %vm3862_vm2, %v4060_v56, 0.0  ;;  %v13269_v50 = vsub.f32 %v13073_v58, %v13168_v60  ;;  %v4063_v12 = vmul.f32 %v13255_v45, %v13255_v45 }
 0x41c   : > { %v4090_v44 = vadd.f32 %v4089_v26, %v4088_v24  ;;  %v4103_v13 = vsel %vm3862_vm2, %v4061_v1, 0.0  ;;  %v13276_v59 = vsub.f32 %v13086_v38, %v13168_v60  ;;  %v4064_v21 = vmul.f32 %v13262_v30, %v13262_v30 }
 0x41d   : > { %v4105_v24 = vsel %vm3862_vm2, %v4062_v9, 0.0  ;;  %v13283_v58 = vsub.f32 %v13083_v5, %v13168_v60  ;;  %v4065_v26 = vmul.f32 %v13269_v50, %v13269_v50  ;;  %v13290_v38 = vsub.f32 %v13096_v8, %v13168_v60 }
 0x41e   : > { %v4092_v49 = vadd.f32 %v4091_v48, %v4090_v44  ;;  %v4107_v44 = vsel %vm3862_vm2, %v4063_v12, 0.0  ;;  %v4066_v48 = vmul.f32 %v13276_v59, %v13276_v59  ;;  %v13297_v5 = vsub.f32 %v13093_v40, %v13168_v60 }
 0x41f   : > { %v13304_v8 = vsub.f32 %v13106_v18, %v13168_v60  ;;  %v13311_v40 = vsub.f32 %v13103_v17, %v13168_v60  ;;  %v13318_v18 = vsub.f32 %v13116_v43, %v13168_v60  ;;  %v13325_v17 = vsub.f32 %v13113_v42, %v13168_v60 }
 0x420   : > { %v4094_v63 = vadd.f32 %v4093_v29, %v4092_v49  ;;  %v4109_v49 = vsel %vm3862_vm2, %v4064_v21, 0.0  ;;  %v4067_v29 = vmul.f32 %v13283_v58, %v13283_v58  ;;  %v13332_v43 = vsub.f32 %v13126_v52, %v13168_v60 }
 0x421   : > { %v13339_v42 = vsub.f32 %v13123_v32, %v13168_v60  ;;  %v13346_v52 = vsub.f32 %v13136_v62, %v13168_v60  ;;  %v13353_v32 = vsub.f32 %v13133_v61, %v13168_v60  ;;  %v13360_v62 = vsub.f32 %v13146_v4, %v13168_v60 }
 0x422   : > { %v4096_v55 = vadd.f32 %v4095_v54, %v4094_v63  ;;  %v4111_v63 = vsel %vm3862_vm2, %v4065_v26, 0.0  ;;  %v4068_v54 = vmul.f32 %v13290_v38, %v13290_v38  ;;  %v13367_v61 = vsub.f32 %v13143_v31, %v13168_v60 }
 0x423   : > { %v13374_v4 = vsub.f32 %v13156_v19, %v13168_v60  ;;  %v13381_v31 = vsub.f32 %v13153_v16, %v13168_v60 }
 0x424   : > { %v4098_v33 = vadd.f32 %v4097_v6, %v4096_v55  ;;  %v4113_v55 = vsel %vm3862_vm2, %v4066_v48, 0.0  ;;  %v4069_v6 = vmul.f32 %v13297_v5, %v13297_v5 }
 0x425   : > { %v4080_v19 = vmul.f32 %v13374_v4, %v13374_v4 }
 0x426   : > { %v4100_v39 = vadd.f32 %v4099_v34, %v4098_v33  ;;  %v4115_v33 = vsel %vm3862_vm2, %v4067_v29, 0.0  ;;  %v4070_v34 = vmul.f32 %v13304_v8, %v13304_v8 }
 0x427   : > { %v4141_v16 = vsel %vm3862_vm2, %v4080_v19, 0.0  ;;  %v4520_v19 = vld [vmem:[%s15061_s6] sm:$0xff] }
 0x428   : > { %v4102_v7 = vadd.f32 %v4101_v10, %v4100_v39  ;;  %v4117_v39 = vsel %vm3862_vm2, %v4068_v54, 0.0  ;;  %v4071_v10 = vmul.f32 %v13311_v40, %v13311_v40 }
 0x42a   : > { %v4104_v20 = vadd.f32 %v4103_v13, %v4102_v7  ;;  %v4119_v7 = vsel %vm3862_vm2, %v4069_v6, 0.0  ;;  %v4072_v13 = vmul.f32 %v13318_v18, %v13318_v18 }
 0x42c   : > { %v4106_v25 = vadd.f32 %v4105_v24, %v4104_v20  ;;  %v4121_v20 = vsel %vm3862_vm2, %v4070_v34, 0.0  ;;  %v4073_v24 = vmul.f32 %v13325_v17, %v13325_v17 }
 0x42e   : > { %v4108_v47 = vadd.f32 %v4107_v44, %v4106_v25  ;;  %v4123_v25 = vsel %vm3862_vm2, %v4071_v10, 0.0  ;;  %v4074_v44 = vmul.f32 %v13332_v43, %v13332_v43 }
 0x430   : > { %v4110_v28 = vadd.f32 %v4109_v49, %v4108_v47  ;;  %v4125_v47 = vsel %vm3862_vm2, %v4072_v13, 0.0  ;;  %v4075_v49 = vmul.f32 %v13339_v42, %v13339_v42  ;;  %v4081_v13 = vmul.f32 %v13381_v31, %v13381_v31 }
 0x432   : > { %v4112_v53 = vadd.f32 %v4111_v63, %v4110_v28  ;;  %v4127_v28 = vsel %vm3862_vm2, %v4073_v24, 0.0  ;;  %v4076_v63 = vmul.f32 %v13346_v52, %v13346_v52  ;;  %v4143_v24 = vsel %vm3862_vm2, %v4081_v13, 0.0  ;;  %v4529_v13 = vld [vmem:[#allocation2 + $0x9] sm:$0xff] }
 0x434   : > { %v4114_v56 = vadd.f32 %v4113_v55, %v4112_v53  ;;  %v4129_v53 = vsel %vm3862_vm2, %v4074_v44, 0.0  ;;  %v4077_v55 = vmul.f32 %v13353_v32, %v13353_v32 }
 0x436   : > { %v4116_v1 = vadd.f32 %v4115_v33, %v4114_v56  ;;  %v4131_v56 = vsel %vm3862_vm2, %v4075_v49, 0.0  ;;  %v4078_v33 = vmul.f32 %v13360_v62, %v13360_v62 }
 0x438   : > { %v4118_v9 = vadd.f32 %v4117_v39, %v4116_v1  ;;  %v4133_v1 = vsel %vm3862_vm2, %v4076_v63, 0.0  ;;  %v4079_v39 = vmul.f32 %v13367_v61, %v13367_v61  ;;  %v4561_v63 = vld [vmem:[%s15061_s6 + $0x48] sm:$0xff] }
 0x43a   : > { %v4120_v12 = vadd.f32 %v4119_v7, %v4118_v9  ;;  %v4135_v9 = vsel %vm3862_vm2, %v4077_v55, 0.0  ;;  %v4137_v7 = vsel %vm3862_vm2, %v4078_v33, 0.0  ;;  %v4563_v55 = vld [vmem:[%s15061_s6 + $0x58] sm:$0xff]  ;;  %v4565_v33 = vld [vmem:[%s15061_s6 + $0x68] sm:$0xff] }
 0x43c   : > { %v4122_v21 = vadd.f32 %v4121_v20, %v4120_v12  ;;  %v4139_v20 = vsel %vm3862_vm2, %v4079_v39, 0.0  ;;  %v4567_v39 = vld [vmem:[%s15061_s6 + $0x78] sm:$0xff] }
 0x43e   : > { %v4124_v26 = vadd.f32 %v4123_v25, %v4122_v21 }
 0x440   : > { %v4126_v48 = vadd.f32 %v4125_v47, %v4124_v26 }
 0x442   : > { %v4128_v29 = vadd.f32 %v4127_v28, %v4126_v48 }
 0x444   : > { %v4130_v54 = vadd.f32 %v4129_v53, %v4128_v29  ;;  %v4560_v29 = vld [vmem:[%s15061_s6 + $0x40] sm:$0xff] }
 0x445   : > { %v11153_v53 = vpack.c.bf16 %v4561_v63, %v4560_v29 }
 0x446   : > { %v4132_v6 = vadd.f32 %v4131_v56, %v4130_v54  ;;  %v4562_v54 = vld [vmem:[%s15061_s6 + $0x50] sm:$0xff] }
 0x447   : > { %11154 = vmatprep.subr.bf16.mxu1 %v11153_v53  ;;  %v11157_v56 = vpack.c.bf16 %v4563_v55, %v4562_v54  ;;  %v3860_v55 = vld [vmem:[%s15059_s4] sm:$0x1] }
 0x448   : > { %v4134_v34 = vadd.f32 %v4133_v1, %v4132_v6  ;;  %v4564_v6 = vld [vmem:[%s15061_s6 + $0x60] sm:$0xff] }
 0x449   : > { %v11161_v1 = vpack.c.bf16 %v4565_v33, %v4564_v6 }
 0x44a   : > { %v4136_v10 = vadd.f32 %v4135_v9, %v4134_v34  ;;  %v4566_v34 = vld [vmem:[%s15061_s6 + $0x70] sm:$0xff] }
 0x44b   : > { %v11165_v9 = vpack.c.bf16 %v4567_v39, %v4566_v34 }
 0x44c   : > { %v4138_v12 = vadd.f32 %v4137_v7, %v4136_v10  ;;  %v4528_v10 = vld [vmem:[#allocation2 + $0x1] sm:$0xff] }
 0x44d   : > { %v4521_v7 = vld [vmem:[%s15061_s6 + $0x8] sm:$0xff] }
 0x44e   : > { %v4140_v21 = vadd.f32 %v4139_v20, %v4138_v12  ;;  %v11169_v12 = vpack.c.bf16 %v4521_v7, %v4520_v19  ;;  %v4522_v20 = vld [vmem:[%s15061_s6 + $0x10] sm:$0xff] }
 0x450   : > { %v4142_v60 = vadd.f32 %v4141_v16, %v4140_v21  ;;  %v4523_v21 = vld [vmem:[%s15061_s6 + $0x18] sm:$0xff] }
 0x451   : > { %v11173_v16 = vpack.c.bf16 %v4523_v21, %v4522_v20 }
 0x452   : > { %v4144_v25 = vadd.f32 %v4143_v24, %v4142_v60  ;;  %v4524_v60 = vld [vmem:[%s15061_s6 + $0x20] sm:$0xff]  ;;  %v4525_v24 = vld [vmem:[%s15061_s6 + $0x28] sm:$0xff] }
 0x454   : > { %v4145_v26 = vrot.slane %v4144_v25, 4 }
 0x456   : > { %v4146_v44 = vadd.f32 %v4145_v26, %v4144_v25  ;;  %v11177_v25 = vpack.c.bf16 %v4525_v24, %v4524_v60  ;;  %v4526_v26 = vld [vmem:[%s15061_s6 + $0x30] sm:$0xff] }
 0x458   : > { %v4147_v47 = vrot.slane %v4146_v44, 2 }
 0x45a   : > { %v4148_v48 = vadd.f32 %v4147_v47, %v4146_v44  ;;  %v4527_v44 = vld [vmem:[%s15061_s6 + $0x38] sm:$0xff] }
 0x45b   : > { %v11181_v47 = vpack.c.bf16 %v4527_v44, %v4526_v26 }
 0x45c   : > { %v4149_v49 = vrot.slane %v4148_v48, 1 }
 0x45e   : > { %v4150_v28 = vadd.f32 %v4149_v49, %v4148_v48  ;;  %v5242_v48 = vld [vmem:[%s15061_s6 + $0x80] sm:$0xff]  ;;  %v5243_v49 = vld [vmem:[%s15061_s6 + $0x88] sm:$0xff] }
 0x460   : > { %10513 = vmatmul.mubr.msk.f32.vlgmr.msra.gmra.mrb[0].mxu1 %vm3862_vm2, %v4150_v28  ;;  %v13451_v28 = vpack.c.bf16 %v5243_v49, %v5242_v48 }
 0x461   : > { %11156 = vmatpush3.bf16.msra.mxu1 %v11153_v53  ;;  %10531 = vmatprep.mubr.msk.f32.mxu1 %vm3862_vm2, %v4528_v10 }
 0x462   : > { %11158 = vmatprep.subr.bf16.mxu1 %v11157_v56  ;;  %15292 = vst [vmem:[#allocation12_spill] sm:$0xff] %v13451_v28 }
 0x465   : > { %11160 = vmatpush3.bf16.msra.mxu1 %v11157_v56 }
 0x466   : > { %11162 = vmatprep.subr.bf16.mxu1 %v11161_v1 }
 0x469   : > { %11164 = vmatpush3.bf16.msra.mxu1 %v11161_v1 }
 0x46a   : > { %11166 = vmatprep.subr.bf16.mxu1 %v11165_v9 }
 0x46d   : > { %11168 = vmatpush3.bf16.msra.mxu1 %v11165_v9 }
 0x46e   : > { %11170 = vmatprep.subr.bf16.mxu1 %v11169_v12 }
 0x470   : > { %10532 = vmatmul.mubr.msk.f32.vlgmr.msra.gmra.mrb[2].mxu1 %vm3862_vm2, %v4529_v13 }
 0x471   : > { %11172 = vmatpush3.bf16.msra.mxu1 %v11169_v12 }
 0x472   : > { %11174 = vmatprep.subr.bf16.mxu1 %v11173_v16 }
 0x475   : > { %11176 = vmatpush3.bf16.msra.mxu1 %v11173_v16 }
 0x476   : > { %11178 = vmatprep.subr.bf16.mxu1 %v11177_v25 }
 0x479   : > { %11180 = vmatpush3.bf16.msra.mxu1 %v11177_v25 }
 0x47a   : > { %11182 = vmatprep.subr.bf16.mxu1 %v11181_v47 }
 0x47d   : > { %11184 = vmatpush3.bf16.msra.mxu1 %v11181_v47 }
 0x47e   : > { %11186 = vmatprep.subr.bf16.mxu1 %v13451_v28 }
 0x533   : > { %v4220_v29 = vpop.f32.mrb[0].mxu1 }
 0x534   : > { %v4224_v63 = vmul.f32 0.001953125, %v4220_v29  ;;  %v10514_v53 = vpop.f32.mrb[1].mxu1 }
 0x536   : > { %v4225_v54 = vadd.f32 1e-05, %v4224_v63 }
 0x538   : > { %11845 = vrsqrt.f32 %v4225_v54 }
 0x542   : > { %v11846_v56 = vpop.eup %11845 }
 0x543   : > { %v4227_v6 = vmul.f32 %v11846_v56, %v3860_v55 }
 0x545   : > { %v4232_v33 = vrot.slane %v4227_v6, %v13165_v57  ;;  %v4359_v57 = vld [vmem:[%s13563_s26 + $0xb8] sm:$0xff] }
 0x547   : > { %v4234_v1 = vmul.f32 %v4232_v33, %v13172_v0  ;;  %v4235_v34 = vmul.f32 %v4232_v33, %v13176_v2  ;;  %v4236_v39 = vmul.f32 %v4232_v33, %v13180_v36  ;;  %v4237_v9 = vmul.f32 %v4232_v33, %v13184_v35 }
 0x548   : > { %v4238_v10 = vmul.f32 %v4232_v33, %v13192_v3  ;;  %v4239_v19 = vmul.f32 %v4232_v33, %v13198_v37  ;;  %v4240_v7 = vmul.f32 %v4232_v33, %v13206_v11  ;;  %v4241_v12 = vmul.f32 %v4232_v33, %v13213_v41 }
 0x549   : > { %v4242_v13 = vmul.f32 %v4232_v33, %v13220_v15  ;;  %v4243_v20 = vmul.f32 %v4232_v33, %v13227_v14  ;;  %v4244_v0 = vmul.f32 %v4232_v33, %v13234_v23  ;;  %v4245_v2 = vmul.f32 %v4232_v33, %v13241_v22  ;;  %v9038_v23 = vld [vmem:[%s15060_s5] ss:$0 sm:$0xff] }
 0x54a   : > { %v4246_v36 = vmul.f32 %v4232_v33, %v13248_v46  ;;  %v4247_v35 = vmul.f32 %v4232_v33, %v13255_v45  ;;  %v4248_v3 = vmul.f32 %v4232_v33, %v13262_v30  ;;  %v4249_v37 = vmul.f32 %v4232_v33, %v13269_v50 }
 0x54b   : > { %v4250_v11 = vmul.f32 %v4232_v33, %v13276_v59  ;;  %v4251_v41 = vmul.f32 %v4232_v33, %v13283_v58  ;;  %v4252_v15 = vmul.f32 %v4232_v33, %v13290_v38  ;;  %v4253_v14 = vmul.f32 %v4232_v33, %v13297_v5 }
 0x54c   : > { %v4254_v22 = vmul.f32 %v4232_v33, %v13304_v8  ;;  %v4255_v46 = vmul.f32 %v4232_v33, %v13311_v40  ;;  %v4256_v45 = vmul.f32 %v4232_v33, %v13318_v18  ;;  %v4257_v30 = vmul.f32 %v4232_v33, %v13325_v17 }
 0x54d   : > { %v4258_v50 = vmul.f32 %v4232_v33, %v13332_v43  ;;  %v4259_v59 = vmul.f32 %v4232_v33, %v13339_v42  ;;  %v4260_v58 = vmul.f32 %v4232_v33, %v13346_v52  ;;  %v4261_v38 = vmul.f32 %v4232_v33, %v13353_v32 }
 0x54e   : > { %v4262_v5 = vmul.f32 %v4232_v33, %v13360_v62  ;;  %v4263_v21 = vmul.f32 %v4232_v33, %v13367_v61  ;;  %v4264_v8 = vmul.f32 %v4232_v33, %v13374_v4  ;;  %v4265_v40 = vmul.f32 %v4232_v33, %v13381_v31 }
 0x54f   : > { %v13493_v16 = vadd.f32 %v9038_v23, %v4234_v1  ;;  %v13495_v18 = vadd.f32 %v9038_v23, %v4235_v34  ;;  %v13497_v17 = vadd.f32 %v9038_v23, %v4236_v39  ;;  %v13499_v43 = vadd.f32 %v9038_v23, %v4237_v9 }
 0x550   : > { %v13501_v42 = vadd.f32 %v9038_v23, %v4238_v10  ;;  %v13503_v52 = vadd.f32 %v9038_v23, %v4239_v19  ;;  %v13505_v32 = vadd.f32 %v9038_v23, %v4240_v7  ;;  %v13507_v62 = vadd.f32 %v9038_v23, %v4241_v12 }
 0x551   : > { %v13509_v61 = vadd.f32 %v9038_v23, %v4242_v13  ;;  %v13511_v4 = vadd.f32 %v9038_v23, %v4243_v20  ;;  %v13513_v31 = vadd.f32 %v9038_v23, %v4244_v0  ;;  %v13515_v60 = vadd.f32 %v9038_v23, %v4245_v2 }
 0x552   : > { %v13517_v24 = vadd.f32 %v9038_v23, %v4246_v36  ;;  %v13519_v25 = vadd.f32 %v9038_v23, %v4247_v35  ;;  %v13521_v26 = vadd.f32 %v9038_v23, %v4248_v3  ;;  %v13523_v44 = vadd.f32 %v9038_v23, %v4249_v37 }
 0x553   : > { %v13525_v47 = vadd.f32 %v9038_v23, %v4250_v11  ;;  %v13527_v48 = vadd.f32 %v9038_v23, %v4251_v41  ;;  %v13529_v49 = vadd.f32 %v9038_v23, %v4252_v15  ;;  %v13531_v29 = vadd.f32 %v9038_v23, %v4253_v14  ;;  %v4337_v41 = vld [vmem:[%s13563_s26 + $0x8] sm:$0xff]  ;;  %v4336_v15 = vld [vmem:[%s13563_s26] sm:$0xff]  ;;  %v4339_v14 = vld [vmem:[%s13563_s26 + $0x18] sm:$0xff] }
 0x554   : > { %v13534_v63 = vadd.f32 %v9038_v23, %v4254_v22  ;;  %v13536_v53 = vadd.f32 %v9038_v23, %v4255_v46  ;;  %v13538_v54 = vadd.f32 %v9038_v23, %v4256_v45  ;;  %v13540_v55 = vadd.f32 %v9038_v23, %v4257_v30 }
 0x555   : > { %v13542_v56 = vadd.f32 %v9038_v23, %v4258_v50  ;;  %v13544_v6 = vadd.f32 %v9038_v23, %v4259_v59  ;;  %v13546_v33 = vadd.f32 %v9038_v23, %v4260_v58  ;;  %v13548_v1 = vadd.f32 %v9038_v23, %v4261_v38  ;;  %v4341_v50 = vld [vmem:[%s13563_s26 + $0x28] sm:$0xff]  ;;  %v4340_v59 = vld [vmem:[%s13563_s26 + $0x20] sm:$0xff]  ;;  %v4343_v58 = vld [vmem:[%s13563_s26 + $0x38] sm:$0xff] }
 0x556   : > { %v13550_v34 = vadd.f32 %v9038_v23, %v4262_v5  ;;  %v13552_v39 = vadd.f32 %v9038_v23, %v4263_v21  ;;  %v13554_v9 = vadd.f32 %v9038_v23, %v4264_v8  ;;  %v13556_v10 = vadd.f32 %v9038_v23, %v4265_v40  ;;  %v4338_v23 = vld [vmem:[%s13563_s26 + $0x10] sm:$0xff]  ;;  %v4357_v21 = vld [vmem:[%s13563_s26 + $0xa8] sm:$0xff]  ;;  %v4356_v5 = vld [vmem:[%s13563_s26 + $0xa0] sm:$0xff] }
 0x557   : > { %15293 = vst [vmem:[#allocation18_spill] sm:$0xff] %v13548_v1  ;;  %v4304_v19 = vmax.f32 %v13493_v16, 0.0  ;;  %v4305_v7 = vmax.f32 %v13495_v18, 0.0  ;;  %v4306_v12 = vmax.f32 %v13497_v17, 0.0  ;;  %v4307_v13 = vmax.f32 %v13499_v43, 0.0  ;;  %v4342_v38 = vld [vmem:[%s13563_s26 + $0x30] sm:$0xff] }
 0x558   : > { %15294 = vst [vmem:[#allocation28_spill] sm:$0xff] %v13550_v34  ;;  %15295 = vst [vmem:[#allocation30_spill] sm:$0xff] %v13552_v39  ;;  %v4308_v20 = vmax.f32 %v13501_v42, 0.0  ;;  %v4309_v0 = vmax.f32 %v13503_v52, 0.0  ;;  %v4310_v2 = vmax.f32 %v13505_v32, 0.0  ;;  %v4311_v36 = vmax.f32 %v13507_v62, 0.0 }
 0x559   : > { %15296 = vst [vmem:[#allocation31_spill] sm:$0xff] %v13554_v9  ;;  %15297 = vst [vmem:[#allocation33_spill] sm:$0xff] %v13556_v10  ;;  %v4312_v35 = vmax.f32 %v13509_v61, 0.0  ;;  %v4313_v3 = vmax.f32 %v13511_v4, 0.0  ;;  %v4314_v37 = vmax.f32 %v13513_v31, 0.0  ;;  %v4315_v11 = vmax.f32 %v13515_v60, 0.0 }
 0x55a   : > { %v4316_v22 = vmax.f32 %v13517_v24, 0.0  ;;  %v4317_v46 = vmax.f32 %v13519_v25, 0.0  ;;  %v4318_v45 = vmax.f32 %v13521_v26, 0.0  ;;  %v4319_v30 = vmax.f32 %v13523_v44, 0.0  ;;  %v4345_v16 = vld [vmem:[%s13563_s26 + $0x48] sm:$0xff]  ;;  %v4344_v18 = vld [vmem:[%s13563_s26 + $0x40] sm:$0xff] }
 0x55b   : > { %v4347_v17 = vld [vmem:[%s13563_s26 + $0x58] sm:$0xff]  ;;  %v4346_v43 = vld [vmem:[%s13563_s26 + $0x50] sm:$0xff]  ;;  %v4349_v61 = vld [vmem:[%s13563_s26 + $0x68] sm:$0xff]  ;;  %v4368_v42 = vadd.f32 %v4336_v15, %v4304_v19  ;;  %v4369_v40 = vadd.f32 %v4337_v41, %v4305_v7  ;;  %v4370_v26 = vadd.f32 %v4338_v23, %v4306_v12  ;;  %v4371_v8 = vadd.f32 %v4339_v14, %v4307_v13 }
 0x55c   : > { %v4348_v4 = vld [vmem:[%s13563_s26 + $0x60] sm:$0xff]  ;;  %v4351_v31 = vld [vmem:[%s13563_s26 + $0x78] sm:$0xff]  ;;  %v4350_v44 = vld [vmem:[%s13563_s26 + $0x70] sm:$0xff]  ;;  %v4372_v27 = vadd.f32 %v4340_v59, %v4308_v20  ;;  %v4373_v62 = vadd.f32 %v4341_v50, %v4309_v0  ;;  %v4374_v32 = vadd.f32 %v4342_v38, %v4310_v2  ;;  %v4375_v28 = vadd.f32 %v4343_v58, %v4311_v36 }
 0x55d   : > { %v4352_v24 = vld [vmem:[%s13563_s26 + $0x80] sm:$0xff]  ;;  %v4355_v52 = vld [vmem:[%s13563_s26 + $0x98] sm:$0xff]  ;;  %v4354_v25 = vld [vmem:[%s13563_s26 + $0x90] sm:$0xff]  ;;  %v4376_v39 = vadd.f32 %v4344_v18, %v4312_v35  ;;  %v4377_v34 = vadd.f32 %v4345_v16, %v4313_v3  ;;  %v4378_v1 = vadd.f32 %v4346_v43, %v4314_v37  ;;  %v4379_v19 = vadd.f32 %v4347_v17, %v4315_v11  ;;  %4456 = vst.msk [vmem:[#allocation2 + $0x19] sm:$0xff] %vm3862_vm2, %v4368_v42 }
 0x55e   : > { %v4358_v60 = vld [vmem:[%s13563_s26 + $0xb0] sm:$0xff]  ;;  %v4361_v10 = vld [vmem:[%s13563_s26 + $0xc8] sm:$0xff]  ;;  %v4360_v9 = vld [vmem:[%s13563_s26 + $0xc0] sm:$0xff]  ;;  %4457 = vst.msk [vmem:[#allocation2 + $0x21] sm:$0xff] %vm3862_vm2, %v4369_v40  ;;  %v4380_v20 = vadd.f32 %v4348_v4, %v4316_v22  ;;  %v4381_v0 = vadd.f32 %v4349_v61, %v4317_v46  ;;  %v4382_v2 = vadd.f32 %v4350_v44, %v4318_v45  ;;  %v4383_v36 = vadd.f32 %v4351_v31, %v4319_v30 }
 0x55f   : > { %4458 = vst.msk [vmem:[#allocation2 + $0x31] sm:$0xff] %vm3862_vm2, %v4370_v26  ;;  %4459 = vst.msk [vmem:[#allocation2 + $0x39] sm:$0xff] %vm3862_vm2, %v4371_v8  ;;  %v4363_v7 = vld [vmem:[%s13563_s26 + $0xd8] sm:$0xff]  ;;  %v4362_v12 = vld [vmem:[%s13563_s26 + $0xd0] sm:$0xff]  ;;  %v15298_v11 = vmax.f32 %v13525_v47, 0.0  ;;  %v15299_v15 = vmax.f32 %v13527_v48, 0.0 }
 0x560   : > { %v4365_v13 = vld [vmem:[%s13563_s26 + $0xe8] sm:$0xff]  ;;  %4460 = vst.msk [vmem:[#allocation2 + $0x49] sm:$0xff] %vm3862_vm2, %v4372_v27  ;;  %4461 = vst.msk [vmem:[#allocation2 + $0x51] sm:$0xff] %vm3862_vm2, %v4373_v62  ;;  %v4364_v35 = vld [vmem:[%s13563_s26 + $0xe0] sm:$0xff]  ;;  %v15300_v23 = vmax.f32 %v13529_v49, 0.0  ;;  %v15301_v27 = vmax.f32 %v13531_v29, 0.0 }
 0x561   : > { %4462 = vst.msk [vmem:[#allocation2 + $0x61] sm:$0xff] %vm3862_vm2, %v4374_v32  ;;  %4463 = vst.msk [vmem:[#allocation2 + $0x69] sm:$0xff] %vm3862_vm2, %v4375_v28  ;;  %v4367_v3 = vld [vmem:[%s13563_s26 + $0xf8] sm:$0xff]  ;;  %v4366_v37 = vld [vmem:[%s13563_s26 + $0xf0] sm:$0xff]  ;;  %v4384_v41 = vadd.f32 %v4352_v24, %v15298_v11  ;;  %v4385_v14 = vadd.f32 %v4353_v51, %v15299_v15  ;;  %v15302_v28 = vmax.f32 %v13534_v63, 0.0  ;;  %v15303_v48 = vmax.f32 %v13536_v53, 0.0 }
 0x562   : > { %v4386_v22 = vadd.f32 %v4354_v25, %v15300_v23  ;;  %v4387_v46 = vadd.f32 %v4355_v52, %v15301_v27  ;;  %4464 = vst.msk [vmem:[#allocation2 + $0x79] sm:$0xff] %vm3862_vm2, %v4376_v39  ;;  %4465 = vst.msk [vmem:[#allocation2 + $0x81] sm:$0xff] %vm3862_vm2, %v4377_v34  ;;  %v15304_v49 = vmax.f32 %v13538_v54, 0.0  ;;  %v15305_v29 = vmax.f32 %v13540_v55, 0.0  ;;  %v15309_v50 = vld [vmem:[#allocation18_spill] sm:$0xff]  ;;  %v15311_v59 = vld [vmem:[#allocation28_spill] sm:$0xff] }
 0x563   : > { %4466 = vst.msk [vmem:[#allocation2 + $0x91] sm:$0xff] %vm3862_vm2, %v4378_v1  ;;  %4467 = vst.msk [vmem:[#allocation2 + $0x99] sm:$0xff] %vm3862_vm2, %v4379_v19  ;;  %v4388_v47 = vadd.f32 %v4356_v5, %v15302_v28  ;;  %v4389_v51 = vadd.f32 %v4357_v21, %v15303_v48  ;;  %v15306_v63 = vmax.f32 %v13542_v56, 0.0  ;;  %v15307_v53 = vmax.f32 %v13544_v6, 0.0  ;;  %v15313_v58 = vld [vmem:[#allocation30_spill] sm:$0xff]  ;;  %v15315_v38 = vld [vmem:[#allocation31_spill] sm:$0xff] }
 0x564   : > { %v4390_v45 = vadd.f32 %v4358_v60, %v15304_v49  ;;  %v4391_v30 = vadd.f32 %v4359_v57, %v15305_v29  ;;  %4468 = vst.msk [vmem:[#allocation2 + $0xa9] sm:$0xff] %vm3862_vm2, %v4380_v20  ;;  %4469 = vst.msk [vmem:[#allocation2 + $0xb1] sm:$0xff] %vm3862_vm2, %v4381_v0  ;;  %v15308_v54 = vmax.f32 %v13546_v33, 0.0  ;;  %v15310_v55 = vmax.f32 %v15309_v50, 0.0  ;;  %v15317_v21 = vld [vmem:[#allocation33_spill] sm:$0xff]  ;;  %v5244_v23 = vld [vmem:[%s15061_s6 + $0x90] sm:$0xff] }
 0x565   : > { %4470 = vst.msk [vmem:[#allocation2 + $0xc1] sm:$0xff] %vm3862_vm2, %v4382_v2  ;;  %4471 = vst.msk [vmem:[#allocation2 + $0xc9] sm:$0xff] %vm3862_vm2, %v4383_v36  ;;  %v4392_v1 = vadd.f32 %v4360_v9, %v15306_v63  ;;  %v4393_v34 = vadd.f32 %v4361_v10, %v15307_v53  ;;  %v15312_v56 = vmax.f32 %v15311_v59, 0.0  ;;  %v15314_v6 = vmax.f32 %v15313_v58, 0.0  ;;  %v13693_v16 = vld [vmem:[#allocation2 + $0x19] sm:$0xff]  ;;  %v13695_v18 = vld [vmem:[#allocation2 + $0x21] sm:$0xff] }
 0x566   : > { %v4394_v39 = vadd.f32 %v4362_v12, %v15308_v54  ;;  %v4395_v57 = vadd.f32 %v4363_v7, %v15310_v55  ;;  %4472 = vst.msk [vmem:[#allocation2 + $0xd9] sm:$0xff] %vm3862_vm2, %v4384_v41  ;;  %4473 = vst.msk [vmem:[#allocation2 + $0xe1] sm:$0xff] %vm3862_vm2, %v4385_v14  ;;  %v15316_v33 = vmax.f32 %v15315_v38, 0.0  ;;  %v15318_v8 = vmax.f32 %v15317_v21, 0.0  ;;  %10534 = vmatprep.mubr.msk.f32.mxu1 %vm3862_vm2, %v13693_v16  ;;  %v13701_v17 = vld [vmem:[#allocation2 + $0x31] sm:$0xff]  ;;  %v13705_v43 = vld [vmem:[#allocation2 + $0x39] sm:$0xff] }
 0x567   : > { %4474 = vst.msk [vmem:[#allocation2 + $0xf1] sm:$0xff] %vm3862_vm2, %v4386_v22  ;;  %4475 = vst.msk [vmem:[#allocation2 + $0xf9] sm:$0xff] %vm3862_vm2, %v4387_v46  ;;  %v4396_v9 = vadd.f32 %v4364_v35, %v15312_v56  ;;  %v4397_v10 = vadd.f32 %v4365_v13, %v15314_v6  ;;  %10535 = vmatmul.mubr.msk.f32.gmra.mrb[4].mxu1 %vm3862_vm2, %v13695_v18  ;;  %v13709_v42 = vld [vmem:[#allocation2 + $0x49] sm:$0xff]  ;;  %v13713_v52 = vld [vmem:[#allocation2 + $0x51] sm:$0xff] }
 0x568   : > { %v4398_v5 = vadd.f32 %v4366_v37, %v15316_v33  ;;  %v4399_v40 = vadd.f32 %v4367_v3, %v15318_v8  ;;  %4476 = vst.msk [vmem:[#allocation2 + $0x109] sm:$0xff] %vm3862_vm2, %v4388_v47  ;;  %4477 = vst.msk [vmem:[#allocation2 + $0x111] sm:$0xff] %vm3862_vm2, %v4389_v51  ;;  %10537 = vmatprep.mubr.msk.f32.mxu1 %vm3862_vm2, %v13701_v17  ;;  %v13717_v32 = vld [vmem:[#allocation2 + $0x61] sm:$0xff]  ;;  %v13721_v62 = vld [vmem:[#allocation2 + $0x69] sm:$0xff] }
 0x569   : > { %4478 = vst.msk [vmem:[#allocation2 + $0x121] sm:$0xff] %vm3862_vm2, %v4390_v45  ;;  %4479 = vst.msk [vmem:[#allocation2 + $0x129] sm:$0xff] %vm3862_vm2, %v4391_v30  ;;  %v13725_v61 = vld [vmem:[#allocation2 + $0x79] sm:$0xff]  ;;  %v13729_v4 = vld [vmem:[#allocation2 + $0x81] sm:$0xff] }
 0x56a   : > { %4480 = vst.msk [vmem:[#allocation2 + $0x139] sm:$0xff] %vm3862_vm2, %v4392_v1  ;;  %4481 = vst.msk [vmem:[#allocation2 + $0x141] sm:$0xff] %vm3862_vm2, %v4393_v34  ;;  %v13733_v31 = vld [vmem:[#allocation2 + $0x91] sm:$0xff]  ;;  %v13737_v60 = vld [vmem:[#allocation2 + $0x99] sm:$0xff] }
 0x56b   : > { %4482 = vst.msk [vmem:[#allocation2 + $0x151] sm:$0xff] %vm3862_vm2, %v4394_v39  ;;  %4483 = vst.msk [vmem:[#allocation2 + $0x159] sm:$0xff] %vm3862_vm2, %v4395_v57  ;;  %10538 = vmatmul.mubr.msk.f32.gmra.mrb[6].mxu1 %vm3862_vm2, %v13705_v43  ;;  %v13741_v24 = vld [vmem:[#allocation2 + $0xa9] sm:$0xff]  ;;  %v13745_v25 = vld [vmem:[#allocation2 + $0xb1] sm:$0xff] }
 0x56c   : > { %4484 = vst.msk [vmem:[#allocation2 + $0x169] sm:$0xff] %vm3862_vm2, %v4396_v9  ;;  %4485 = vst.msk [vmem:[#allocation2 + $0x171] sm:$0xff] %vm3862_vm2, %v4397_v10  ;;  %10540 = vmatprep.mubr.msk.f32.mxu1 %vm3862_vm2, %v13709_v42  ;;  %v13749_v26 = vld [vmem:[#allocation2 + $0xc1] sm:$0xff]  ;;  %v13753_v44 = vld [vmem:[#allocation2 + $0xc9] sm:$0xff] }
 0x56d   : > { %4486 = vst.msk [vmem:[#allocation2 + $0x181] sm:$0xff] %vm3862_vm2, %v4398_v5  ;;  %4487 = vst.msk [vmem:[#allocation2 + $0x189] sm:$0xff] %vm3862_vm2, %v4399_v40  ;;  %v13757_v19 = vld [vmem:[#allocation2 + $0xd9] sm:$0xff]  ;;  %v13761_v7 = vld [vmem:[#allocation2 + $0xe1] sm:$0xff] }
 0x56e   : > { %v13765_v12 = vld [vmem:[#allocation2 + $0xf1] sm:$0xff]  ;;  %v13769_v13 = vld [vmem:[#allocation2 + $0xf9] sm:$0xff]  ;;  %v4489_v27 = vld [vmem:[#allocation2 + $0x8] sm:$0xff] }
 0x56f   : > { %10541 = vmatmul.mubr.msk.f32.gmra.mrb[8].mxu1 %vm3862_vm2, %v13713_v52  ;;  %v13773_v20 = vld [vmem:[#allocation2 + $0x109] sm:$0xff]  ;;  %v13777_v0 = vld [vmem:[#allocation2 + $0x111] sm:$0xff]  ;;  %v4488_v15 = vld [vmem:[#allocation2] sm:$0xff] }
 0x570   : > { %10543 = vmatprep.mubr.msk.f32.mxu1 %vm3862_vm2, %v13717_v32  ;;  %v13781_v2 = vld [vmem:[#allocation2 + $0x121] sm:$0xff]  ;;  %v13785_v36 = vld [vmem:[#allocation2 + $0x129] sm:$0xff]  ;;  %v5245_v22 = vld [vmem:[%s15061_s6 + $0x98] sm:$0xff] }
 0x571   : > { %v13789_v35 = vld [vmem:[#allocation2 + $0x139] sm:$0xff]  ;;  %v13793_v3 = vld [vmem:[#allocation2 + $0x141] sm:$0xff]  ;;  %v11189_v46 = vpack.c.bf16 %v5245_v22, %v5244_v23  ;;  %v5248_v29 = vld [vmem:[%s15061_s6 + $0xb0] sm:$0xff] }
 0x572   : > { %15319 = vst [vmem:[#allocation35_spill] sm:$0xff] %v13789_v35  ;;  %15320 = vst [vmem:[#allocation3_spill] sm:$0xff] %v13793_v3  ;;  %v13797_v37 = vld [vmem:[#allocation2 + $0x151] sm:$0xff]  ;;  %v13801_v11 = vld [vmem:[#allocation2 + $0x159] sm:$0xff] }
 0x573   : > { %10544 = vmatmul.mubr.msk.f32.gmra.mrb[10].mxu1 %vm3862_vm2, %v13721_v62  ;;  %15321 = vst [vmem:[#allocation4_spill] sm:$0xff] %v13797_v37  ;;  %15322 = vst [vmem:[#allocation5_spill] sm:$0xff] %v13801_v11  ;;  %v13805_v41 = vld [vmem:[#allocation2 + $0x169] sm:$0xff]  ;;  %v13809_v14 = vld [vmem:[#allocation2 + $0x171] sm:$0xff] }
 0x574   : > { %10546 = vmatprep.mubr.msk.f32.mxu1 %vm3862_vm2, %v13725_v61  ;;  %15323 = vst [vmem:[#allocation6_spill] sm:$0xff] %v13805_v41  ;;  %15324 = vst [vmem:[#allocation7_spill] sm:$0xff] %v13809_v14  ;;  %v5246_v28 = vld [vmem:[%s15061_s6 + $0xa0] sm:$0xff]  ;;  %v5247_v47 = vld [vmem:[%s15061_s6 + $0xa8] sm:$0xff] }
 0x575   : > { %v13827_v48 = vld [vmem:[#allocation2 + $0x18] sm:$0xff]  ;;  %v11193_v49 = vpack.c.bf16 %v5247_v47, %v5246_v28  ;;  %v13832_v45 = vld [vmem:[#allocation2 + $0x20] sm:$0xff]  ;;  %v13842_v63 = vld [vmem:[#allocation2 + $0x30] sm:$0xff] }
 0x576   : > { %v15325_v51 = vld [vmem:[#allocation12_spill] sm:$0xff]  ;;  %v5635_v34 = vld [vmem:[%s15061_s6 + $0xc0] sm:$0xff]  ;;  %v5636_v54 = vld [vmem:[%s15061_s6 + $0xc8] sm:$0xff] }
 0x577   : > { %10547 = vmatmul.mubr.msk.f32.gmra.mrb[12].mxu1 %vm3862_vm2, %v13729_v4  ;;  %v5249_v30 = vld [vmem:[%s15061_s6 + $0xb8] sm:$0xff]  ;;  %v13856_v39 = vld [vmem:[#allocation2 + $0x48] sm:$0xff]  ;;  %v11201_v50 = vpack.c.bf16 %v5636_v54, %v5635_v34  ;;  %v13860_v55 = vld [vmem:[#allocation2 + $0x50] sm:$0xff] }
 0x578   : > { %10549 = vmatprep.mubr.msk.f32.mxu1 %vm3862_vm2, %v13733_v31  ;;  %v11197_v1 = vpack.c.bf16 %v5249_v30, %v5248_v29  ;;  %v13846_v53 = vld [vmem:[#allocation2 + $0x38] sm:$0xff]  ;;  %v13864_v57 = vld [vmem:[#allocation2 + $0x60] sm:$0xff]  ;;  %v13868_v59 = vld [vmem:[#allocation2 + $0x68] sm:$0xff] }
 0x579   : > { %v13872_v56 = vld [vmem:[#allocation2 + $0x78] sm:$0xff]  ;;  %v13876_v9 = vld [vmem:[#allocation2 + $0x80] sm:$0xff]  ;;  %v13880_v58 = vld [vmem:[#allocation2 + $0x90] sm:$0xff] }
 0x57a   : > { %v13884_v6 = vld [vmem:[#allocation2 + $0x98] sm:$0xff]  ;;  %v13888_v10 = vld [vmem:[#allocation2 + $0xa8] sm:$0xff]  ;;  %v13892_v38 = vld [vmem:[#allocation2 + $0xb0] sm:$0xff] }
 0x57b   : > { %10550 = vmatmul.mubr.msk.f32.gmra.mrb[14].mxu1 %vm3862_vm2, %v13737_v60  ;;  %v13896_v33 = vld [vmem:[#allocation2 + $0xc0] sm:$0xff]  ;;  %v13900_v5 = vld [vmem:[#allocation2 + $0xc8] sm:$0xff]  ;;  %v13904_v21 = vld [vmem:[#allocation2 + $0xd8] sm:$0xff] }
 0x57c   : > { %10552 = vmatprep.mubr.msk.f32.mxu1 %vm3862_vm2, %v13741_v24  ;;  %v13908_v8 = vld [vmem:[#allocation2 + $0xe0] sm:$0xff]  ;;  %v13912_v40 = vld [vmem:[#allocation2 + $0xf0] sm:$0xff]  ;;  %v13920_v23 = vld [vmem:[#allocation2 + $0x108] sm:$0xff] }
 0x57d   : > { %v13924_v22 = vld [vmem:[#allocation2 + $0x110] sm:$0xff]  ;;  %v13936_v28 = vld [vmem:[#allocation2 + $0x138] sm:$0xff]  ;;  %v13940_v47 = vld [vmem:[#allocation2 + $0x140] sm:$0xff] }
 0x57e   : > { %v13952_v29 = vld [vmem:[#allocation2 + $0x168] sm:$0xff]  ;;  %v5637_v34 = vld [vmem:[%s15061_s6 + $0xd0] sm:$0xff]  ;;  %v5638_v54 = vld [vmem:[%s15061_s6 + $0xd8] sm:$0xff] }
 0x57f   : > { %10553 = vmatmul.mubr.msk.f32.gmra.mrb[16].mxu1 %vm3862_vm2, %v13745_v25  ;;  %v5210_v30 = vld [vmem:[#allocation2 + $0x2] sm:$0xff] }
 0x580   : > { %10555 = vmatprep.mubr.msk.f32.mxu1 %vm3862_vm2, %v13749_v26 }
 0x583   : > { %10556 = vmatmul.mubr.msk.f32.gmra.mrb[18].mxu1 %vm3862_vm2, %v13753_v44 }
 0x584   : > { %10558 = vmatprep.mubr.msk.f32.mxu1 %vm3862_vm2, %v13757_v19 }
 0x587   : > { %10559 = vmatmul.mubr.msk.f32.gmra.mrb[20].mxu1 %vm3862_vm2, %v13761_v7 }
 0x588   : > { %10561 = vmatprep.mubr.msk.f32.mxu1 %vm3862_vm2, %v13765_v12 }
 0x58b   : > { %10562 = vmatmul.mubr.msk.f32.gmra.mrb[22].mxu1 %vm3862_vm2, %v13769_v13 }
 0x58c   : > { %10564 = vmatprep.mubr.msk.f32.mxu1 %vm3862_vm2, %v13773_v20 }
 0x58f   : > { %10565 = vmatmul.mubr.msk.f32.gmra.mrb[24].mxu1 %vm3862_vm2, %v13777_v0 }
 0x590   : > { %10567 = vmatprep.mubr.msk.f32.mxu1 %vm3862_vm2, %v13781_v2 }
 0x593   : > { %10568 = vmatmul.mubr.msk.f32.gmra.mrb[26].mxu1 %vm3862_vm2, %v13785_v36 }
 0x594   : > { %10570 = vmatprep.mubr.msk.f32.mxu1 %vm3862_vm2, %v13789_v35  ;;  %v13978_v35 = vld [vmem:[#allocation2 + $0x22] sm:$0xff] }
 0x595   : > { %15327 = vst [vmem:[#allocation9_spill] sm:$0xff] %v13978_v35 }
 0x597   : > { %10571 = vmatmul.mubr.msk.f32.gmra.mrb[28].mxu1 %vm3862_vm2, %v13793_v3  ;;  %v13974_v3 = vld [vmem:[#allocation2 + $0x1a] sm:$0xff] }
 0x598   : > { %10573 = vmatprep.mubr.msk.f32.mxu1 %vm3862_vm2, %v13797_v37  ;;  %v5640_v37 = vld [vmem:[%s15061_s6 + $0xe8] sm:$0xff]  ;;  %15326 = vst [vmem:[#allocation8_spill] sm:$0xff] %v13974_v3 }
 0x59b   : > { %10574 = vmatmul.mubr.msk.f32.gmra.mrb[30].mxu1 %vm3862_vm2, %v13801_v11  ;;  %v5639_v11 = vld [vmem:[%s15061_s6 + $0xe0] sm:$0xff] }
 0x59c   : > { %10576 = vmatprep.mubr.msk.f32.mxu1 %vm3862_vm2, %v13805_v41  ;;  %v11205_v41 = vpack.c.bf16 %v5638_v54, %v5637_v34  ;;  %v5641_v34 = vld [vmem:[%s15061_s6 + $0xf0] sm:$0xff]  ;;  %v5642_v54 = vld [vmem:[%s15061_s6 + $0xf8] sm:$0xff] }
 0x59f   : > { %10577 = vmatmul.mubr.msk.f32.gmra.mrb[32].mxu1 %vm3862_vm2, %v13809_v14  ;;  %v5211_v14 = vld [vmem:[#allocation2 + $0xa] sm:$0xff] }
 0x5a0   : > { %10595 = vmatprep.mubr.msk.f32.mxu1 %vm3862_vm2, %v4488_v15  ;;  %v13916_v15 = vld [vmem:[#allocation2 + $0xf8] sm:$0xff] }
 0x5a3   : > { %10596 = vmatmul.mubr.msk.f32.vlgmr.msra.gmra.mrb[2].mxu1 %vm3862_vm2, %v4489_v27  ;;  %v13928_v27 = vld [vmem:[#allocation2 + $0x120] sm:$0xff] }
 0x5a4   : > { %11188 = vmatpush3.bf16.msra.mxu1 %v15325_v51  ;;  %10598 = vmatprep.mubr.msk.f32.mxu1 %vm3862_vm2, %v13827_v48  ;;  %v13944_v51 = vld [vmem:[#allocation2 + $0x150] sm:$0xff] }
 0x5a5   : > { %11190 = vmatprep.subr.bf16.mxu1 %v11189_v46 }
 0x5a7   : > { %10599 = vmatmul.mubr.msk.f32.gmra.mrb[4].mxu1 %vm3862_vm2, %v13832_v45 }
 0x5a8   : > { %10601 = vmatprep.mubr.msk.f32.mxu1 %vm3862_vm2, %v13842_v63  ;;  %11192 = vmatpush3.bf16.msra.mxu1 %v11189_v46  ;;  %v13932_v46 = vld [vmem:[#allocation2 + $0x128] sm:$0xff] }
 0x5a9   : > { %11194 = vmatprep.subr.bf16.mxu1 %v11193_v49 }
 0x5ab   : > { %10602 = vmatmul.mubr.msk.f32.gmra.mrb[6].mxu1 %vm3862_vm2, %v13846_v53 }
 0x5ac   : > { %10604 = vmatprep.mubr.msk.f32.mxu1 %vm3862_vm2, %v13856_v39  ;;  %11196 = vmatpush3.bf16.msra.mxu1 %v11193_v49  ;;  %v13948_v49 = vld [vmem:[#allocation2 + $0x158] sm:$0xff] }
 0x5ad   : > { %11198 = vmatprep.subr.bf16.mxu1 %v11197_v1 }
 0x5af   : > { %10605 = vmatmul.mubr.msk.f32.gmra.mrb[8].mxu1 %vm3862_vm2, %v13860_v55 }
 0x5b0   : > { %10607 = vmatprep.mubr.msk.f32.mxu1 %vm3862_vm2, %v13864_v57  ;;  %11200 = vmatpush3.bf16.msra.mxu1 %v11197_v1  ;;  %v13956_v1 = vld [vmem:[#allocation2 + $0x170] sm:$0xff] }
 0x5b1   : > { %11202 = vmatprep.subr.bf16.mxu1 %v11201_v50 }
 0x5b3   : > { %10608 = vmatmul.mubr.msk.f32.gmra.mrb[10].mxu1 %vm3862_vm2, %v13868_v59 }
 0x5b4   : > { %10610 = vmatprep.mubr.msk.f32.mxu1 %vm3862_vm2, %v13872_v56 }
 0x5b7   : > { %10611 = vmatmul.mubr.msk.f32.gmra.mrb[12].mxu1 %vm3862_vm2, %v13876_v9 }
 0x5b8   : > { %10613 = vmatprep.mubr.msk.f32.mxu1 %vm3862_vm2, %v13880_v58 }
 0x5bb   : > { %10614 = vmatmul.mubr.msk.f32.gmra.mrb[14].mxu1 %vm3862_vm2, %v13884_v6 }
 0x5bc   : > { %10616 = vmatprep.mubr.msk.f32.mxu1 %vm3862_vm2, %v13888_v10 }
 0x5bf   : > { %10617 = vmatmul.mubr.msk.f32.gmra.mrb[16].mxu1 %vm3862_vm2, %v13892_v38 }
 0x5c0   : > { %10619 = vmatprep.mubr.msk.f32.mxu1 %vm3862_vm2, %v13896_v33 }
 0x5c3   : > { %10620 = vmatmul.mubr.msk.f32.gmra.mrb[18].mxu1 %vm3862_vm2, %v13900_v5 }
 0x5c4   : > { %10622 = vmatprep.mubr.msk.f32.mxu1 %vm3862_vm2, %v13904_v21 }
 0x5c7   : > { %10623 = vmatmul.mubr.msk.f32.gmra.mrb[20].mxu1 %vm3862_vm2, %v13908_v8 }
 0x5c8   : > { %10625 = vmatprep.mubr.msk.f32.mxu1 %vm3862_vm2, %v13912_v40 }
 0x5cb   : > { %10626 = vmatmul.mubr.msk.f32.gmra.mrb[22].mxu1 %vm3862_vm2, %v13916_v15 }
 0x5cc   : > { %10628 = vmatprep.mubr.msk.f32.mxu1 %vm3862_vm2, %v13920_v23 }
 0x5cf   : > { %10629 = vmatmul.mubr.msk.f32.gmra.mrb[24].mxu1 %vm3862_vm2, %v13924_v22 }
 0x5d0   : > { %10631 = vmatprep.mubr.msk.f32.mxu1 %vm3862_vm2, %v13928_v27 }
 0x5d3   : > { %10632 = vmatmul.mubr.msk.f32.gmra.mrb[26].mxu1 %vm3862_vm2, %v13932_v46 }
 0x5d4   : > { %10634 = vmatprep.mubr.msk.f32.mxu1 %vm3862_vm2, %v13936_v28 }
 0x5d7   : > { %10635 = vmatmul.mubr.msk.f32.gmra.mrb[28].mxu1 %vm3862_vm2, %v13940_v47 }
 0x5d8   : > { %10637 = vmatprep.mubr.msk.f32.mxu1 %vm3862_vm2, %v13944_v51 }
 0x5db   : > { %10638 = vmatmul.mubr.msk.f32.gmra.mrb[30].mxu1 %vm3862_vm2, %v13948_v49 }
 0x5dc   : > { %10640 = vmatprep.mubr.msk.f32.mxu1 %vm3862_vm2, %v13952_v29 }
 0x5df   : > { %10641 = vmatmul.mubr.msk.f32.gmra.mrb[32].mxu1 %vm3862_vm2, %v13956_v1 }
 0x5e0   : > { %10659 = vmatprep.mubr.msk.f32.mxu1 %vm3862_vm2, %v5210_v30  ;;  %v11209_v30 = vpack.c.bf16 %v5640_v37, %v5639_v11  ;;  %v11213_v37 = vpack.c.bf16 %v5642_v54, %v5641_v34  ;;  %v13992_v11 = vld [vmem:[#allocation2 + $0x3a] sm:$0xff]  ;;  %v14006_v34 = vld [vmem:[#allocation2 + $0x52] sm:$0xff]  ;;  %v14010_v54 = vld [vmem:[#allocation2 + $0x62] sm:$0xff] }
 0x5e1   : > { %15328 = vst [vmem:[#allocation10_spill] sm:$0xff] %v13992_v11  ;;  %15329 = vst [vmem:[#allocation37_spill] sm:$0xff] %v14010_v54 }
 0x5e3   : > { %10660 = vmatmul.mubr.msk.f32.vlgmr.msra.gmra.mrb[2].mxu1 %vm3862_vm2, %v5211_v14  ;;  %v13988_v14 = vld [vmem:[#allocation2 + $0x32] sm:$0xff] }
 0x5e4   : > { %11204 = vmatpush3.bf16.msra.mxu1 %v11201_v50  ;;  %10662 = vmatprep.mubr.msk.f32.mxu1 %vm3862_vm2, %v13974_v3  ;;  %v6028_v50 = vld [vmem:[%s15061_s6 + $0x100] sm:$0xff]  ;;  %v6029_v3 = vld [vmem:[%s15061_s6 + $0x108] sm:$0xff] }
 0x5e5   : > { %11206 = vmatprep.subr.bf16.mxu1 %v11205_v41 }
 0x5e7   : > { %10663 = vmatmul.mubr.msk.f32.gmra.mrb[4].mxu1 %vm3862_vm2, %v13978_v35  ;;  %v14002_v35 = vld [vmem:[#allocation2 + $0x4a] sm:$0xff] }
 0x5e8   : > { %10665 = vmatprep.mubr.msk.f32.mxu1 %vm3862_vm2, %v13988_v14  ;;  %11208 = vmatpush3.bf16.msra.mxu1 %v11205_v41  ;;  %v11217_v41 = vpack.c.bf16 %v6029_v3, %v6028_v50  ;;  %v14022_v3 = vld [vmem:[#allocation2 + $0x82] sm:$0xff]  ;;  %v14026_v50 = vld [vmem:[#allocation2 + $0x92] sm:$0xff] }
 0x5e9   : > { %11210 = vmatprep.subr.bf16.mxu1 %v11209_v30  ;;  %15332 = vst [vmem:[#allocation14_spill] sm:$0xff] %v14022_v3  ;;  %15333 = vst [vmem:[#allocation15_spill] sm:$0xff] %v14026_v50 }
 0x5eb   : > { %10666 = vmatmul.mubr.msk.f32.gmra.mrb[6].mxu1 %vm3862_vm2, %v13992_v11  ;;  %v14014_v11 = vld [vmem:[#allocation2 + $0x6a] sm:$0xff] }
 0x5ec   : > { %10668 = vmatprep.mubr.msk.f32.mxu1 %vm3862_vm2, %v14002_v35  ;;  %11212 = vmatpush3.bf16.msra.mxu1 %v11209_v30  ;;  %15330 = vst [vmem:[#allocation38_spill] sm:$0xff] %v14014_v11  ;;  %v14018_v30 = vld [vmem:[#allocation2 + $0x7a] sm:$0xff] }
 0x5ed   : > { %11214 = vmatprep.subr.bf16.mxu1 %v11213_v37  ;;  %15331 = vst [vmem:[#allocation13_spill] sm:$0xff] %v14018_v30 }
 0x5ef   : > { %10669 = vmatmul.mubr.msk.f32.gmra.mrb[8].mxu1 %vm3862_vm2, %v14006_v34 }
 0x5f0   : > { %10671 = vmatprep.mubr.msk.f32.mxu1 %vm3862_vm2, %v14010_v54  ;;  %11216 = vmatpush3.bf16.msra.mxu1 %v11213_v37  ;;  %v14030_v37 = vld [vmem:[#allocation2 + $0x9a] sm:$0xff]  ;;  %v6033_v54 = vld [vmem:[%s15061_s6 + $0x128] sm:$0xff] }
 0x5f1   : > { %11218 = vmatprep.subr.bf16.mxu1 %v11217_v41  ;;  %15334 = vst [vmem:[#allocation16_spill] sm:$0xff] %v14030_v37 }
 0x5f3   : > { %10672 = vmatmul.mubr.msk.f32.gmra.mrb[10].mxu1 %vm3862_vm2, %v14014_v11  ;;  %v14034_v11 = vld [vmem:[#allocation2 + $0xaa] sm:$0xff] }
 0x5f4   : > { %10674 = vmatprep.mubr.msk.f32.mxu1 %vm3862_vm2, %v14018_v30  ;;  %15335 = vst [vmem:[#allocation17_spill] sm:$0xff] %v14034_v11  ;;  %v14038_v30 = vld [vmem:[#allocation2 + $0xb2] sm:$0xff] }
 0x5f5   : > { %15336 = vst [vmem:[#allocation19_spill] sm:$0xff] %v14038_v30 }
 0x5f7   : > { %10675 = vmatmul.mubr.msk.f32.gmra.mrb[12].mxu1 %vm3862_vm2, %v14022_v3  ;;  %v14042_v3 = vld [vmem:[#allocation2 + $0xc2] sm:$0xff] }
 0x5f8   : > { %10677 = vmatprep.mubr.msk.f32.mxu1 %vm3862_vm2, %v14026_v50  ;;  %15337 = vst [vmem:[#allocation20_spill] sm:$0xff] %v14042_v3  ;;  %v14046_v50 = vld [vmem:[#allocation2 + $0xca] sm:$0xff] }
 0x5f9   : > { %15338 = vst [vmem:[#allocation21_spill] sm:$0xff] %v14046_v50 }
 0x5fb   : > { %10678 = vmatmul.mubr.msk.f32.gmra.mrb[14].mxu1 %vm3862_vm2, %v14030_v37  ;;  %v14050_v37 = vld [vmem:[#allocation2 + $0xda] sm:$0xff] }
 0x5fc   : > { %10680 = vmatprep.mubr.msk.f32.mxu1 %vm3862_vm2, %v14034_v11  ;;  %15339 = vst [vmem:[#allocation22_spill] sm:$0xff] %v14050_v37  ;;  %v14054_v11 = vld [vmem:[#allocation2 + $0xe2] sm:$0xff] }
 0x5fd   : > { %15340 = vst [vmem:[#allocation23_spill] sm:$0xff] %v14054_v11 }
 0x5ff   : > { %10681 = vmatmul.mubr.msk.f32.gmra.mrb[16].mxu1 %vm3862_vm2, %v14038_v30  ;;  %v14058_v30 = vld [vmem:[#allocation2 + $0xf2] sm:$0xff] }
 0x600   : > { %10683 = vmatprep.mubr.msk.f32.mxu1 %vm3862_vm2, %v14042_v3  ;;  %15341 = vst [vmem:[#allocation24_spill] sm:$0xff] %v14058_v30  ;;  %v14062_v3 = vld [vmem:[#allocation2 + $0xfa] sm:$0xff] }
 0x601   : > { %15342 = vst [vmem:[#allocation25_spill] sm:$0xff] %v14062_v3 }
 0x603   : > { %10684 = vmatmul.mubr.msk.f32.gmra.mrb[18].mxu1 %vm3862_vm2, %v14046_v50  ;;  %v14066_v50 = vld [vmem:[#allocation2 + $0x10a] sm:$0xff] }
 0x604   : > { %10686 = vmatprep.mubr.msk.f32.mxu1 %vm3862_vm2, %v14050_v37  ;;  %15343 = vst [vmem:[#allocation26_spill] sm:$0xff] %v14066_v50  ;;  %v14070_v37 = vld [vmem:[#allocation2 + $0x112] sm:$0xff] }
 0x605   : > { %15344 = vst [vmem:[#allocation27_spill] sm:$0xff] %v14070_v37 }
 0x607   : > { %10687 = vmatmul.mubr.msk.f32.gmra.mrb[20].mxu1 %vm3862_vm2, %v14054_v11  ;;  %v14074_v11 = vld [vmem:[#allocation2 + $0x122] sm:$0xff] }
 0x608   : > { %10689 = vmatprep.mubr.msk.f32.mxu1 %vm3862_vm2, %v14058_v30  ;;  %15345 = vst [vmem:[#allocation29_spill] sm:$0xff] %v14074_v11  ;;  %v14078_v30 = vld [vmem:[#allocation2 + $0x12a] sm:$0xff] }
 0x609   : > { %15346 = vst [vmem:[#allocation32_spill] sm:$0xff] %v14078_v30 }
 0x60b   : > { %10690 = vmatmul.mubr.msk.f32.gmra.mrb[22].mxu1 %vm3862_vm2, %v14062_v3  ;;  %v14082_v3 = vld [vmem:[#allocation2 + $0x13a] sm:$0xff] }
 0x60c   : > { %10692 = vmatprep.mubr.msk.f32.mxu1 %vm3862_vm2, %v14066_v50  ;;  %15347 = vst [vmem:[#allocation34_spill] sm:$0xff] %v14082_v3  ;;  %v14086_v50 = vld [vmem:[#allocation2 + $0x142] sm:$0xff] }
 0x60d   : > { %15348 = vst [vmem:[#allocation36_spill] sm:$0xff] %v14086_v50 }
 0x60f   : > { %10693 = vmatmul.mubr.msk.f32.gmra.mrb[24].mxu1 %vm3862_vm2, %v14070_v37  ;;  %v14090_v37 = vld [vmem:[#allocation2 + $0x152] sm:$0xff] }
 0x610   : > { %10695 = vmatprep.mubr.msk.f32.mxu1 %vm3862_vm2, %v14074_v11  ;;  %15349 = vst [vmem:[#allocation18_spill] sm:$0xff] %v14090_v37  ;;  %v14094_v11 = vld [vmem:[#allocation2 + $0x15a] sm:$0xff] }
 0x611   : > { %15350 = vst [vmem:[#allocation28_spill] sm:$0xff] %v14094_v11 }
 0x613   : > { %10696 = vmatmul.mubr.msk.f32.gmra.mrb[26].mxu1 %vm3862_vm2, %v14078_v30  ;;  %v14098_v30 = vld [vmem:[#allocation2 + $0x16a] sm:$0xff] }
 0x614   : > { %10698 = vmatprep.mubr.msk.f32.mxu1 %vm3862_vm2, %v14082_v3  ;;  %15351 = vst [vmem:[#allocation30_spill] sm:$0xff] %v14098_v30  ;;  %v14102_v3 = vld [vmem:[#allocation2 + $0x172] sm:$0xff] }
 0x615   : > { %15352 = vst [vmem:[#allocation31_spill] sm:$0xff] %v14102_v3 }
 0x617   : > { %10699 = vmatmul.mubr.msk.f32.gmra.mrb[28].mxu1 %vm3862_vm2, %v14086_v50  ;;  %v6030_v50 = vld [vmem:[%s15061_s6 + $0x110] sm:$0xff] }
 0x618   : > { %10701 = vmatprep.mubr.msk.f32.mxu1 %vm3862_vm2, %v14090_v37  ;;  %v6031_v37 = vld [vmem:[%s15061_s6 + $0x118] sm:$0xff] }
 0x61b   : > { %10702 = vmatmul.mubr.msk.f32.gmra.mrb[30].mxu1 %vm3862_vm2, %v14094_v11  ;;  %v11221_v11 = vpack.c.bf16 %v6031_v37, %v6030_v50  ;;  %v6035_v50 = vld [vmem:[%s15061_s6 + $0x138] sm:$0xff]  ;;  %v6423_v37 = vld [vmem:[%s15061_s6 + $0x150] sm:$0xff] }
 0x61c   : > { %10704 = vmatprep.mubr.msk.f32.mxu1 %vm3862_vm2, %v14098_v30  ;;  %v6032_v30 = vld [vmem:[%s15061_s6 + $0x120] sm:$0xff] }
 0x61f   : > { %10705 = vmatmul.mubr.msk.f32.gmra.mrb[32].mxu1 %vm3862_vm2, %v14102_v3  ;;  %v11225_v3 = vpack.c.bf16 %v6033_v54, %v6032_v30  ;;  %v6422_v54 = vld [vmem:[%s15061_s6 + $0x148] sm:$0xff] }
 0x620   : > { %10723 = vmatprep.mubr.msk.f32.mxu1 %vm3862_vm2, %v13827_v48  ;;  %v6034_v48 = vld [vmem:[%s15061_s6 + $0x130] sm:$0xff] }
 0x623   : > { %10724 = vmatmul.mubr.msk.f32.vlgmr.msra.gmra.mrb[2].mxu1 %vm3862_vm2, %v13832_v45  ;;  %v11229_v45 = vpack.c.bf16 %v6035_v50, %v6034_v48  ;;  %v6424_v48 = vld [vmem:[%s15061_s6 + $0x158] sm:$0xff] }
 0x624   : > { %11220 = vmatpush3.bf16.msra.mxu1 %v11217_v41  ;;  %10726 = vmatprep.mubr.msk.f32.mxu1 %vm3862_vm2, %v13842_v63  ;;  %v6421_v41 = vld [vmem:[%s15061_s6 + $0x140] sm:$0xff]  ;;  %v11237_v50 = vpack.c.bf16 %v6424_v48, %v6423_v37  ;;  %v6428_v37 = vld [vmem:[%s15061_s6 + $0x178] sm:$0xff] }
 0x625   : > { %11222 = vmatprep.subr.bf16.mxu1 %v11221_v11  ;;  %v11233_v30 = vpack.c.bf16 %v6422_v54, %v6421_v41  ;;  %v6426_v41 = vld [vmem:[%s15061_s6 + $0x168] sm:$0xff]  ;;  %v7208_v48 = vld [vmem:[%s15061_s6 + $0x1c0] sm:$0xff] }
 0x627   : > { %10727 = vmatmul.mubr.msk.f32.gmra.mrb[4].mxu1 %vm3862_vm2, %v13846_v53 }
 0x628   : > { %10729 = vmatprep.mubr.msk.f32.mxu1 %vm3862_vm2, %v13856_v39  ;;  %11224 = vmatpush3.bf16.msra.mxu1 %v11221_v11  ;;  %v14190_v11 = vld [vmem:[#allocation2 + $0x180] sm:$0xff] }
 0x629   : > { %11226 = vmatprep.subr.bf16.mxu1 %v11225_v3 }
 0x62b   : > { %10730 = vmatmul.mubr.msk.f32.gmra.mrb[6].mxu1 %vm3862_vm2, %v13860_v55 }
 0x62c   : > { %10732 = vmatprep.mubr.msk.f32.mxu1 %vm3862_vm2, %v13864_v57  ;;  %11228 = vmatpush3.bf16.msra.mxu1 %v11225_v3  ;;  %v14194_v3 = vld [vmem:[#allocation2 + $0x188] sm:$0xff] }
 0x62d   : > { %11230 = vmatprep.subr.bf16.mxu1 %v11229_v45 }
 0x62f   : > { %10733 = vmatmul.mubr.msk.f32.gmra.mrb[8].mxu1 %vm3862_vm2, %v13868_v59 }
 0x630   : > { %10735 = vmatprep.mubr.msk.f32.mxu1 %vm3862_vm2, %v13872_v56  ;;  %11232 = vmatpush3.bf16.msra.mxu1 %v11229_v45  ;;  %v6425_v45 = vld [vmem:[%s15061_s6 + $0x160] sm:$0xff] }
 0x631   : > { %11234 = vmatprep.subr.bf16.mxu1 %v11233_v30  ;;  %v11241_v54 = vpack.c.bf16 %v6426_v41, %v6425_v45  ;;  %v15362_v45 = vld [vmem:[#allocation37_spill] sm:$0xff] }
 0x633   : > { %10736 = vmatmul.mubr.msk.f32.gmra.mrb[10].mxu1 %vm3862_vm2, %v13876_v9 }
 0x634   : > { %10738 = vmatprep.mubr.msk.f32.mxu1 %vm3862_vm2, %v13880_v58 }
 0x637   : > { %10739 = vmatmul.mubr.msk.f32.gmra.mrb[12].mxu1 %vm3862_vm2, %v13884_v6 }
 0x638   : > { %10741 = vmatprep.mubr.msk.f32.mxu1 %vm3862_vm2, %v13888_v10 }
 0x63b   : > { %10742 = vmatmul.mubr.msk.f32.gmra.mrb[14].mxu1 %vm3862_vm2, %v13892_v38 }
 0x63c   : > { %10744 = vmatprep.mubr.msk.f32.mxu1 %vm3862_vm2, %v13896_v33 }
 0x63f   : > { %10745 = vmatmul.mubr.msk.f32.gmra.mrb[16].mxu1 %vm3862_vm2, %v13900_v5 }
 0x640   : > { %10747 = vmatprep.mubr.msk.f32.mxu1 %vm3862_vm2, %v13904_v21 }
 0x643   : > { %10748 = vmatmul.mubr.msk.f32.gmra.mrb[18].mxu1 %vm3862_vm2, %v13908_v8 }
 0x644   : > { %10750 = vmatprep.mubr.msk.f32.mxu1 %vm3862_vm2, %v13912_v40 }
 0x647   : > { %10751 = vmatmul.mubr.msk.f32.gmra.mrb[20].mxu1 %vm3862_vm2, %v13916_v15 }
 0x648   : > { %10753 = vmatprep.mubr.msk.f32.mxu1 %vm3862_vm2, %v13920_v23 }
 0x64b   : > { %10754 = vmatmul.mubr.msk.f32.gmra.mrb[22].mxu1 %vm3862_vm2, %v13924_v22 }
 0x64c   : > { %10756 = vmatprep.mubr.msk.f32.mxu1 %vm3862_vm2, %v13928_v27 }
 0x64f   : > { %10757 = vmatmul.mubr.msk.f32.gmra.mrb[24].mxu1 %vm3862_vm2, %v13932_v46 }
 0x650   : > { %10759 = vmatprep.mubr.msk.f32.mxu1 %vm3862_vm2, %v13936_v28 }
 0x653   : > { %10760 = vmatmul.mubr.msk.f32.gmra.mrb[26].mxu1 %vm3862_vm2, %v13940_v47 }
 0x654   : > { %10762 = vmatprep.mubr.msk.f32.mxu1 %vm3862_vm2, %v13944_v51 }
 0x657   : > { %10763 = vmatmul.mubr.msk.f32.gmra.mrb[28].mxu1 %vm3862_vm2, %v13948_v49 }
 0x658   : > { %10765 = vmatprep.mubr.msk.f32.mxu1 %vm3862_vm2, %v13952_v29 }
 0x65b   : > { %10766 = vmatmul.mubr.msk.f32.gmra.mrb[30].mxu1 %vm3862_vm2, %v13956_v1 }
 0x65c   : > { %10768 = vmatprep.mubr.msk.f32.mxu1 %vm3862_vm2, %v14190_v11 }
 0x65f   : > { %10769 = vmatmul.mubr.msk.f32.gmra.mrb[32].mxu1 %vm3862_vm2, %v14194_v3 }
 0x660   : > { %10787 = vmatprep.mubr.msk.f32.mxu1 %vm3862_vm2, %v13693_v16  ;;  %v6427_v16 = vld [vmem:[%s15061_s6 + $0x170] sm:$0xff] }
 0x663   : > { %10788 = vmatmul.mubr.msk.f32.vlgmr.msra.gmra.mrb[2].mxu1 %vm3862_vm2, %v13695_v18  ;;  %v11245_v18 = vpack.c.bf16 %v6428_v37, %v6427_v16  ;;  %v15364_v16 = vld [vmem:[#allocation13_spill] sm:$0xff]  ;;  %v15365_v37 = vld [vmem:[#allocation14_spill] sm:$0xff] }
 0x664   : > { %11236 = vmatpush3.bf16.msra.mxu1 %v11233_v30  ;;  %10790 = vmatprep.mubr.msk.f32.mxu1 %vm3862_vm2, %v13701_v17  ;;  %v6815_v17 = vld [vmem:[%s15061_s6 + $0x180] sm:$0xff]  ;;  %v6816_v30 = vld [vmem:[%s15061_s6 + $0x188] sm:$0xff] }
 0x665   : > { %11238 = vmatprep.subr.bf16.mxu1 %v11237_v50 }
 0x667   : > { %10791 = vmatmul.mubr.msk.f32.gmra.mrb[4].mxu1 %vm3862_vm2, %v13705_v43  ;;  %v11249_v43 = vpack.c.bf16 %v6816_v30, %v6815_v17  ;;  %v15367_v17 = vld [vmem:[#allocation16_spill] sm:$0xff]  ;;  %v15368_v30 = vld [vmem:[#allocation17_spill] sm:$0xff] }
 0x668   : > { %10793 = vmatprep.mubr.msk.f32.mxu1 %vm3862_vm2, %v13709_v42  ;;  %11240 = vmatpush3.bf16.msra.mxu1 %v11237_v50  ;;  %v15353_v42 = vld [vmem:[#allocation35_spill] sm:$0xff]  ;;  %v7209_v50 = vld [vmem:[%s15061_s6 + $0x1c8] sm:$0xff] }
 0x669   : > { %11242 = vmatprep.subr.bf16.mxu1 %v11241_v54  ;;  %v11265_v41 = vpack.c.bf16 %v7209_v50, %v7208_v48  ;;  %v14378_v48 = vld [vmem:[#allocation2 + $0x18a] sm:$0xff] }
 0x66a   : > { %15387 = vst [vmem:[#allocation12_spill] sm:$0xff] %v14378_v48  ;;  %v7210_v50 = vld [vmem:[%s15061_s6 + $0x1d0] sm:$0xff] }
 0x66b   : > { %10794 = vmatmul.mubr.msk.f32.gmra.mrb[6].mxu1 %vm3862_vm2, %v13713_v52  ;;  %v15354_v52 = vld [vmem:[#allocation3_spill] sm:$0xff] }
 0x66c   : > { %10796 = vmatprep.mubr.msk.f32.mxu1 %vm3862_vm2, %v13717_v32  ;;  %11244 = vmatpush3.bf16.msra.mxu1 %v11241_v54  ;;  %v15355_v32 = vld [vmem:[#allocation4_spill] sm:$0xff]  ;;  %v15363_v54 = vld [vmem:[#allocation38_spill] sm:$0xff] }
 0x66d   : > { %11246 = vmatprep.subr.bf16.mxu1 %v11245_v18 }
 0x66f   : > { %10797 = vmatmul.mubr.msk.f32.gmra.mrb[8].mxu1 %vm3862_vm2, %v13721_v62  ;;  %v15356_v62 = vld [vmem:[#allocation5_spill] sm:$0xff] }
 0x670   : > { %10799 = vmatprep.mubr.msk.f32.mxu1 %vm3862_vm2, %v13725_v61  ;;  %11248 = vmatpush3.bf16.msra.mxu1 %v11245_v18  ;;  %v15357_v61 = vld [vmem:[#allocation6_spill] sm:$0xff]  ;;  %v15366_v18 = vld [vmem:[#allocation15_spill] sm:$0xff] }
 0x671   : > { %11250 = vmatprep.subr.bf16.mxu1 %v11249_v43 }
 0x673   : > { %10800 = vmatmul.mubr.msk.f32.gmra.mrb[10].mxu1 %vm3862_vm2, %v13729_v4  ;;  %v15358_v4 = vld [vmem:[#allocation7_spill] sm:$0xff] }
 0x674   : > { %10802 = vmatprep.mubr.msk.f32.mxu1 %vm3862_vm2, %v13733_v31  ;;  %v14282_v31 = vld [vmem:[#allocation2 + $0x181] sm:$0xff] }
 0x677   : > { %10803 = vmatmul.mubr.msk.f32.gmra.mrb[12].mxu1 %vm3862_vm2, %v13737_v60  ;;  %v14286_v60 = vld [vmem:[#allocation2 + $0x189] sm:$0xff] }
 0x678   : > { %10805 = vmatprep.mubr.msk.f32.mxu1 %vm3862_vm2, %v13741_v24  ;;  %v6817_v24 = vld [vmem:[%s15061_s6 + $0x190] sm:$0xff] }
 0x67b   : > { %10806 = vmatmul.mubr.msk.f32.gmra.mrb[14].mxu1 %vm3862_vm2, %v13745_v25  ;;  %v6818_v25 = vld [vmem:[%s15061_s6 + $0x198] sm:$0xff] }
 0x67c   : > { %10808 = vmatprep.mubr.msk.f32.mxu1 %vm3862_vm2, %v13749_v26  ;;  %v15359_v26 = vld [vmem:[#allocation8_spill] sm:$0xff] }
 0x67f   : > { %10809 = vmatmul.mubr.msk.f32.gmra.mrb[16].mxu1 %vm3862_vm2, %v13753_v44  ;;  %v11253_v44 = vpack.c.bf16 %v6818_v25, %v6817_v24  ;;  %v15376_v24 = vld [vmem:[#allocation26_spill] sm:$0xff]  ;;  %v15377_v25 = vld [vmem:[#allocation27_spill] sm:$0xff] }
 0x680   : > { %10811 = vmatprep.mubr.msk.f32.mxu1 %vm3862_vm2, %v13757_v19  ;;  %v6819_v19 = vld [vmem:[%s15061_s6 + $0x1a0] sm:$0xff] }
 0x683   : > { %10812 = vmatmul.mubr.msk.f32.gmra.mrb[18].mxu1 %vm3862_vm2, %v13761_v7  ;;  %v6820_v7 = vld [vmem:[%s15061_s6 + $0x1a8] sm:$0xff] }
 0x684   : > { %10814 = vmatprep.mubr.msk.f32.mxu1 %vm3862_vm2, %v13765_v12  ;;  %v15360_v12 = vld [vmem:[#allocation9_spill] sm:$0xff] }
 0x687   : > { %10815 = vmatmul.mubr.msk.f32.gmra.mrb[20].mxu1 %vm3862_vm2, %v13769_v13  ;;  %v11257_v13 = vpack.c.bf16 %v6820_v7, %v6819_v19  ;;  %v15380_v19 = vld [vmem:[#allocation34_spill] sm:$0xff]  ;;  %v15381_v7 = vld [vmem:[#allocation36_spill] sm:$0xff] }
 0x688   : > { %10817 = vmatprep.mubr.msk.f32.mxu1 %vm3862_vm2, %v13773_v20  ;;  %v6821_v20 = vld [vmem:[%s15061_s6 + $0x1b0] sm:$0xff] }
 0x68b   : > { %10818 = vmatmul.mubr.msk.f32.gmra.mrb[22].mxu1 %vm3862_vm2, %v13777_v0  ;;  %v6822_v0 = vld [vmem:[%s15061_s6 + $0x1b8] sm:$0xff] }
 0x68c   : > { %10820 = vmatprep.mubr.msk.f32.mxu1 %vm3862_vm2, %v13781_v2  ;;  %v15361_v2 = vld [vmem:[#allocation10_spill] sm:$0xff] }
 0x68f   : > { %10821 = vmatmul.mubr.msk.f32.gmra.mrb[24].mxu1 %vm3862_vm2, %v13785_v36  ;;  %v11261_v36 = vpack.c.bf16 %v6822_v0, %v6821_v20  ;;  %v15384_v20 = vld [vmem:[#allocation30_spill] sm:$0xff]  ;;  %v15385_v0 = vld [vmem:[#allocation31_spill] sm:$0xff] }
 0x690   : > { %10823 = vmatprep.mubr.msk.f32.mxu1 %vm3862_vm2, %v15353_v42  ;;  %v15370_v42 = vld [vmem:[#allocation20_spill] sm:$0xff] }
 0x693   : > { %10824 = vmatmul.mubr.msk.f32.gmra.mrb[26].mxu1 %vm3862_vm2, %v15354_v52  ;;  %v15371_v52 = vld [vmem:[#allocation21_spill] sm:$0xff] }
 0x694   : > { %10826 = vmatprep.mubr.msk.f32.mxu1 %vm3862_vm2, %v15355_v32  ;;  %v15372_v32 = vld [vmem:[#allocation22_spill] sm:$0xff] }
 0x697   : > { %10827 = vmatmul.mubr.msk.f32.gmra.mrb[28].mxu1 %vm3862_vm2, %v15356_v62  ;;  %v15373_v62 = vld [vmem:[#allocation23_spill] sm:$0xff] }
 0x698   : > { %10829 = vmatprep.mubr.msk.f32.mxu1 %vm3862_vm2, %v15357_v61  ;;  %v15374_v61 = vld [vmem:[#allocation24_spill] sm:$0xff] }
 0x69b   : > { %10830 = vmatmul.mubr.msk.f32.gmra.mrb[30].mxu1 %vm3862_vm2, %v15358_v4  ;;  %v15375_v4 = vld [vmem:[#allocation25_spill] sm:$0xff] }
 0x69c   : > { %10832 = vmatprep.mubr.msk.f32.mxu1 %vm3862_vm2, %v14282_v31 }
 0x69f   : > { %10833 = vmatmul.mubr.msk.f32.gmra.mrb[32].mxu1 %vm3862_vm2, %v14286_v60 }
 0x6a0   : > { %10851 = vmatprep.mubr.msk.f32.mxu1 %vm3862_vm2, %v15359_v26  ;;  %v15378_v26 = vld [vmem:[#allocation29_spill] sm:$0xff] }
 0x6a3   : > { %10852 = vmatmul.mubr.msk.f32.vlgmr.msra.gmra.mrb[2].mxu1 %vm3862_vm2, %v15360_v12  ;;  %v15382_v12 = vld [vmem:[#allocation18_spill] sm:$0xff] }
 0x6a4   : > { %11252 = vmatpush3.bf16.msra.mxu1 %v11249_v43  ;;  %10854 = vmatprep.mubr.msk.f32.mxu1 %vm3862_vm2, %v13988_v14  ;;  %v15369_v43 = vld [vmem:[#allocation19_spill] sm:$0xff] }
 0x6a5   : > { %11254 = vmatprep.subr.bf16.mxu1 %v11253_v44 }
 0x6a7   : > { %10855 = vmatmul.mubr.msk.f32.gmra.mrb[4].mxu1 %vm3862_vm2, %v15361_v2 }
 0x6a8   : > { %10857 = vmatprep.mubr.msk.f32.mxu1 %vm3862_vm2, %v14002_v35  ;;  %11256 = vmatpush3.bf16.msra.mxu1 %v11253_v44  ;;  %v15379_v44 = vld [vmem:[#allocation32_spill] sm:$0xff] }
 0x6a9   : > { %11258 = vmatprep.subr.bf16.mxu1 %v11257_v13 }
 0x6ab   : > { %10858 = vmatmul.mubr.msk.f32.gmra.mrb[6].mxu1 %vm3862_vm2, %v14006_v34 }
 0x6ac   : > { %10860 = vmatprep.mubr.msk.f32.mxu1 %vm3862_vm2, %v15362_v45  ;;  %11260 = vmatpush3.bf16.msra.mxu1 %v11257_v13  ;;  %v15383_v13 = vld [vmem:[#allocation28_spill] sm:$0xff] }
 0x6ad   : > { %11262 = vmatprep.subr.bf16.mxu1 %v11261_v36 }
 0x6af   : > { %10861 = vmatmul.mubr.msk.f32.gmra.mrb[8].mxu1 %vm3862_vm2, %v15363_v54 }
 0x6b0   : > { %10863 = vmatprep.mubr.msk.f32.mxu1 %vm3862_vm2, %v15364_v16  ;;  %11264 = vmatpush3.bf16.msra.mxu1 %v11261_v36  ;;  %v14374_v36 = vld [vmem:[#allocation2 + $0x182] sm:$0xff] }
 0x6b1   : > { %11266 = vmatprep.subr.bf16.mxu1 %v11265_v41  ;;  %15386 = vst [vmem:[#allocation33_spill] sm:$0xff] %v14374_v36 }
 0x6b3   : > { %10864 = vmatmul.mubr.msk.f32.gmra.mrb[10].mxu1 %vm3862_vm2, %v15365_v37 }
 0x6b4   : > { %10866 = vmatprep.mubr.msk.f32.mxu1 %vm3862_vm2, %v15366_v18 }
 0x6b7   : > { %10867 = vmatmul.mubr.msk.f32.gmra.mrb[12].mxu1 %vm3862_vm2, %v15367_v17 }
 0x6b8   : > { %10869 = vmatprep.mubr.msk.f32.mxu1 %vm3862_vm2, %v15368_v30 }
 0x6bb   : > { %10870 = vmatmul.mubr.msk.f32.gmra.mrb[14].mxu1 %vm3862_vm2, %v15369_v43 }
 0x6bc   : > { %10872 = vmatprep.mubr.msk.f32.mxu1 %vm3862_vm2, %v15370_v42 }
 0x6bf   : > { %10873 = vmatmul.mubr.msk.f32.gmra.mrb[16].mxu1 %vm3862_vm2, %v15371_v52 }
 0x6c0   : > { %10875 = vmatprep.mubr.msk.f32.mxu1 %vm3862_vm2, %v15372_v32 }
 0x6c3   : > { %10876 = vmatmul.mubr.msk.f32.gmra.mrb[18].mxu1 %vm3862_vm2, %v15373_v62 }
 0x6c4   : > { %10878 = vmatprep.mubr.msk.f32.mxu1 %vm3862_vm2, %v15374_v61 }
 0x6c7   : > { %10879 = vmatmul.mubr.msk.f32.gmra.mrb[20].mxu1 %vm3862_vm2, %v15375_v4 }
 0x6c8   : > { %10881 = vmatprep.mubr.msk.f32.mxu1 %vm3862_vm2, %v15376_v24 }
 0x6cb   : > { %10882 = vmatmul.mubr.msk.f32.gmra.mrb[22].mxu1 %vm3862_vm2, %v15377_v25 }
 0x6cc   : > { %10884 = vmatprep.mubr.msk.f32.mxu1 %vm3862_vm2, %v15378_v26 }
 0x6cf   : > { %10885 = vmatmul.mubr.msk.f32.gmra.mrb[24].mxu1 %vm3862_vm2, %v15379_v44 }
 0x6d0   : > { %10887 = vmatprep.mubr.msk.f32.mxu1 %vm3862_vm2, %v15380_v19 }
 0x6d3   : > { %10888 = vmatmul.mubr.msk.f32.gmra.mrb[26].mxu1 %vm3862_vm2, %v15381_v7 }
 0x6d4   : > { %10890 = vmatprep.mubr.msk.f32.mxu1 %vm3862_vm2, %v15382_v12 }
 0x6d7   : > { %10891 = vmatmul.mubr.msk.f32.gmra.mrb[28].mxu1 %vm3862_vm2, %v15383_v13  ;;  %v7211_v13 = vld [vmem:[%s15061_s6 + $0x1d8] sm:$0xff] }
 0x6d8   : > { %10893 = vmatprep.mubr.msk.f32.mxu1 %vm3862_vm2, %v15384_v20  ;;  %v7213_v20 = vld [vmem:[%s15061_s6 + $0x1e8] sm:$0xff] }
 0x6db   : > { %10894 = vmatmul.mubr.msk.f32.gmra.mrb[30].mxu1 %vm3862_vm2, %v15385_v0  ;;  %v11269_v0 = vpack.c.bf16 %v7211_v13, %v7210_v50  ;;  %v7215_v13 = vld [vmem:[%s15061_s6 + $0x1f8] sm:$0xff]  ;;  %v7194_v50 = vld [vmem:[#allocation2 + $0x109] sm:$0xff] }
 0x6dc   : > { %10896 = vmatprep.mubr.msk.f32.mxu1 %vm3862_vm2, %v14374_v36  ;;  %v7212_v36 = vld [vmem:[%s15061_s6 + $0x1e0] sm:$0xff] }
 0x6df   : > { %10897 = vmatmul.mubr.msk.f32.gmra.mrb[32].mxu1 %vm3862_vm2, %v14378_v48  ;;  %v11273_v48 = vpack.c.bf16 %v7213_v20, %v7212_v36  ;;  %v7190_v20 = vld [vmem:[#allocation2 + $0xd9] sm:$0xff]  ;;  %v7192_v36 = vld [vmem:[#allocation2 + $0xf1] sm:$0xff] }
 0x6e0   : > { %10915 = vmatprep.mubr.msk.f32.mxu1 %vm3862_vm2, %v13842_v63  ;;  %v7214_v63 = vld [vmem:[%s15061_s6 + $0x1f0] sm:$0xff] }
 0x6e3   : > { %10916 = vmatmul.mubr.msk.f32.vlgmr.msra.gmra.mrb[2].mxu1 %vm3862_vm2, %v13846_v53  ;;  %v11277_v53 = vpack.c.bf16 %v7215_v13, %v7214_v63  ;;  %v7195_v63 = vld [vmem:[#allocation2 + $0x111] sm:$0xff]  ;;  %v7196_v13 = vld [vmem:[#allocation2 + $0x121] sm:$0xff] }
 0x6e4   : > { %11268 = vmatpush3.bf16.msra.mxu1 %v11265_v41  ;;  %10918 = vmatprep.mubr.msk.f32.mxu1 %vm3862_vm2, %v13856_v39  ;;  %v7601_v39 = vld [vmem:[%s15061_s6 + $0x200] sm:$0xff]  ;;  %v7602_v41 = vld [vmem:[%s15061_s6 + $0x208] sm:$0xff] }
 0x6e5   : > { %11270 = vmatprep.subr.bf16.mxu1 %v11269_v0 }
 0x6e7   : > { %10919 = vmatmul.mubr.msk.f32.gmra.mrb[4].mxu1 %vm3862_vm2, %v13860_v55  ;;  %v11281_v55 = vpack.c.bf16 %v7602_v41, %v7601_v39  ;;  %v7198_v39 = vld [vmem:[#allocation2 + $0x139] sm:$0xff]  ;;  %v7199_v41 = vld [vmem:[#allocation2 + $0x141] sm:$0xff] }
 0x6e8   : > { %10921 = vmatprep.mubr.msk.f32.mxu1 %vm3862_vm2, %v13864_v57  ;;  %11272 = vmatpush3.bf16.msra.mxu1 %v11269_v0  ;;  %v6813_v57 = vld [vmem:[#allocation2 + $0x198] sm:$0xff]  ;;  %v7191_v0 = vld [vmem:[#allocation2 + $0xe1] sm:$0xff] }
 0x6e9   : > { %11274 = vmatprep.subr.bf16.mxu1 %v11273_v48 }
 0x6eb   : > { %10922 = vmatmul.mubr.msk.f32.gmra.mrb[6].mxu1 %vm3862_vm2, %v13868_v59  ;;  %v6814_v59 = vld [vmem:[#allocation2 + $0x1a0] sm:$0xff] }
 0x6ec   : > { %10924 = vmatprep.mubr.msk.f32.mxu1 %vm3862_vm2, %v13872_v56  ;;  %11276 = vmatpush3.bf16.msra.mxu1 %v11273_v48  ;;  %v7603_v56 = vld [vmem:[%s15061_s6 + $0x210] sm:$0xff]  ;;  %v7193_v48 = vld [vmem:[#allocation2 + $0xf9] sm:$0xff] }
 0x6ed   : > { %11278 = vmatprep.subr.bf16.mxu1 %v11277_v53 }
 0x6ef   : > { %10925 = vmatmul.mubr.msk.f32.gmra.mrb[8].mxu1 %vm3862_vm2, %v13876_v9  ;;  %v7604_v9 = vld [vmem:[%s15061_s6 + $0x218] sm:$0xff] }
 0x6f0   : > { %10927 = vmatprep.mubr.msk.f32.mxu1 %vm3862_vm2, %v13880_v58  ;;  %11280 = vmatpush3.bf16.msra.mxu1 %v11277_v53  ;;  %v7176_v58 = vld [vmem:[#allocation2 + $0x31] sm:$0xff]  ;;  %v7197_v53 = vld [vmem:[#allocation2 + $0x129] sm:$0xff] }
 0x6f1   : > { %11282 = vmatprep.subr.bf16.mxu1 %v11281_v55 }
 0x6f3   : > { %10928 = vmatmul.mubr.msk.f32.gmra.mrb[10].mxu1 %vm3862_vm2, %v13884_v6  ;;  %v11285_v6 = vpack.c.bf16 %v7604_v9, %v7603_v56  ;;  %v7203_v56 = vld [vmem:[#allocation2 + $0x171] sm:$0xff]  ;;  %v7206_v9 = vld [vmem:[#allocation2 + $0x199] sm:$0xff] }
 0x6f4   : > { %10930 = vmatprep.mubr.msk.f32.mxu1 %vm3862_vm2, %v13888_v10  ;;  %v7177_v10 = vld [vmem:[#allocation2 + $0x39] sm:$0xff] }
 0x6f7   : > { %10931 = vmatmul.mubr.msk.f32.gmra.mrb[12].mxu1 %vm3862_vm2, %v13892_v38  ;;  %v7605_v38 = vld [vmem:[%s15061_s6 + $0x220] sm:$0xff] }
 0x6f8   : > { %10933 = vmatprep.mubr.msk.f32.mxu1 %vm3862_vm2, %v13896_v33  ;;  %v7606_v33 = vld [vmem:[%s15061_s6 + $0x228] sm:$0xff] }
 0x6fb   : > { %10934 = vmatmul.mubr.msk.f32.gmra.mrb[14].mxu1 %vm3862_vm2, %v13900_v5  ;;  %v7178_v5 = vld [vmem:[#allocation2 + $0x49] sm:$0xff] }
 0x6fc   : > { %10936 = vmatprep.mubr.msk.f32.mxu1 %vm3862_vm2, %v13904_v21  ;;  %v11289_v21 = vpack.c.bf16 %v7606_v33, %v7605_v38 }
 0x6ff   : > { %10937 = vmatmul.mubr.msk.f32.gmra.mrb[16].mxu1 %vm3862_vm2, %v13908_v8  ;;  %v7179_v8 = vld [vmem:[#allocation2 + $0x51] sm:$0xff] }
 0x700   : > { %10939 = vmatprep.mubr.msk.f32.mxu1 %vm3862_vm2, %v13912_v40  ;;  %v7607_v40 = vld [vmem:[%s15061_s6 + $0x230] sm:$0xff] }
 0x703   : > { %10940 = vmatmul.mubr.msk.f32.gmra.mrb[18].mxu1 %vm3862_vm2, %v13916_v15  ;;  %v7608_v15 = vld [vmem:[%s15061_s6 + $0x238] sm:$0xff] }
 0x704   : > { %10942 = vmatprep.mubr.msk.f32.mxu1 %vm3862_vm2, %v13920_v23  ;;  %v7180_v23 = vld [vmem:[#allocation2 + $0x61] sm:$0xff] }
 0x707   : > { %10943 = vmatmul.mubr.msk.f32.gmra.mrb[20].mxu1 %vm3862_vm2, %v13924_v22  ;;  %v11293_v22 = vpack.c.bf16 %v7608_v15, %v7607_v40 }
 0x708   : > { %10945 = vmatprep.mubr.msk.f32.mxu1 %vm3862_vm2, %v13928_v27  ;;  %v7181_v27 = vld [vmem:[#allocation2 + $0x69] sm:$0xff] }
 0x70b   : > { %10946 = vmatmul.mubr.msk.f32.gmra.mrb[22].mxu1 %vm3862_vm2, %v13932_v46  ;;  %v7182_v46 = vld [vmem:[#allocation2 + $0x79] sm:$0xff] }
 0x70c   : > { %10948 = vmatprep.mubr.msk.f32.mxu1 %vm3862_vm2, %v13936_v28  ;;  %v7183_v28 = vld [vmem:[#allocation2 + $0x81] sm:$0xff] }
 0x70f   : > { %10949 = vmatmul.mubr.msk.f32.gmra.mrb[24].mxu1 %vm3862_vm2, %v13940_v47  ;;  %v7184_v47 = vld [vmem:[#allocation2 + $0x91] sm:$0xff] }
 0x710   : > { %10951 = vmatprep.mubr.msk.f32.mxu1 %vm3862_vm2, %v13944_v51  ;;  %v15388_v51 = vmov 0.0|0.0  }
 0x713   : > { %10952 = vmatmul.mubr.msk.f32.gmra.mrb[26].mxu1 %vm3862_vm2, %v13948_v49  ;;  %v7185_v49 = vld [vmem:[#allocation2 + $0x99] sm:$0xff] }
 0x714   : > { %10954 = vmatprep.mubr.msk.f32.mxu1 %vm3862_vm2, %v13952_v29  ;;  %v7186_v29 = vld [vmem:[#allocation2 + $0xa9] sm:$0xff] }
 0x717   : > { %10955 = vmatmul.mubr.msk.f32.gmra.mrb[28].mxu1 %vm3862_vm2, %v13956_v1  ;;  %v7187_v1 = vld [vmem:[#allocation2 + $0xb1] sm:$0xff] }
 0x718   : > { %10957 = vmatprep.mubr.msk.f32.mxu1 %vm3862_vm2, %v14190_v11  ;;  %v7188_v11 = vld [vmem:[#allocation2 + $0xc1] sm:$0xff] }
 0x71b   : > { %10958 = vmatmul.mubr.msk.f32.gmra.mrb[30].mxu1 %vm3862_vm2, %v14194_v3  ;;  %v7189_v3 = vld [vmem:[#allocation2 + $0xc9] sm:$0xff] }
 0x71c   : > { %10960 = vmatprep.mubr.msk.f32.mxu1 %vm3862_vm2, %v6813_v57  ;;  %v7201_v57 = vld [vmem:[#allocation2 + $0x159] sm:$0xff] }
 0x71f   : > { %10961 = vmatmul.mubr.msk.f32.gmra.mrb[32].mxu1 %vm3862_vm2, %v6814_v59  ;;  %v7202_v59 = vld [vmem:[#allocation2 + $0x169] sm:$0xff] }
 0x720   : > { %10979 = vmatprep.mubr.msk.f32.mxu1 %vm3862_vm2, %v7176_v58  ;;  %v7207_v58 = vld [vmem:[#allocation2 + $0x1a1] sm:$0xff] }
 0x723   : > { %10980 = vmatmul.mubr.msk.f32.vlgmr.msra.gmra.mrb[2].mxu1 %vm3862_vm2, %v7177_v10 }
 0x724   : > { %11284 = vmatpush3.bf16.msra.mxu1 %v11281_v55  ;;  %10982 = vmatprep.mubr.msk.f32.mxu1 %vm3862_vm2, %v7178_v5  ;;  %v7200_v55 = vld [vmem:[#allocation2 + $0x151] sm:$0xff] }
 0x725   : > { %11286 = vmatprep.subr.bf16.mxu1 %v11285_v6 }
 0x727   : > { %10983 = vmatmul.mubr.msk.f32.gmra.mrb[4].mxu1 %vm3862_vm2, %v7179_v8 }
 0x728   : > { %10985 = vmatprep.mubr.msk.f32.mxu1 %vm3862_vm2, %v7180_v23  ;;  %11288 = vmatpush3.bf16.msra.mxu1 %v11285_v6 }
 0x729   : > { %11290 = vmatprep.subr.bf16.mxu1 %v11289_v21 }
 0x72b   : > { %10986 = vmatmul.mubr.msk.f32.gmra.mrb[6].mxu1 %vm3862_vm2, %v7181_v27 }
 0x72c   : > { %10988 = vmatprep.mubr.msk.f32.mxu1 %vm3862_vm2, %v7182_v46  ;;  %11292 = vmatpush3.bf16.msra.mxu1 %v11289_v21 }
 0x72d   : > { %11294 = vmatprep.subr.bf16.mxu1 %v11293_v22 }
 0x72f   : > { %10989 = vmatmul.mubr.msk.f32.gmra.mrb[8].mxu1 %vm3862_vm2, %v7183_v28 }
 0x730   : > { %10991 = vmatprep.mubr.msk.f32.mxu1 %vm3862_vm2, %v7184_v47  ;;  %11296 = vmatpush3.bf16.msra.mxu1 %v11293_v22 }
 0x731   : > { %11297 = vmatprep.subr.bf16.mxu1 %v15388_v51 }
 0x733   : > { %10992 = vmatmul.mubr.msk.f32.gmra.mrb[10].mxu1 %vm3862_vm2, %v7185_v49 }
 0x734   : > { %10994 = vmatprep.mubr.msk.f32.mxu1 %vm3862_vm2, %v7186_v29 }
 0x737   : > { %10995 = vmatmul.mubr.msk.f32.gmra.mrb[12].mxu1 %vm3862_vm2, %v7187_v1 }
 0x738   : > { %10997 = vmatprep.mubr.msk.f32.mxu1 %vm3862_vm2, %v7188_v11 }
 0x73b   : > { %10998 = vmatmul.mubr.msk.f32.gmra.mrb[14].mxu1 %vm3862_vm2, %v7189_v3 }
 0x73c   : > { %11000 = vmatprep.mubr.msk.f32.mxu1 %vm3862_vm2, %v7190_v20 }
 0x73f   : > { %11001 = vmatmul.mubr.msk.f32.gmra.mrb[16].mxu1 %vm3862_vm2, %v7191_v0 }
 0x740   : > { %11003 = vmatprep.mubr.msk.f32.mxu1 %vm3862_vm2, %v7192_v36 }
 0x743   : > { %11004 = vmatmul.mubr.msk.f32.gmra.mrb[18].mxu1 %vm3862_vm2, %v7193_v48 }
 0x744   : > { %11006 = vmatprep.mubr.msk.f32.mxu1 %vm3862_vm2, %v7194_v50 }
 0x747   : > { %11007 = vmatmul.mubr.msk.f32.gmra.mrb[20].mxu1 %vm3862_vm2, %v7195_v63 }
 0x748   : > { %11009 = vmatprep.mubr.msk.f32.mxu1 %vm3862_vm2, %v7196_v13 }
 0x74b   : > { %11010 = vmatmul.mubr.msk.f32.gmra.mrb[22].mxu1 %vm3862_vm2, %v7197_v53 }
 0x74c   : > { %11012 = vmatprep.mubr.msk.f32.mxu1 %vm3862_vm2, %v7198_v39 }
 0x74f   : > { %11013 = vmatmul.mubr.msk.f32.gmra.mrb[24].mxu1 %vm3862_vm2, %v7199_v41 }
 0x750   : > { %11015 = vmatprep.mubr.msk.f32.mxu1 %vm3862_vm2, %v7200_v55 }
 0x753   : > { %11016 = vmatmul.mubr.msk.f32.gmra.mrb[26].mxu1 %vm3862_vm2, %v7201_v57 }
 0x754   : > { %11018 = vmatprep.mubr.msk.f32.mxu1 %vm3862_vm2, %v7202_v59 }
 0x757   : > { %11019 = vmatmul.mubr.msk.f32.gmra.mrb[28].mxu1 %vm3862_vm2, %v7203_v56 }
 0x758   : > { %11021 = vmatprep.mubr.msk.f32.mxu1 %vm3862_vm2, %v14282_v31  ;;  %v15392_v31 = vld [vmem:[#allocation33_spill] sm:$0xff] }
 0x75b   : > { %11022 = vmatmul.mubr.msk.f32.gmra.mrb[30].mxu1 %vm3862_vm2, %v14286_v60  ;;  %v7599_v60 = vld [vmem:[#allocation2 + $0x19a] sm:$0xff] }
 0x75c   : > { %11024 = vmatprep.mubr.msk.f32.mxu1 %vm3862_vm2, %v7206_v9 }
 0x75f   : > { %11025 = vmatmul.mubr.msk.f32.gmra.mrb[32].mxu1 %vm3862_vm2, %v7207_v58 }
 0x760   : > { %11043 = vmatprep.mubr.msk.f32.mxu1 %vm3862_vm2, %v13988_v14  ;;  %v15390_v14 = vld [vmem:[#allocation30_spill] sm:$0xff] }
 0x763   : > { %11044 = vmatmul.mubr.msk.f32.vlgmr.msra.gmra.mrb[2].mxu1 %vm3862_vm2, %v15361_v2  ;;  %v15393_v2 = vld [vmem:[#allocation12_spill] sm:$0xff] }
 0x764   : > { %11046 = vmatprep.mubr.msk.f32.mxu1 %vm3862_vm2, %v14002_v35  ;;  %v15389_v35 = vld [vmem:[#allocation28_spill] sm:$0xff] }
 0x767   : > { %11047 = vmatmul.mubr.msk.f32.gmra.mrb[4].mxu1 %vm3862_vm2, %v14006_v34  ;;  %v15391_v34 = vld [vmem:[#allocation31_spill] sm:$0xff] }
 0x768   : > { %11049 = vmatprep.mubr.msk.f32.mxu1 %vm3862_vm2, %v15362_v45  ;;  %v7600_v45 = vld [vmem:[#allocation2 + $0x1a2] sm:$0xff] }
 0x76b   : > { %11050 = vmatmul.mubr.msk.f32.gmra.mrb[6].mxu1 %vm3862_vm2, %v15363_v54  ;;  %v15394_v54 = vmov 0.0  }
 0x76c   : > { %11052 = vmatprep.mubr.msk.f32.mxu1 %vm3862_vm2, %v15364_v16  ;;  %v8033_v16 = vld [vmem:[%s15064_s9] sm:$0xff] }
 0x76f   : > { %11053 = vmatmul.mubr.msk.f32.gmra.mrb[8].mxu1 %vm3862_vm2, %v15365_v37  ;;  %v8034_v37 = vld [vmem:[%s15064_s9 + $0x8] sm:$0xff] }
 0x770   : > { %11055 = vmatprep.mubr.msk.f32.mxu1 %vm3862_vm2, %v15366_v18  ;;  %v11298_v18 = vpack.c.bf16 %v8034_v37, %v8033_v16 }
 0x772   : > { %11299 = vmatpush3.bf16.msra.mxu1 %v11298_v18  ;;  %11311 = vmatpush3.bf16.msra.mxu0 %v11298_v18 }
 0x773   : > { %11056 = vmatmul.mubr.msk.f32.gmra.mrb[10].mxu1 %vm3862_vm2, %v15367_v17  ;;  %11300 = vmatprep.subr.bf16.mxu1 %v15388_v51  ;;  %v8035_v17 = vld [vmem:[%s15064_s9 + $0x10] sm:$0xff] }
 0x774   : > { %11058 = vmatprep.mubr.msk.f32.mxu1 %vm3862_vm2, %v15368_v30  ;;  %11312 = vmatprep.subr.bf16.mxu0 %v15388_v51  ;;  %v8036_v30 = vld [vmem:[%s15064_s9 + $0x18] sm:$0xff] }
 0x777   : > { %11059 = vmatmul.mubr.msk.f32.gmra.mrb[12].mxu1 %vm3862_vm2, %v15369_v43  ;;  %v11301_v43 = vpack.c.bf16 %v8036_v30, %v8035_v17 }
 0x778   : > { %11061 = vmatprep.mubr.msk.f32.mxu1 %vm3862_vm2, %v15370_v42  ;;  %v8037_v42 = vld [vmem:[%s15064_s9 + $0x20] sm:$0xff] }
 0x779   : > { %11302 = vmatpush3.bf16.msra.mxu1 %v11301_v43  ;;  %11314 = vmatpush3.bf16.msra.mxu0 %v11301_v43 }
 0x77a   : > { %11303 = vmatprep.subr.bf16.mxu1 %v15388_v51  ;;  %11315 = vmatprep.subr.bf16.mxu0 %v15388_v51 }
 0x77b   : > { %11062 = vmatmul.mubr.msk.f32.gmra.mrb[14].mxu1 %vm3862_vm2, %v15371_v52  ;;  %v8038_v52 = vld [vmem:[%s15064_s9 + $0x28] sm:$0xff] }
 0x77c   : > { %11064 = vmatprep.mubr.msk.f32.mxu1 %vm3862_vm2, %v15372_v32  ;;  %v11304_v32 = vpack.c.bf16 %v8038_v52, %v8037_v42 }
 0x77e   : > { %11305 = vmatpush3.bf16.msra.mxu1 %v11304_v32  ;;  %11317 = vmatpush3.bf16.msra.mxu0 %v11304_v32 }
 0x77f   : > { %11065 = vmatmul.mubr.msk.f32.gmra.mrb[16].mxu1 %vm3862_vm2, %v15373_v62  ;;  %11306 = vmatprep.subr.bf16.mxu1 %v15388_v51  ;;  %v8039_v62 = vld [vmem:[%s15064_s9 + $0x30] sm:$0xff] }
 0x780   : > { %11067 = vmatprep.mubr.msk.f32.mxu1 %vm3862_vm2, %v15374_v61  ;;  %11318 = vmatprep.subr.bf16.mxu0 %v15388_v51  ;;  %v8040_v61 = vld [vmem:[%s15064_s9 + $0x38] sm:$0xff] }
 0x783   : > { %11068 = vmatmul.mubr.msk.f32.gmra.mrb[18].mxu1 %vm3862_vm2, %v15375_v4  ;;  %v11307_v4 = vpack.c.bf16 %v8040_v61, %v8039_v62 }
 0x784   : > { %11070 = vmatprep.mubr.msk.f32.mxu1 %vm3862_vm2, %v15376_v24 }
 0x785   : > { %11308 = vmatpush3.bf16.msra.mxu1 %v11307_v4  ;;  %11320 = vmatpush3.bf16.msra.mxu0 %v11307_v4 }
 0x787   : > { %11071 = vmatmul.mubr.msk.f32.gmra.mrb[20].mxu1 %vm3862_vm2, %v15377_v25 }
 0x788   : > { %11073 = vmatprep.mubr.msk.f32.mxu1 %vm3862_vm2, %v15378_v26 }
 0x78b   : > { %11074 = vmatmul.mubr.msk.f32.gmra.mrb[22].mxu1 %vm3862_vm2, %v15379_v44 }
 0x78c   : > { %11076 = vmatprep.mubr.msk.f32.mxu1 %vm3862_vm2, %v15380_v19 }
 0x78f   : > { %11077 = vmatmul.mubr.msk.f32.gmra.mrb[24].mxu1 %vm3862_vm2, %v15381_v7 }
 0x790   : > { %11079 = vmatprep.mubr.msk.f32.mxu1 %vm3862_vm2, %v15382_v12 }
 0x793   : > { %11080 = vmatmul.mubr.msk.f32.gmra.mrb[26].mxu1 %vm3862_vm2, %v15389_v35 }
 0x794   : > { %11082 = vmatprep.mubr.msk.f32.mxu1 %vm3862_vm2, %v15390_v14 }
 0x797   : > { %11083 = vmatmul.mubr.msk.f32.gmra.mrb[28].mxu1 %vm3862_vm2, %v15391_v34 }
 0x798   : > { %11085 = vmatprep.mubr.msk.f32.mxu1 %vm3862_vm2, %v15392_v31 }
 0x79b   : > { %11086 = vmatmul.mubr.msk.f32.gmra.mrb[30].mxu1 %vm3862_vm2, %v15393_v2 }
 0x79c   : > { %11088 = vmatprep.mubr.msk.f32.mxu1 %vm3862_vm2, %v7599_v60 }
 0x79f   : > { %11089 = vmatmul.mubr.msk.f32.gmra.mrb[32].mxu1 %vm3862_vm2, %v7600_v45 }
 0x7a0   : > { %11107 = vmatprep.mubr.msk.f32.mxu1 %vm11859_vm4, %v15394_v54 }
 0x836   : > { %v14615_v24 = vpop.f32.mrb[2].mxu1 }
 0x837   : > { %v7965_v25 = vsel %vm3862_vm2, %v14615_v24, 0.0  ;;  %v14619_v26 = vpop.f32.mrb[3].mxu1 }
 0x838   : > { %v7964_v44 = vsel %vm3862_vm2, %v14619_v26, 0.0 }
 0x839   : > { %v7966_v19 = vadd.f32 %v7965_v25, %v7964_v44 }
 0x83a   : > { %v14623_v7 = vpop.f32.mrb[4].mxu1 }
 0x83b   : > { %v14625_v12 = vpop.f32.mrb[5].mxu1  ;;  %v7969_v38 = vsel %vm3862_vm2, %v14623_v7, 0.0 }
 0x83c   : > { %v7967_v6 = vsel %vm3862_vm2, %v14625_v12, 0.0 }
 0x83d   : > { %v7968_v10 = vadd.f32 %v7967_v6, %v7966_v19 }
 0x83e   : > { %v14631_v33 = vpop.f32.mrb[6].mxu1 }
 0x83f   : > { %v14633_v5 = vpop.f32.mrb[7].mxu1  ;;  %v7970_v21 = vadd.f32 %v7969_v38, %v7968_v10  ;;  %v7973_v15 = vsel %vm3862_vm2, %v14631_v33, 0.0 }
 0x840   : > { %v7971_v8 = vsel %vm3862_vm2, %v14633_v5, 0.0 }
 0x841   : > { %v7972_v40 = vadd.f32 %v7971_v8, %v7970_v21 }
 0x842   : > { %v14639_v23 = vpop.f32.mrb[8].mxu1 }
 0x843   : > { %v14641_v22 = vpop.f32.mrb[9].mxu1  ;;  %v7974_v27 = vadd.f32 %v7973_v15, %v7972_v40  ;;  %v7977_v47 = vsel %vm3862_vm2, %v14639_v23, 0.0 }
 0x844   : > { %v7975_v46 = vsel %vm3862_vm2, %v14641_v22, 0.0 }
 0x845   : > { %v7976_v28 = vadd.f32 %v7975_v46, %v7974_v27 }
 0x846   : > { %v14647_v51 = vpop.f32.mrb[10].mxu1 }
 0x847   : > { %v14649_v49 = vpop.f32.mrb[11].mxu1  ;;  %v7978_v29 = vadd.f32 %v7977_v47, %v7976_v28  ;;  %v7981_v3 = vsel %vm3862_vm2, %v14647_v51, 0.0 }
 0x848   : > { %v7979_v1 = vsel %vm3862_vm2, %v14649_v49, 0.0 }
 0x849   : > { %v7980_v11 = vadd.f32 %v7979_v1, %v7978_v29 }
 0x84a   : > { %v14655_v20 = vpop.f32.mrb[12].mxu1 }
 0x84b   : > { %v14657_v0 = vpop.f32.mrb[13].mxu1  ;;  %v7982_v36 = vadd.f32 %v7981_v3, %v7980_v11  ;;  %v7985_v63 = vsel %vm3862_vm2, %v14655_v20, 0.0 }
 0x84c   : > { %v7983_v48 = vsel %vm3862_vm2, %v14657_v0, 0.0 }
 0x84d   : > { %v7984_v50 = vadd.f32 %v7983_v48, %v7982_v36 }
 0x84e   : > { %v14663_v13 = vpop.f32.mrb[14].mxu1 }
 0x84f   : > { %v14665_v53 = vpop.f32.mrb[15].mxu1  ;;  %v7986_v39 = vadd.f32 %v7985_v63, %v7984_v50  ;;  %v7989_v57 = vsel %vm3862_vm2, %v14663_v13, 0.0 }
 0x850   : > { %v7987_v41 = vsel %vm3862_vm2, %v14665_v53, 0.0 }
 0x851   : > { %v7988_v55 = vadd.f32 %v7987_v41, %v7986_v39 }
 0x852   : > { %v14671_v59 = vpop.f32.mrb[16].mxu1 }
 0x853   : > { %v14673_v56 = vpop.f32.mrb[17].mxu1  ;;  %v7990_v9 = vadd.f32 %v7989_v57, %v7988_v55  ;;  %v7993_v14 = vsel %vm3862_vm2, %v14671_v59, 0.0 }
 0x854   : > { %v7991_v58 = vsel %vm3862_vm2, %v14673_v56, 0.0 }
 0x855   : > { %v7992_v35 = vadd.f32 %v7991_v58, %v7990_v9 }
 0x856   : > { %v14679_v34 = vpop.f32.mrb[18].mxu1 }
 0x857   : > { %v14681_v31 = vpop.f32.mrb[19].mxu1  ;;  %v7994_v60 = vadd.f32 %v7993_v14, %v7992_v35  ;;  %v7997_v54 = vsel %vm3862_vm2, %v14679_v34, 0.0 }
 0x858   : > { %v7995_v2 = vsel %vm3862_vm2, %v14681_v31, 0.0 }
 0x859   : > { %v7996_v45 = vadd.f32 %v7995_v2, %v7994_v60 }
 0x85a   : > { %v14687_v16 = vpop.f32.mrb[20].mxu1 }
 0x85b   : > { %v14689_v37 = vpop.f32.mrb[21].mxu1  ;;  %v7998_v18 = vadd.f32 %v7997_v54, %v7996_v45  ;;  %v8001_v43 = vsel %vm3862_vm2, %v14687_v16, 0.0 }
 0x85c   : > { %v7999_v17 = vsel %vm3862_vm2, %v14689_v37, 0.0 }
 0x85d   : > { %v8000_v30 = vadd.f32 %v7999_v17, %v7998_v18 }
 0x85e   : > { %v14695_v42 = vpop.f32.mrb[22].mxu1 }
 0x85f   : > { %v14697_v52 = vpop.f32.mrb[23].mxu1  ;;  %v8002_v32 = vadd.f32 %v8001_v43, %v8000_v30  ;;  %v8005_v4 = vsel %vm3862_vm2, %v14695_v42, 0.0 }
 0x860   : > { %v8003_v62 = vsel %vm3862_vm2, %v14697_v52, 0.0 }
 0x861   : > { %v8004_v61 = vadd.f32 %v8003_v62, %v8002_v32 }
 0x862   : > { %v14703_v25 = vpop.f32.mrb[24].mxu1 }
 0x863   : > { %v14705_v44 = vpop.f32.mrb[25].mxu1  ;;  %v8006_v19 = vadd.f32 %v8005_v4, %v8004_v61  ;;  %v8009_v38 = vsel %vm3862_vm2, %v14703_v25, 0.0  ;;  %v15395_v61 = vld [vmem:[#allocation11_spill] sm:$0xff] }
 0x864   : > { %v8007_v6 = vsel %vm3862_vm2, %v14705_v44, 0.0 }
 0x865   : > { %v8008_v10 = vadd.f32 %v8007_v6, %v8006_v19 }
 0x866   : > { %v11081_v21 = vpop.f32.mrb[26].mxu1 }
 0x867   : > { %v7891_v8 = vpop.f32.mrb[27].mxu1  ;;  %v8010_v40 = vadd.f32 %v8009_v38, %v8008_v10  ;;  %v8013_v46 = vsel %vm3862_vm2, %v11081_v21, 0.0 }
 0x868   : > { %v8011_v15 = vsel %vm3862_vm2, %v7891_v8, 0.0 }
 0x869   : > { %v8012_v27 = vadd.f32 %v8011_v15, %v8010_v40 }
 0x86a   : > { %v11084_v28 = vpop.f32.mrb[28].mxu1 }
 0x86b   : > { %v7901_v47 = vpop.f32.mrb[29].mxu1  ;;  %v8014_v29 = vadd.f32 %v8013_v46, %v8012_v27  ;;  %v8017_v3 = vsel %vm3862_vm2, %v11084_v28, 0.0 }
 0x86c   : > { %v8015_v1 = vsel %vm3862_vm2, %v7901_v47, 0.0 }
 0x86d   : > { %v8016_v11 = vadd.f32 %v8015_v1, %v8014_v29 }
 0x86e   : > { %v11087_v36 = vpop.f32.mrb[30].mxu1 }
 0x86f   : > { %v7911_v48 = vpop.f32.mrb[31].mxu1  ;;  %v8018_v50 = vadd.f32 %v8017_v3, %v8016_v11  ;;  %v8021_v41 = vsel %vm3862_vm2, %v11087_v36, 0.0 }
 0x870   : > { %v8019_v63 = vsel %vm3862_vm2, %v7911_v48, 0.0 }
 0x871   : > { %v8020_v39 = vadd.f32 %v8019_v63, %v8018_v50 }
 0x872   : > { %v11090_v55 = vpop.f32.mrb[32].mxu1 }
 0x873   : > { %v7921_v57 = vpop.f32.mrb[33].mxu1  ;;  %v8022_v9 = vadd.f32 %v8021_v41, %v8020_v39  ;;  %v8025_v14 = vsel %vm3862_vm2, %v11090_v55, 0.0 }
 0x874   : > { %v8023_v58 = vsel %vm3862_vm2, %v7921_v57, 0.0 }
 0x875   : > { %v8024_v35 = vadd.f32 %v8023_v58, %v8022_v9 }
 0x877   : > { %v8026_v60 = vadd.f32 %v8025_v14, %v8024_v35 }
 0x879   : > { %v8027_v2 = vrot.slane %v8026_v60, 4 }
 0x87b   : > { %v8028_v45 = vadd.f32 %v8027_v2, %v8026_v60 }
 0x87d   : > { %v8029_v54 = vrot.slane %v8028_v45, 2 }
 0x87f   : > { %v8030_v18 = vadd.f32 %v8029_v54, %v8028_v45 }
 0x881   : > { %v8031_v17 = vrot.slane %v8030_v18, 1 }
 0x883   : > { %v8032_v30 = vadd.f32 %v8031_v17, %v8030_v18 }
 0x885   : > { %11108 = vmatmul.mubr.msk.f32.vlgmr.msra.gmra.mrb[34].mxu1 %vm3862_vm2, %v8032_v30 }
 0x958   : > { %v8110_v43 = vpop.f32.mrb[34].mxu1 }
 0x959   : > { %v8114_v32 = vmul.f32 0.001953125, %v8110_v43  ;;  %v11109_v62 = vpop.f32.mrb[35].mxu1 }
 0x95b   : > { %v8118_v4 = vrot.slane %v8114_v32, %v15395_v61 }
 0x95d   : > { %v14722_v19 = vsub.f32 %v14619_v26, %v8118_v4  ;;  %v14725_v6 = vsub.f32 %v14615_v24, %v8118_v4  ;;  %v14728_v10 = vsub.f32 %v14625_v12, %v8118_v4  ;;  %v14731_v38 = vsub.f32 %v14623_v7, %v8118_v4 }
 0x95e   : > { %v14734_v40 = vsub.f32 %v14633_v5, %v8118_v4  ;;  %v14737_v15 = vsub.f32 %v14631_v33, %v8118_v4  ;;  %v14740_v27 = vsub.f32 %v14641_v22, %v8118_v4  ;;  %v14743_v26 = vsub.f32 %v14639_v23, %v8118_v4 }
 0x95f   : > { %v14746_v24 = vsub.f32 %v14649_v49, %v8118_v4  ;;  %v14749_v12 = vsub.f32 %v14647_v51, %v8118_v4  ;;  %v14752_v7 = vsub.f32 %v14657_v0, %v8118_v4  ;;  %v14755_v5 = vsub.f32 %v14655_v20, %v8118_v4 }
 0x960   : > { %v14758_v33 = vsub.f32 %v14665_v53, %v8118_v4  ;;  %v14761_v22 = vsub.f32 %v14663_v13, %v8118_v4  ;;  %v14764_v23 = vsub.f32 %v14673_v56, %v8118_v4  ;;  %v14767_v49 = vsub.f32 %v14671_v59, %v8118_v4 }
 0x961   : > { %v14770_v51 = vsub.f32 %v14681_v31, %v8118_v4  ;;  %v14773_v0 = vsub.f32 %v14679_v34, %v8118_v4  ;;  %v14776_v20 = vsub.f32 %v14689_v37, %v8118_v4  ;;  %v14779_v53 = vsub.f32 %v14687_v16, %v8118_v4 }
 0x962   : > { %v14782_v13 = vsub.f32 %v14697_v52, %v8118_v4  ;;  %v14785_v56 = vsub.f32 %v14695_v42, %v8118_v4  ;;  %v14788_v59 = vsub.f32 %v14705_v44, %v8118_v4  ;;  %v14791_v31 = vsub.f32 %v14703_v25, %v8118_v4 }
 0x963   : > { %v14793_v34 = vsub.f32 %v7891_v8, %v8118_v4  ;;  %v14795_v46 = vsub.f32 %v11081_v21, %v8118_v4  ;;  %v14797_v37 = vsub.f32 %v7901_v47, %v8118_v4  ;;  %v14799_v16 = vsub.f32 %v11084_v28, %v8118_v4 }
 0x964   : > { %v14801_v29 = vsub.f32 %v7911_v48, %v8118_v4  ;;  %v14803_v52 = vsub.f32 %v11087_v36, %v8118_v4  ;;  %v14805_v42 = vsub.f32 %v7921_v57, %v8118_v4  ;;  %v14807_v1 = vsub.f32 %v11090_v55, %v8118_v4 }
 0x965   : > { %v8151_v25 = vmul.f32 %v14722_v19, %v14722_v19  ;;  %v8152_v44 = vmul.f32 %v14725_v6, %v14725_v6  ;;  %v8153_v21 = vmul.f32 %v14728_v10, %v14728_v10  ;;  %v8154_v8 = vmul.f32 %v14731_v38, %v14731_v38 }
 0x966   : > { %v8155_v3 = vmul.f32 %v14734_v40, %v14734_v40  ;;  %v8156_v50 = vmul.f32 %v14737_v15, %v14737_v15  ;;  %v8157_v41 = vmul.f32 %v14740_v27, %v14740_v27  ;;  %v8158_v9 = vmul.f32 %v14743_v26, %v14743_v26 }
 0x967   : > { %v8183_v28 = vsel %vm3862_vm2, %v8151_v25, 0.0  ;;  %v8184_v47 = vsel %vm3862_vm2, %v8152_v44, 0.0  ;;  %v8186_v36 = vsel %vm3862_vm2, %v8153_v21, 0.0  ;;  %v8188_v63 = vsel %vm3862_vm2, %v8154_v8, 0.0 }
 0x968   : > { %v8185_v11 = vadd.f32 %v8184_v47, %v8183_v28  ;;  %v8190_v55 = vsel %vm3862_vm2, %v8155_v3, 0.0  ;;  %v8192_v58 = vsel %vm3862_vm2, %v8156_v50, 0.0  ;;  %v8159_v14 = vmul.f32 %v14746_v24, %v14746_v24 }
 0x969   : > { %v8194_v60 = vsel %vm3862_vm2, %v8157_v41, 0.0  ;;  %v8160_v45 = vmul.f32 %v14749_v12, %v14749_v12  ;;  %v8196_v54 = vsel %vm3862_vm2, %v8158_v9, 0.0  ;;  %v8161_v17 = vmul.f32 %v14752_v7, %v14752_v7 }
 0x96a   : > { %v8187_v48 = vadd.f32 %v8186_v36, %v8185_v11  ;;  %v8198_v30 = vsel %vm3862_vm2, %v8159_v14, 0.0  ;;  %v8162_v32 = vmul.f32 %v14755_v5, %v14755_v5  ;;  %v8163_v25 = vmul.f32 %v14758_v33, %v14758_v33 }
 0x96b   : > { %v8200_v62 = vsel %vm3862_vm2, %v8160_v45, 0.0  ;;  %v8202_v44 = vsel %vm3862_vm2, %v8161_v17, 0.0  ;;  %v8164_v8 = vmul.f32 %v14761_v22, %v14761_v22  ;;  %v8165_v11 = vmul.f32 %v14764_v23, %v14764_v23 }
 0x96c   : > { %v8189_v39 = vadd.f32 %v8188_v63, %v8187_v48  ;;  %v8204_v28 = vsel %vm3862_vm2, %v8162_v32, 0.0  ;;  %v8206_v3 = vsel %vm3862_vm2, %v8163_v25, 0.0  ;;  %v8166_v48 = vmul.f32 %v14767_v49, %v14767_v49 }
 0x96d   : > { %v8208_v50 = vsel %vm3862_vm2, %v8164_v8, 0.0  ;;  %v8210_v41 = vsel %vm3862_vm2, %v8165_v11, 0.0 }
 0x96e   : > { %v8191_v57 = vadd.f32 %v8190_v55, %v8189_v39  ;;  %v8167_v39 = vmul.f32 %v14770_v51, %v14770_v51  ;;  %v8212_v9 = vsel %vm3862_vm2, %v8166_v48, 0.0 }
 0x970   : > { %v8193_v35 = vadd.f32 %v8192_v58, %v8191_v57  ;;  %v8168_v57 = vmul.f32 %v14773_v0, %v14773_v0  ;;  %v8214_v14 = vsel %vm3862_vm2, %v8167_v39, 0.0 }
 0x972   : > { %v8195_v2 = vadd.f32 %v8194_v60, %v8193_v35  ;;  %v8169_v35 = vmul.f32 %v14776_v20, %v14776_v20  ;;  %v8216_v45 = vsel %vm3862_vm2, %v8168_v57, 0.0 }
 0x974   : > { %v8197_v18 = vadd.f32 %v8196_v54, %v8195_v2  ;;  %v8170_v2 = vmul.f32 %v14779_v53, %v14779_v53  ;;  %v8218_v17 = vsel %vm3862_vm2, %v8169_v35, 0.0 }
 0x976   : > { %v8199_v43 = vadd.f32 %v8198_v30, %v8197_v18  ;;  %v8171_v18 = vmul.f32 %v14782_v13, %v14782_v13  ;;  %v8220_v32 = vsel %vm3862_vm2, %v8170_v2, 0.0 }
 0x978   : > { %v8201_v4 = vadd.f32 %v8200_v62, %v8199_v43  ;;  %v8172_v43 = vmul.f32 %v14785_v56, %v14785_v56  ;;  %v8222_v25 = vsel %vm3862_vm2, %v8171_v18, 0.0 }
 0x97a   : > { %v8203_v21 = vadd.f32 %v8202_v44, %v8201_v4  ;;  %v8173_v4 = vmul.f32 %v14788_v59, %v14788_v59  ;;  %v8224_v8 = vsel %vm3862_vm2, %v8172_v43, 0.0 }
 0x97c   : > { %v8205_v47 = vadd.f32 %v8204_v28, %v8203_v21  ;;  %v8174_v21 = vmul.f32 %v14791_v31, %v14791_v31  ;;  %v8226_v11 = vsel %vm3862_vm2, %v8173_v4, 0.0 }
 0x97e   : > { %v8207_v36 = vadd.f32 %v8206_v3, %v8205_v47  ;;  %v8175_v47 = vmul.f32 %v14793_v34, %v14793_v34  ;;  %v8228_v48 = vsel %vm3862_vm2, %v8174_v21, 0.0 }
 0x980   : > { %v8209_v63 = vadd.f32 %v8208_v50, %v8207_v36  ;;  %v8176_v36 = vmul.f32 %v14795_v46, %v14795_v46  ;;  %v8230_v39 = vsel %vm3862_vm2, %v8175_v47, 0.0 }
 0x982   : > { %v8211_v55 = vadd.f32 %v8210_v41, %v8209_v63  ;;  %v8177_v63 = vmul.f32 %v14797_v37, %v14797_v37  ;;  %v8232_v57 = vsel %vm3862_vm2, %v8176_v36, 0.0 }
 0x984   : > { %v8213_v58 = vadd.f32 %v8212_v9, %v8211_v55  ;;  %v8178_v55 = vmul.f32 %v14799_v16, %v14799_v16  ;;  %v8234_v35 = vsel %vm3862_vm2, %v8177_v63, 0.0 }
 0x986   : > { %v8215_v60 = vadd.f32 %v8214_v14, %v8213_v58  ;;  %v8179_v58 = vmul.f32 %v14801_v29, %v14801_v29  ;;  %v8236_v2 = vsel %vm3862_vm2, %v8178_v55, 0.0 }
 0x988   : > { %v8217_v54 = vadd.f32 %v8216_v45, %v8215_v60  ;;  %v8180_v60 = vmul.f32 %v14803_v52, %v14803_v52  ;;  %v8238_v18 = vsel %vm3862_vm2, %v8179_v58, 0.0 }
 0x98a   : > { %v8219_v30 = vadd.f32 %v8218_v17, %v8217_v54  ;;  %v8181_v54 = vmul.f32 %v14805_v42, %v14805_v42  ;;  %v8240_v43 = vsel %vm3862_vm2, %v8180_v60, 0.0 }
 0x98c   : > { %v8221_v62 = vadd.f32 %v8220_v32, %v8219_v30  ;;  %v8182_v30 = vmul.f32 %v14807_v1, %v14807_v1 }
 0x98e   : > { %v8223_v44 = vadd.f32 %v8222_v25, %v8221_v62  ;;  %v8242_v62 = vsel %vm3862_vm2, %v8181_v54, 0.0  ;;  %v8244_v25 = vsel %vm3862_vm2, %v8182_v30, 0.0 }
 0x990   : > { %v8225_v28 = vadd.f32 %v8224_v8, %v8223_v44 }
 0x992   : > { %v8227_v3 = vadd.f32 %v8226_v11, %v8225_v28 }
 0x994   : > { %v8229_v50 = vadd.f32 %v8228_v48, %v8227_v3 }
 0x996   : > { %v8231_v41 = vadd.f32 %v8230_v39, %v8229_v50  ;;  %v7962_v39 = vld [vmem:[%s15062_s7] sm:$0x1] }
 0x998   : > { %v8233_v9 = vadd.f32 %v8232_v57, %v8231_v41 }
 0x99a   : > { %v8235_v14 = vadd.f32 %v8234_v35, %v8233_v9 }
 0x99c   : > { %v8237_v45 = vadd.f32 %v8236_v2, %v8235_v14 }
 0x99e   : > { %v8239_v17 = vadd.f32 %v8238_v18, %v8237_v45 }
 0x9a0   : > { %v8241_v32 = vadd.f32 %v8240_v43, %v8239_v17 }
 0x9a2   : > { %v8243_v4 = vadd.f32 %v8242_v62, %v8241_v32 }
 0x9a4   : > { %v8245_v44 = vadd.f32 %v8244_v25, %v8243_v4 }
 0x9a6   : > { %v8246_v21 = vrot.slane %v8245_v44, 4 }
 0x9a8   : > { %v8247_v8 = vadd.f32 %v8246_v21, %v8245_v44 }
 0x9aa   : > { %v8248_v28 = vrot.slane %v8247_v8, 2 }
 0x9ac   : > { %v8249_v47 = vadd.f32 %v8248_v28, %v8247_v8 }
 0x9ae   : > { %v8250_v11 = vrot.slane %v8249_v47, 1 }
 0x9b0   : > { %v8251_v3 = vadd.f32 %v8250_v11, %v8249_v47 }
 0x9b2   : > { %11127 = vmatmul.mubr.msk.f32.vlgmr.msra.gmra.mrb[34].mxu0 %vm3862_vm2, %v8251_v3 }
 0xa85   : > { %v8321_v36 = vpop.f32.mrb[34].mxu0 }
 0xa86   : > { %v8325_v48 = vmul.f32 0.001953125, %v8321_v36  ;;  %v11128_v50 = vpop.f32.mrb[35].mxu0 }
 0xa88   : > { %v8326_v63 = vadd.f32 1e-05, %v8325_v48 }
 0xa8a   : > { %11847 = vrsqrt.f32 %v8326_v63 }
 0xa94   : > { %v11848_v41 = vpop.eup %11847 }
 0xa95   : > { %v8328_v55 = vmul.f32 %v11848_v41, %v7962_v39 }
 0xa97   : > { %v8333_v57 = vrot.slane %v8328_v55, %v15395_v61 }
 0xa99   : > { %v8335_v9 = vmul.f32 %v8333_v57, %v14722_v19  ;;  %v8336_v58 = vmul.f32 %v8333_v57, %v14725_v6  ;;  %v8337_v35 = vmul.f32 %v8333_v57, %v14728_v10  ;;  %v8338_v14 = vmul.f32 %v8333_v57, %v14731_v38 }
 0xa9a   : > { %v8339_v60 = vmul.f32 %v8333_v57, %v14734_v40  ;;  %v8340_v2 = vmul.f32 %v8333_v57, %v14737_v15  ;;  %v8341_v45 = vmul.f32 %v8333_v57, %v14740_v27  ;;  %v8342_v54 = vmul.f32 %v8333_v57, %v14743_v26 }
 0xa9b   : > { %v8343_v18 = vmul.f32 %v8333_v57, %v14746_v24  ;;  %v8344_v61 = vmul.f32 %v8333_v57, %v14749_v12  ;;  %v8345_v19 = vmul.f32 %v8333_v57, %v14752_v7  ;;  %v8346_v6 = vmul.f32 %v8333_v57, %v14755_v5  ;;  %v9329_v7 = vld [vmem:[%s15063_s8] ss:$0 sm:$0xff] }
 0xa9c   : > { %v8347_v10 = vmul.f32 %v8333_v57, %v14758_v33  ;;  %v8348_v38 = vmul.f32 %v8333_v57, %v14761_v22  ;;  %v8349_v40 = vmul.f32 %v8333_v57, %v14764_v23  ;;  %v8350_v15 = vmul.f32 %v8333_v57, %v14767_v49 }
 0xa9d   : > { %v8351_v27 = vmul.f32 %v8333_v57, %v14770_v51  ;;  %v8352_v26 = vmul.f32 %v8333_v57, %v14773_v0  ;;  %v8353_v24 = vmul.f32 %v8333_v57, %v14776_v20  ;;  %v8354_v12 = vmul.f32 %v8333_v57, %v14779_v53 }
 0xa9e   : > { %v8355_v5 = vmul.f32 %v8333_v57, %v14782_v13  ;;  %v8356_v33 = vmul.f32 %v8333_v57, %v14785_v56  ;;  %v8357_v22 = vmul.f32 %v8333_v57, %v14788_v59  ;;  %v8358_v23 = vmul.f32 %v8333_v57, %v14791_v31 }
 0xa9f   : > { %v8359_v49 = vmul.f32 %v8333_v57, %v14793_v34  ;;  %v8360_v51 = vmul.f32 %v8333_v57, %v14795_v46  ;;  %v8361_v0 = vmul.f32 %v8333_v57, %v14797_v37  ;;  %v8362_v20 = vmul.f32 %v8333_v57, %v14799_v16 }
 0xaa0   : > { %v8363_v53 = vmul.f32 %v8333_v57, %v14801_v29  ;;  %v8364_v17 = vmul.f32 %v8333_v57, %v14803_v52  ;;  %v8365_v13 = vmul.f32 %v8333_v57, %v14805_v42  ;;  %v8366_v56 = vmul.f32 %v8333_v57, %v14807_v1 }
 0xaa1   : > { %v8373_v30 = vadd.f32 %v9329_v7, %v8335_v9  ;;  %v8374_v59 = vadd.f32 %v9329_v7, %v8336_v58  ;;  %v8375_v43 = vadd.f32 %v9329_v7, %v8337_v35  ;;  %v8376_v31 = vadd.f32 %v9329_v7, %v8338_v14 }
 0xaa2   : > { %v8377_v32 = vadd.f32 %v9329_v7, %v8339_v60  ;;  %v8378_v34 = vadd.f32 %v9329_v7, %v8340_v2  ;;  %v8379_v62 = vadd.f32 %v9329_v7, %v8341_v45  ;;  %v8380_v46 = vadd.f32 %v9329_v7, %v8342_v54 }
 0xaa3   : > { %v8381_v4 = vadd.f32 %v9329_v7, %v8343_v18  ;;  %v8382_v37 = vadd.f32 %v9329_v7, %v8344_v61  ;;  %v8383_v25 = vadd.f32 %v9329_v7, %v8345_v19  ;;  %v8384_v16 = vadd.f32 %v9329_v7, %v8346_v6 }
 0xaa4   : > { %v8385_v44 = vadd.f32 %v9329_v7, %v8347_v10  ;;  %v8386_v29 = vadd.f32 %v9329_v7, %v8348_v38  ;;  %v8387_v52 = vadd.f32 %v9329_v7, %v8349_v40  ;;  %v8388_v21 = vadd.f32 %v9329_v7, %v8350_v15 }
 0xaa5   : > { %v8389_v42 = vadd.f32 %v9329_v7, %v8351_v27  ;;  %v8390_v8 = vadd.f32 %v9329_v7, %v8352_v26  ;;  %v8391_v1 = vadd.f32 %v9329_v7, %v8353_v24  ;;  %v8392_v28 = vadd.f32 %v9329_v7, %v8354_v12 }
 0xaa6   : > { %v14945_v47 = vadd.f32 %v9329_v7, %v8355_v5  ;;  %v14947_v11 = vadd.f32 %v9329_v7, %v8356_v33  ;;  %v14949_v3 = vadd.f32 %v9329_v7, %v8357_v22  ;;  %v14951_v36 = vadd.f32 %v9329_v7, %v8358_v23 }
 0xaa7   : > { %v14953_v48 = vadd.f32 %v9329_v7, %v8359_v49  ;;  %v14955_v50 = vadd.f32 %v9329_v7, %v8360_v51  ;;  %v14957_v63 = vadd.f32 %v9329_v7, %v8361_v0  ;;  %v14959_v39 = vadd.f32 %v9329_v7, %v8362_v20 }
 0xaa8   : > { %v14968_v41 = vadd.f32 %v9329_v7, %v8363_v53  ;;  %v14970_v55 = vadd.f32 %v9329_v7, %v8364_v17  ;;  %v14972_v57 = vadd.f32 %v9329_v7, %v8365_v13  ;;  %v14974_v9 = vadd.f32 %v9329_v7, %v8366_v56 }
 0xaa9   : > { %v8405_v58 = vmax.f32 %v8373_v30, 0.0  ;;  %v8406_v35 = vmax.f32 %v8374_v59, 0.0  ;;  %v8407_v14 = vmax.f32 %v8375_v43, 0.0  ;;  %v8408_v60 = vmax.f32 %v8376_v31, 0.0 }
 0xaaa   : > { %v8409_v2 = vmax.f32 %v8377_v32, 0.0  ;;  %v8410_v45 = vmax.f32 %v8378_v34, 0.0  ;;  %v8411_v54 = vmax.f32 %v8379_v62, 0.0  ;;  %v8412_v18 = vmax.f32 %v8380_v46, 0.0 }
 0xaab   : > { %v8413_v61 = vmax.f32 %v8381_v4, 0.0  ;;  %v8414_v19 = vmax.f32 %v8382_v37, 0.0  ;;  %v8415_v6 = vmax.f32 %v8383_v25, 0.0  ;;  %v8416_v10 = vmax.f32 %v8384_v16, 0.0  ;;  %8437 = vst.msk [vmem:[%s14966_s20] sm:$0xff] %vm3862_vm2, %v8405_v58  ;;  %8438 = vst.msk [vmem:[%s14966_s20 + $0x8] sm:$0xff] %vm3862_vm2, %v8406_v35 }
 0xaac   : > { %8439 = vst.msk [vmem:[%s14966_s20 + $0x10] sm:$0xff] %vm3862_vm2, %v8407_v14  ;;  %8440 = vst.msk [vmem:[%s14966_s20 + $0x18] sm:$0xff] %vm3862_vm2, %v8408_v60  ;;  %v8417_v38 = vmax.f32 %v8385_v44, 0.0  ;;  %v8418_v40 = vmax.f32 %v8386_v29, 0.0  ;;  %v8419_v15 = vmax.f32 %v8387_v52, 0.0  ;;  %v8420_v27 = vmax.f32 %v8388_v21, 0.0 }
 0xaad   : > { %8441 = vst.msk [vmem:[%s14966_s20 + $0x20] sm:$0xff] %vm3862_vm2, %v8409_v2  ;;  %8442 = vst.msk [vmem:[%s14966_s20 + $0x28] sm:$0xff] %vm3862_vm2, %v8410_v45  ;;  %v8421_v26 = vmax.f32 %v8389_v42, 0.0  ;;  %v8422_v24 = vmax.f32 %v8390_v8, 0.0  ;;  %v8423_v12 = vmax.f32 %v8391_v1, 0.0  ;;  %v8424_v7 = vmax.f32 %v8392_v28, 0.0 }
 0xaae   : > { %8443 = vst.msk [vmem:[%s14966_s20 + $0x30] sm:$0xff] %vm3862_vm2, %v8411_v54  ;;  %8444 = vst.msk [vmem:[%s14966_s20 + $0x38] sm:$0xff] %vm3862_vm2, %v8412_v18  ;;  %v8425_v5 = vmax.f32 %v14945_v47, 0.0  ;;  %v8426_v33 = vmax.f32 %v14947_v11, 0.0  ;;  %v8427_v22 = vmax.f32 %v14949_v3, 0.0  ;;  %v8428_v23 = vmax.f32 %v14951_v36, 0.0 }
 0xaaf   : > { %8445 = vst.msk [vmem:[%s14966_s20 + $0x40] sm:$0xff] %vm3862_vm2, %v8413_v61  ;;  %8446 = vst.msk [vmem:[%s14966_s20 + $0x48] sm:$0xff] %vm3862_vm2, %v8414_v19  ;;  %v8429_v49 = vmax.f32 %v14953_v48, 0.0  ;;  %v8430_v51 = vmax.f32 %v14955_v50, 0.0  ;;  %v8431_v0 = vmax.f32 %v14957_v63, 0.0  ;;  %v8432_v20 = vmax.f32 %v14959_v39, 0.0 }
 0xab0   : > { %8447 = vst.msk [vmem:[%s14966_s20 + $0x50] sm:$0xff] %vm3862_vm2, %v8415_v6  ;;  %8448 = vst.msk [vmem:[%s14966_s20 + $0x58] sm:$0xff] %vm3862_vm2, %v8416_v10  ;;  %v8433_v53 = vmax.f32 %v14968_v41, 0.0  ;;  %v8434_v17 = vmax.f32 %v14970_v55, 0.0  ;;  %v8435_v13 = vmax.f32 %v14972_v57, 0.0  ;;  %v8436_v56 = vmax.f32 %v14974_v9, 0.0 }
 0xab1   : > { %8449 = vst.msk [vmem:[%s14966_s20 + $0x60] sm:$0xff] %vm3862_vm2, %v8417_v38  ;;  %8450 = vst.msk [vmem:[%s14966_s20 + $0x68] sm:$0xff] %vm3862_vm2, %v8418_v40 }
 0xab2   : > { %8451 = vst.msk [vmem:[%s14966_s20 + $0x70] sm:$0xff] %vm3862_vm2, %v8419_v15  ;;  %8452 = vst.msk [vmem:[%s14966_s20 + $0x78] sm:$0xff] %vm3862_vm2, %v8420_v27 }
 0xab3   : > { %8453 = vst.msk [vmem:[%s14966_s20 + $0x80] sm:$0xff] %vm3862_vm2, %v8421_v26  ;;  %8454 = vst.msk [vmem:[%s14966_s20 + $0x88] sm:$0xff] %vm3862_vm2, %v8422_v24 }
 0xab4   : > { %8455 = vst.msk [vmem:[%s14966_s20 + $0x90] sm:$0xff] %vm3862_vm2, %v8423_v12  ;;  %8456 = vst.msk [vmem:[%s14966_s20 + $0x98] sm:$0xff] %vm3862_vm2, %v8424_v7 }
 0xab5   : > { %8457 = vst.msk [vmem:[%s14966_s20 + $0xa0] sm:$0xff] %vm3862_vm2, %v8425_v5  ;;  %8458 = vst.msk [vmem:[%s14966_s20 + $0xa8] sm:$0xff] %vm3862_vm2, %v8426_v33 }
 0xab6   : > { %8459 = vst.msk [vmem:[%s14966_s20 + $0xb0] sm:$0xff] %vm3862_vm2, %v8427_v22  ;;  %8460 = vst.msk [vmem:[%s14966_s20 + $0xb8] sm:$0xff] %vm3862_vm2, %v8428_v23 }
 0xab7   : > { %8461 = vst.msk [vmem:[%s14966_s20 + $0xc0] sm:$0xff] %vm3862_vm2, %v8429_v49  ;;  %8462 = vst.msk [vmem:[%s14966_s20 + $0xc8] sm:$0xff] %vm3862_vm2, %v8430_v51 }
 0xab8   : > { %8463 = vst.msk [vmem:[%s14966_s20 + $0xd0] sm:$0xff] %vm3862_vm2, %v8431_v0  ;;  %8464 = vst.msk [vmem:[%s14966_s20 + $0xd8] sm:$0xff] %vm3862_vm2, %v8432_v20 }
 0xab9   : > { %8465 = vst.msk [vmem:[%s14966_s20 + $0xe0] sm:$0xff] %vm3862_vm2, %v8433_v53  ;;  %8466 = vst.msk [vmem:[%s14966_s20 + $0xe8] sm:$0xff] %vm3862_vm2, %v8434_v17 }
 0xaba   : > { %8467 = vst.msk [vmem:[%s14966_s20 + $0xf0] sm:$0xff] %vm3862_vm2, %v8435_v13  ;;  %8468 = vst.msk [vmem:[%s14966_s20 + $0xf8] sm:$0xff] %vm3862_vm2, %v8436_v56 }
 0xabb PF: > { %s20_s13 = sadd.s32 1, %s11855_s13  }
 0xabc   : > { %p17_p4 = scmp.ge.s32.totalorder %s20_s13, 4  }
 0xabe   :  { %19 = sbr.rel (!%p17_p4) target bundleno = 1 (0x1), region = 97 }

</bundles_post_ra>
